<compile_context>
chip_gen: v6e
topology: v6e:2x2x1
jax: 0.10.0
libtpu: 0.0.40
codegen_flags: <defaults>
</compile_context>

<pallas_src>
import numpy as np
import jax
import jax.numpy as jnp
from jax import lax
from jax.experimental import pallas as pl
from jax.experimental.pallas import tpu as pltpu


_POOL_PADS = (0, 0, 1, 1, 0)      # padding_pool of down1..down5
_SEG_FRONT = 128                  # front pad of the packed slab (covers negative tap reads)
_X_MARGIN = 128                   # front margin of the padded-flat input


def _round_up(v, m):
    return (v + m - 1) // m * m


def _build_schedule(h0, w0, c0, couts, pool_pads):
    """Static per-block geometry + lane offsets into the packed output slab."""
    sched = []
    h, w, cin = h0, w0, c0
    off = _SEG_FRONT
    for i, cout in enumerate(couts):
        pp = pool_pads[i]
        hp, wp = h + 2, w + 2                       # zero-padded conv frame
        L = hp * wp
        ho = (h + 2 * pp - 2) // 2 + 1              # maxpool output size
        wo = (w + 2 * pp - 2) // 2 + 1
        hpn, wpn = ho + 2, wo + 2                   # next block's conv frame
        Ln = hpn * wpn
        seg_c = _round_up(L + wp + 1, 128)          # tap over-reads stay inside the segment
        seg_p = _round_up(Ln + wpn + 1, 128)
        off_a, off_b, off_p = off, off + seg_c, off + 2 * seg_c
        off = off_p + seg_p
        sched.append(dict(h=h, w=w, hp=hp, wp=wp, L=L, cin=cin, cout=cout,
                          pp=pp, ho=ho, wo=wo, hpn=hpn, wpn=wpn, Ln=Ln,
                          off_a=off_a, off_b=off_b, off_p=off_p))
        h, w, cin = ho, wo, cout
    return sched, off


# ------------------------------ fused kernel -------------------------------

def _make_down_kernel(sched):
    n_blocks = len(sched)

    def kernel(*refs):
        x_ref = refs[0]
        mask_ref = refs[1]
        blk_refs = []
        p = 2
        for _ in range(n_blocks):
            blk_refs.append(refs[p:p + 5])          # (w_a, b_a, w_b, b_b, sel)
            p += 5
        out_ref = refs[p]                           # packed slab (1, Cmax, TOT)

        # Zero the slab once: supplies the conv zero-padding border rings, the
        # pool padding, and guarantees no reads of uninitialized VMEM.
        out_ref[...] = jnp.zeros_like(out_ref)

        def conv_bn_relu(src_ref, src_base, cin, cout, wp, L, w_ref, b_ref,
                         msk, dst_off):
            # out (Cout, L) = sum_t  W_t (Cout, Cin) @ shifted_input (Cin, L)
            acc = None
            for dy in range(3):
                for dx in range(3):
                    t = dy * 3 + dx
                    d = (dy - 1) * wp + (dx - 1)    # flat tap offset
                    xs = src_ref[0, :cin, src_base + d:src_base + d + L]
                    part = jnp.dot(w_ref[t], xs,
                                   preferred_element_type=jnp.float32)
                    acc = part if acc is None else acc + part
            y = jnp.maximum(acc + b_ref[...], 0.0)  # folded BN bias + ReLU
            y = jnp.where(msk > 0.0, y, 0.0)        # zero the border ring
            out_ref[0, :cout, dst_off:dst_off + L] = y

        def maxpool2x2(src_off, c, wp, L, sel_ref, Ln, dst_off):
            # m[p] = max of the 2x2 window whose top-left flat index is p.
            x00 = out_ref[0, :c, src_off:src_off + L]
            x01 = out_ref[0, :c, src_off + 1:src_off + 1 + L]
            x10 = out_ref[0, :c, src_off + wp:src_off + wp + L]
            x11 = out_ref[0, :c, src_off + wp + 1:src_off + wp + 1 + L]
            m = jnp.maximum(jnp.maximum(x00, x01), jnp.maximum(x10, x11))
            # One MXU matmul with a 0/1 selection matrix does the stride-2
            # decimation AND re-pads the result as the next conv's frame.
            out_ref[0, :c, dst_off:dst_off + Ln] = jnp.dot(
                m, sel_ref[...], preferred_element_type=jnp.float32)

        src_ref, src_base = x_ref, _X_MARGIN
        for i, c in enumerate(sched):
            w_a, b_a, w_b, b_b, sel = blk_refs[i]
            msk = mask_ref[i:i + 1, :c['L']]
            conv_bn_relu(src_ref, src_base, c['cin'], c['cout'], c['wp'],
                         c['L'], w_a, b_a, msk, c['off_a'])
            conv_bn_relu(out_ref, c['off_a'], c['cout'], c['cout'], c['wp'],
                         c['L'], w_b, b_b, msk, c['off_b'])
            maxpool2x2(c['off_b'], c['cout'], c['wp'], c['L'], sel, c['Ln'],
                       c['off_p'])
            src_ref, src_base = out_ref, c['off_p']

    return kernel


# ------------------------------ JAX wrapper --------------------------------

def down_forward(x_nchw, params):
    """DOWN.forward: x (N,C,H,W) -> (10 conv outputs, 5 pool outputs), NCHW."""
    n, c0, h0, w0 = x_nchw.shape
    couts = [blk[0][0].shape[-1] for blk in params]
    sched, tot = _build_schedule(h0, w0, c0, couts, _POOL_PADS)
    c_slab = max(couts)

    # ---- input: zero-bordered padded-flat (N, C0, margin + Hp*Wp + tail)
    hp0, wp0 = h0 + 2, w0 + 2
    L0 = hp0 * wp0
    x_w = _round_up(_X_MARGIN + L0 + wp0 + 1, 128)
    xp = jnp.pad(x_nchw, ((0, 0), (0, 0), (1, 1), (1, 1))).reshape(n, c0, L0)
    xin = jnp.pad(xp, ((0, 0), (0, 0), (_X_MARGIN, x_w - _X_MARGIN - L0)))

    # ---- constant interior masks + pool selection matrices (numpy constants)
    mask_w = _round_up(max(c['L'] for c in sched), 128)
    mask_np = np.zeros((len(sched), mask_w), np.float32)
    sels = []
    for i, c in enumerate(sched):
        m2 = np.zeros((c['hp'], c['wp']), np.float32)
        m2[1:1 + c['h'], 1:1 + c['w']] = 1.0
        mask_np[i, :c['L']] = m2.reshape(-1)
        sel = np.zeros((c['L'], c['Ln']), np.float32)
        for yo in range(c['ho']):
            for xo in range(c['wo']):
                p_src = (2 * yo - c['pp'] + 1) * c['wp'] + (2 * xo - c['pp'] + 1)
                q_dst = (yo + 1) * c['wpn'] + (xo + 1)
                sel[p_src, q_dst] = 1.0
        sels.append(jnp.asarray(sel))
    mask_all = jnp.asarray(mask_np)

    def const_spec(shape):
        return pl.BlockSpec(shape, lambda i, _n=len(shape): (0,) * _n)

    # ---- flatten inputs + specs: x, masks, then per block (w_a,b_a,w_b,b_b,sel)
    flat_in = [xin, mask_all]
    in_specs = [pl.BlockSpec((1, c0, x_w), lambda i: (i, 0, 0)),
                const_spec(mask_all.shape)]
    for i, blk in enumerate(params):
        for (wgt, scale, bias) in blk:                       # conv_a, conv_b
            cin_i, cout_i = wgt.shape[2], wgt.shape[3]
            # fold BN scale into the weights; layout (tap, Cout, Cin)
            w2 = (jnp.transpose(wgt, (0, 1, 3, 2)).reshape(9, cout_i, cin_i)
                  * scale[None, :, None])
            b2 = bias.reshape(cout_i, 1)
            flat_in += [w2, b2]
            in_specs += [const_spec((9, cout_i, cin_i)), const_spec((cout_i, 1))]
        flat_in.append(sels[i])
        in_specs.append(const_spec(sels[i].shape))

    out = pl.pallas_call(
        _make_down_kernel(sched),
        out_shape=jax.ShapeDtypeStruct((n, c_slab, tot), jnp.float32),
        grid=(n,),
        in_specs=in_specs,
        out_specs=pl.BlockSpec((1, c_slab, tot), lambda i: (i, 0, 0)),
        compiler_params=pltpu.CompilerParams(
            dimension_semantics=("parallel",)),   # one batch element per step / TC
    )(*flat_in)

    # ---- host-side unpacking: cheap slices + reshapes (outside the kernel)
    convs, pools = [], []
    for c in sched:
        for off in (c['off_a'], c['off_b']):
            seg = out[:, :c['cout'], off:off + c['L']]
            convs.append(seg.reshape(n, c['cout'], c['hp'], c['wp'])
                         [:, :, 1:1 + c['h'], 1:1 + c['w']])
        seg = out[:, :c['cout'], c['off_p']:c['off_p'] + c['Ln']]
        pools.append(seg.reshape(n, c['cout'], c['hpn'], c['wpn'])
                     [:, :, 1:1 + c['ho'], 1:1 + c['wo']])
    return tuple(convs), tuple(pools)


# --------------------------- pure-JAX reference -----------------------------

def reference_forward(x, params):
    convs, pools = [], []
    act = x
    for i, blk in enumerate(params):
        pp = _POOL_PADS[i]
        for (wgt, scale, bias) in blk:
            z = lax.conv_general_dilated(
                act, wgt, (1, 1), ((1, 1), (1, 1)),
                dimension_numbers=("NCHW", "HWIO", "NCHW"),
                precision=lax.Precision.HIGHEST)
            act = jnp.maximum(z * scale[None, :, None, None]
                              + bias[None, :, None, None], 0.0)
            convs.append(act)
        act = lax.reduce_window(act, jnp.float32(-jnp.inf), lax.max,
                                (1, 1, 2, 2), (1, 1, 2, 2),
                                ((0, 0), (0, 0), (pp, pp), (pp, pp)))
        pools.append(act)
    return tuple(convs), tuple(pools)


# --------------------------- deterministic params ---------------------------

def _conv_bn_params(key, cin, cout):
    k1, k2, k3, k4, k5, k6 = jax.random.split(key, 6)
    w = jax.random.normal(k1, (3, 3, cin, cout), jnp.float32) / jnp.sqrt(9.0 * cin)
    conv_bias = 0.1 * jax.random.normal(k2, (cout,), jnp.float32)
    gamma = 1.0 + 0.1 * jax.random.normal(k3, (cout,), jnp.float32)
    beta = 0.1 * jax.random.normal(k4, (cout,), jnp.float32)
    running_mean = 0.1 * jax.random.normal(k5, (cout,), jnp.float32)
    running_var = jnp.abs(jax.random.normal(k6, (cout,), jnp.float32)) + 0.5
    eps = 1e-5
    scale = gamma / jnp.sqrt(running_var + eps)               # folded BN scale
    bias = (conv_bias - running_mean) * scale + beta          # folded BN bias
    return w, scale, bias


def init_block_params(key, cin, cout):
    ka, kb = jax.random.split(key)
    return _conv_bn_params(ka, cin, cout), _conv_bn_params(kb, cout, cout)


# ---------------------------------- main ------------------------------------

if __name__ == "__main__":
    key = jax.random.PRNGKey(0)
    conv_filter_nums = [4, 8, 8, 16, 16, 16]

    kx, kp = jax.random.split(key)
    # PyTorch-style NCHW input: (batch=2, C=4, H=16, W=16)
    x = jax.random.normal(kx, (2, conv_filter_nums[0], 16, 16), jnp.float32)

    pkeys = jax.random.split(kp, 5)
    params = [init_block_params(pkeys[i], conv_filter_nums[i],
                                conv_filter_nums[i + 1]) for i in range(5)]

    convs, pools = jax.jit(down_forward)(x, params)
    jax.block_until_ready((convs, pools))

    # shape sanity (NCHW)
    assert convs[0].shape == (2, 8, 16, 16)
    assert convs[9].shape == (2, 16, 2, 2)
    assert pools[0].shape == (2, 8, 8, 8)
    assert pools[2].shape == (2, 16, 3, 3)     # padding_pool=1 block
    assert pools[4].shape == (2, 16, 1, 1)

    # numerical check against a pure-JAX reference of the same (eval-BN) math
    ref_convs, ref_pools = jax.jit(reference_forward)(x, params)
    for a, b in zip(convs + pools, ref_convs + ref_pools):
        np.testing.assert_allclose(np.asarray(a), np.asarray(b),
                                   rtol=2e-3, atol=2e-3)

    print("KERNEL_OK")
</pallas_src>

<mosaic_0001>
module attributes {stable_mosaic.version = 11 : i64} {
  func.func @kernel(%arg0: i32, %arg1: memref<1x4x512xf32, #tpu.memory_space<vmem>>, %arg2: memref<5x384xf32, #tpu.memory_space<vmem>>, %arg3: memref<9x8x4xf32, #tpu.memory_space<vmem>>, %arg4: memref<8x1xf32, #tpu.memory_space<vmem>>, %arg5: memref<9x8x8xf32, #tpu.memory_space<vmem>>, %arg6: memref<8x1xf32, #tpu.memory_space<vmem>>, %arg7: memref<324x100xf32, #tpu.memory_space<vmem>>, %arg8: memref<9x8x8xf32, #tpu.memory_space<vmem>>, %arg9: memref<8x1xf32, #tpu.memory_space<vmem>>, %arg10: memref<9x8x8xf32, #tpu.memory_space<vmem>>, %arg11: memref<8x1xf32, #tpu.memory_space<vmem>>, %arg12: memref<100x36xf32, #tpu.memory_space<vmem>>, %arg13: memref<9x16x8xf32, #tpu.memory_space<vmem>>, %arg14: memref<16x1xf32, #tpu.memory_space<vmem>>, %arg15: memref<9x16x16xf32, #tpu.memory_space<vmem>>, %arg16: memref<16x1xf32, #tpu.memory_space<vmem>>, %arg17: memref<36x25xf32, #tpu.memory_space<vmem>>, %arg18: memref<9x16x16xf32, #tpu.memory_space<vmem>>, %arg19: memref<16x1xf32, #tpu.memory_space<vmem>>, %arg20: memref<9x16x16xf32, #tpu.memory_space<vmem>>, %arg21: memref<16x1xf32, #tpu.memory_space<vmem>>, %arg22: memref<25x16xf32, #tpu.memory_space<vmem>>, %arg23: memref<9x16x16xf32, #tpu.memory_space<vmem>>, %arg24: memref<16x1xf32, #tpu.memory_space<vmem>>, %arg25: memref<9x16x16xf32, #tpu.memory_space<vmem>>, %arg26: memref<16x1xf32, #tpu.memory_space<vmem>>, %arg27: memref<16x9xf32, #tpu.memory_space<vmem>>, %arg28: memref<1x16x2560xf32, #tpu.memory_space<vmem>>) attributes {dimension_semantics = [#tpu.dimension_semantics<parallel>], iteration_bounds = array<i64: 2>, scalar_prefetch = 0 : i64, scratch_operands = 0 : i64, tpu.core_type = #tpu.core_type<tc>, window_params = [{transform_indices = @transform_0, window_bounds = array<i64: 1, 4, 512>}, {pipeline_mode = #tpu.pipeline_mode<synchronous>, transform_indices = @transform_1, window_bounds = array<i64: 5, 384>}, {pipeline_mode = #tpu.pipeline_mode<synchronous>, transform_indices = @transform_2, window_bounds = array<i64: 9, 8, 4>}, {pipeline_mode = #tpu.pipeline_mode<synchronous>, transform_indices = @transform_3, window_bounds = array<i64: 8, 1>}, {pipeline_mode = #tpu.pipeline_mode<synchronous>, transform_indices = @transform_4, window_bounds = array<i64: 9, 8, 8>}, {pipeline_mode = #tpu.pipeline_mode<synchronous>, transform_indices = @transform_5, window_bounds = array<i64: 8, 1>}, {pipeline_mode = #tpu.pipeline_mode<synchronous>, transform_indices = @transform_6, window_bounds = array<i64: 324, 100>}, {pipeline_mode = #tpu.pipeline_mode<synchronous>, transform_indices = @transform_7, window_bounds = array<i64: 9, 8, 8>}, {pipeline_mode = #tpu.pipeline_mode<synchronous>, transform_indices = @transform_8, window_bounds = array<i64: 8, 1>}, {pipeline_mode = #tpu.pipeline_mode<synchronous>, transform_indices = @transform_9, window_bounds = array<i64: 9, 8, 8>}, {pipeline_mode = #tpu.pipeline_mode<synchronous>, transform_indices = @transform_10, window_bounds = array<i64: 8, 1>}, {pipeline_mode = #tpu.pipeline_mode<synchronous>, transform_indices = @transform_11, window_bounds = array<i64: 100, 36>}, {pipeline_mode = #tpu.pipeline_mode<synchronous>, transform_indices = @transform_12, window_bounds = array<i64: 9, 16, 8>}, {pipeline_mode = #tpu.pipeline_mode<synchronous>, transform_indices = @transform_13, window_bounds = array<i64: 16, 1>}, {pipeline_mode = #tpu.pipeline_mode<synchronous>, transform_indices = @transform_14, window_bounds = array<i64: 9, 16, 16>}, {pipeline_mode = #tpu.pipeline_mode<synchronous>, transform_indices = @transform_15, window_bounds = array<i64: 16, 1>}, {pipeline_mode = #tpu.pipeline_mode<synchronous>, transform_indices = @transform_16, window_bounds = array<i64: 36, 25>}, {pipeline_mode = #tpu.pipeline_mode<synchronous>, transform_indices = @transform_17, window_bounds = array<i64: 9, 16, 16>}, {pipeline_mode = #tpu.pipeline_mode<synchronous>, transform_indices = @transform_18, window_bounds = array<i64: 16, 1>}, {pipeline_mode = #tpu.pipeline_mode<synchronous>, transform_indices = @transform_19, window_bounds = array<i64: 9, 16, 16>}, {pipeline_mode = #tpu.pipeline_mode<synchronous>, transform_indices = @transform_20, window_bounds = array<i64: 16, 1>}, {pipeline_mode = #tpu.pipeline_mode<synchronous>, transform_indices = @transform_21, window_bounds = array<i64: 25, 16>}, {pipeline_mode = #tpu.pipeline_mode<synchronous>, transform_indices = @transform_22, window_bounds = array<i64: 9, 16, 16>}, {pipeline_mode = #tpu.pipeline_mode<synchronous>, transform_indices = @transform_23, window_bounds = array<i64: 16, 1>}, {pipeline_mode = #tpu.pipeline_mode<synchronous>, transform_indices = @transform_24, window_bounds = array<i64: 9, 16, 16>}, {pipeline_mode = #tpu.pipeline_mode<synchronous>, transform_indices = @transform_25, window_bounds = array<i64: 16, 1>}, {pipeline_mode = #tpu.pipeline_mode<synchronous>, transform_indices = @transform_26, window_bounds = array<i64: 16, 9>}, {transform_indices = @transform_27, window_bounds = array<i64: 1, 16, 2560>}]} {
    %cst = arith.constant 0.000000e+00 : f32
    %0 = vector.broadcast %cst : f32 to vector<1x16x2560xf32>
    %c0 = arith.constant 0 : index
    %c0_0 = arith.constant 0 : index
    %c0_1 = arith.constant 0 : index
    %1 = vector.load %arg28[%c0, %c0_0, %c0_1] : memref<1x16x2560xf32, #tpu.memory_space<vmem>>, vector<1x16x2560xf32>
    tpu.vector_store %arg28[%c0, %c0_0, %c0_1], %0 {strides = array<i32>} : memref<1x16x2560xf32, #tpu.memory_space<vmem>>, vector<1x16x2560xf32>,
    %c0_2 = arith.constant 0 : index
    %c0_3 = arith.constant 0 : index
    %2 = vector.load %arg2[%c0_2, %c0_3] : memref<5x384xf32, #tpu.memory_space<vmem>>, vector<1x324xf32>
    %c0_4 = arith.constant 0 : index
    %c0_5 = arith.constant 0 : index
    %c109 = arith.constant 109 : index
    %3 = vector.load %arg1[%c0_4, %c0_5, %c109] : memref<1x4x512xf32, #tpu.memory_space<vmem>>, vector<1x4x324xf32>
    %4 = vector.shape_cast %3 : vector<1x4x324xf32> to vector<4x324xf32>
    %c0_6 = arith.constant 0 : index
    %c0_7 = arith.constant 0 : index
    %c0_8 = arith.constant 0 : index
    %5 = vector.load %arg3[%c0_6, %c0_7, %c0_8] : memref<9x8x4xf32, #tpu.memory_space<vmem>>, vector<1x8x4xf32>
    %6 = vector.shape_cast %5 : vector<1x8x4xf32> to vector<8x4xf32>
    %cst_9 = arith.constant dense<0.000000e+00> : vector<8x324xf32>
    %7 = tpu.matmul %6, %4, %cst_9 {dimension_numbers = #tpu.dot_dimension_numbers<[1], [0], [0], [1], [0, 0, 1, 1], [], []>} : vector<8x4xf32>, vector<4x324xf32>, vector<8x324xf32> -> vector<8x324xf32>
    %c0_10 = arith.constant 0 : index
    %c0_11 = arith.constant 0 : index
    %c110 = arith.constant 110 : index
    %8 = vector.load %arg1[%c0_10, %c0_11, %c110] : memref<1x4x512xf32, #tpu.memory_space<vmem>>, vector<1x4x324xf32>
    %9 = vector.shape_cast %8 : vector<1x4x324xf32> to vector<4x324xf32>
    %c1 = arith.constant 1 : index
    %c0_12 = arith.constant 0 : index
    %c0_13 = arith.constant 0 : index
    %10 = vector.load %arg3[%c1, %c0_12, %c0_13] : memref<9x8x4xf32, #tpu.memory_space<vmem>>, vector<1x8x4xf32>
    %11 = vector.shape_cast %10 : vector<1x8x4xf32> to vector<8x4xf32>
    %cst_14 = arith.constant dense<0.000000e+00> : vector<8x324xf32>
    %12 = tpu.matmul %11, %9, %cst_14 {dimension_numbers = #tpu.dot_dimension_numbers<[1], [0], [0], [1], [0, 0, 1, 1], [], []>} : vector<8x4xf32>, vector<4x324xf32>, vector<8x324xf32> -> vector<8x324xf32>
    %13 = arith.addf %7, %12 : vector<8x324xf32>
    %c0_15 = arith.constant 0 : index
    %c0_16 = arith.constant 0 : index
    %c111 = arith.constant 111 : index
    %14 = vector.load %arg1[%c0_15, %c0_16, %c111] : memref<1x4x512xf32, #tpu.memory_space<vmem>>, vector<1x4x324xf32>
    %15 = vector.shape_cast %14 : vector<1x4x324xf32> to vector<4x324xf32>
    %c2 = arith.constant 2 : index
    %c0_17 = arith.constant 0 : index
    %c0_18 = arith.constant 0 : index
    %16 = vector.load %arg3[%c2, %c0_17, %c0_18] : memref<9x8x4xf32, #tpu.memory_space<vmem>>, vector<1x8x4xf32>
    %17 = vector.shape_cast %16 : vector<1x8x4xf32> to vector<8x4xf32>
    %cst_19 = arith.constant dense<0.000000e+00> : vector<8x324xf32>
    %18 = tpu.matmul %17, %15, %cst_19 {dimension_numbers = #tpu.dot_dimension_numbers<[1], [0], [0], [1], [0, 0, 1, 1], [], []>} : vector<8x4xf32>, vector<4x324xf32>, vector<8x324xf32> -> vector<8x324xf32>
    %19 = arith.addf %13, %18 : vector<8x324xf32>
    %c0_20 = arith.constant 0 : index
    %c0_21 = arith.constant 0 : index
    %c127 = arith.constant 127 : index
    %20 = vector.load %arg1[%c0_20, %c0_21, %c127] : memref<1x4x512xf32, #tpu.memory_space<vmem>>, vector<1x4x324xf32>
    %21 = vector.shape_cast %20 : vector<1x4x324xf32> to vector<4x324xf32>
    %c3 = arith.constant 3 : index
    %c0_22 = arith.constant 0 : index
    %c0_23 = arith.constant 0 : index
    %22 = vector.load %arg3[%c3, %c0_22, %c0_23] : memref<9x8x4xf32, #tpu.memory_space<vmem>>, vector<1x8x4xf32>
    %23 = vector.shape_cast %22 : vector<1x8x4xf32> to vector<8x4xf32>
    %cst_24 = arith.constant dense<0.000000e+00> : vector<8x324xf32>
    %24 = tpu.matmul %23, %21, %cst_24 {dimension_numbers = #tpu.dot_dimension_numbers<[1], [0], [0], [1], [0, 0, 1, 1], [], []>} : vector<8x4xf32>, vector<4x324xf32>, vector<8x324xf32> -> vector<8x324xf32>
    %25 = arith.addf %19, %24 : vector<8x324xf32>
    %c0_25 = arith.constant 0 : index
    %c0_26 = arith.constant 0 : index
    %c128 = arith.constant 128 : index
    %26 = vector.load %arg1[%c0_25, %c0_26, %c128] : memref<1x4x512xf32, #tpu.memory_space<vmem>>, vector<1x4x324xf32>
    %27 = vector.shape_cast %26 : vector<1x4x324xf32> to vector<4x324xf32>
    %c4 = arith.constant 4 : index
    %c0_27 = arith.constant 0 : index
    %c0_28 = arith.constant 0 : index
    %28 = vector.load %arg3[%c4, %c0_27, %c0_28] : memref<9x8x4xf32, #tpu.memory_space<vmem>>, vector<1x8x4xf32>
    %29 = vector.shape_cast %28 : vector<1x8x4xf32> to vector<8x4xf32>
    %cst_29 = arith.constant dense<0.000000e+00> : vector<8x324xf32>
    %30 = tpu.matmul %29, %27, %cst_29 {dimension_numbers = #tpu.dot_dimension_numbers<[1], [0], [0], [1], [0, 0, 1, 1], [], []>} : vector<8x4xf32>, vector<4x324xf32>, vector<8x324xf32> -> vector<8x324xf32>
    %31 = arith.addf %25, %30 : vector<8x324xf32>
    %c0_30 = arith.constant 0 : index
    %c0_31 = arith.constant 0 : index
    %c129 = arith.constant 129 : index
    %32 = vector.load %arg1[%c0_30, %c0_31, %c129] : memref<1x4x512xf32, #tpu.memory_space<vmem>>, vector<1x4x324xf32>
    %33 = vector.shape_cast %32 : vector<1x4x324xf32> to vector<4x324xf32>
    %c5 = arith.constant 5 : index
    %c0_32 = arith.constant 0 : index
    %c0_33 = arith.constant 0 : index
    %34 = vector.load %arg3[%c5, %c0_32, %c0_33] : memref<9x8x4xf32, #tpu.memory_space<vmem>>, vector<1x8x4xf32>
    %35 = vector.shape_cast %34 : vector<1x8x4xf32> to vector<8x4xf32>
    %cst_34 = arith.constant dense<0.000000e+00> : vector<8x324xf32>
    %36 = tpu.matmul %35, %33, %cst_34 {dimension_numbers = #tpu.dot_dimension_numbers<[1], [0], [0], [1], [0, 0, 1, 1], [], []>} : vector<8x4xf32>, vector<4x324xf32>, vector<8x324xf32> -> vector<8x324xf32>
    %37 = arith.addf %31, %36 : vector<8x324xf32>
    %c0_35 = arith.constant 0 : index
    %c0_36 = arith.constant 0 : index
    %c145 = arith.constant 145 : index
    %38 = vector.load %arg1[%c0_35, %c0_36, %c145] : memref<1x4x512xf32, #tpu.memory_space<vmem>>, vector<1x4x324xf32>
    %39 = vector.shape_cast %38 : vector<1x4x324xf32> to vector<4x324xf32>
    %c6 = arith.constant 6 : index
    %c0_37 = arith.constant 0 : index
    %c0_38 = arith.constant 0 : index
    %40 = vector.load %arg3[%c6, %c0_37, %c0_38] : memref<9x8x4xf32, #tpu.memory_space<vmem>>, vector<1x8x4xf32>
    %41 = vector.shape_cast %40 : vector<1x8x4xf32> to vector<8x4xf32>
    %cst_39 = arith.constant dense<0.000000e+00> : vector<8x324xf32>
    %42 = tpu.matmul %41, %39, %cst_39 {dimension_numbers = #tpu.dot_dimension_numbers<[1], [0], [0], [1], [0, 0, 1, 1], [], []>} : vector<8x4xf32>, vector<4x324xf32>, vector<8x324xf32> -> vector<8x324xf32>
    %43 = arith.addf %37, %42 : vector<8x324xf32>
    %c0_40 = arith.constant 0 : index
    %c0_41 = arith.constant 0 : index
    %c146 = arith.constant 146 : index
    %44 = vector.load %arg1[%c0_40, %c0_41, %c146] : memref<1x4x512xf32, #tpu.memory_space<vmem>>, vector<1x4x324xf32>
    %45 = vector.shape_cast %44 : vector<1x4x324xf32> to vector<4x324xf32>
    %c7 = arith.constant 7 : index
    %c0_42 = arith.constant 0 : index
    %c0_43 = arith.constant 0 : index
    %46 = vector.load %arg3[%c7, %c0_42, %c0_43] : memref<9x8x4xf32, #tpu.memory_space<vmem>>, vector<1x8x4xf32>
    %47 = vector.shape_cast %46 : vector<1x8x4xf32> to vector<8x4xf32>
    %cst_44 = arith.constant dense<0.000000e+00> : vector<8x324xf32>
    %48 = tpu.matmul %47, %45, %cst_44 {dimension_numbers = #tpu.dot_dimension_numbers<[1], [0], [0], [1], [0, 0, 1, 1], [], []>} : vector<8x4xf32>, vector<4x324xf32>, vector<8x324xf32> -> vector<8x324xf32>
    %49 = arith.addf %43, %48 : vector<8x324xf32>
    %c0_45 = arith.constant 0 : index
    %c0_46 = arith.constant 0 : index
    %c147 = arith.constant 147 : index
    %50 = vector.load %arg1[%c0_45, %c0_46, %c147] : memref<1x4x512xf32, #tpu.memory_space<vmem>>, vector<1x4x324xf32>
    %51 = vector.shape_cast %50 : vector<1x4x324xf32> to vector<4x324xf32>
    %c8 = arith.constant 8 : index
    %c0_47 = arith.constant 0 : index
    %c0_48 = arith.constant 0 : index
    %52 = vector.load %arg3[%c8, %c0_47, %c0_48] : memref<9x8x4xf32, #tpu.memory_space<vmem>>, vector<1x8x4xf32>
    %53 = vector.shape_cast %52 : vector<1x8x4xf32> to vector<8x4xf32>
    %cst_49 = arith.constant dense<0.000000e+00> : vector<8x324xf32>
    %54 = tpu.matmul %53, %51, %cst_49 {dimension_numbers = #tpu.dot_dimension_numbers<[1], [0], [0], [1], [0, 0, 1, 1], [], []>} : vector<8x4xf32>, vector<4x324xf32>, vector<8x324xf32> -> vector<8x324xf32>
    %55 = arith.addf %49, %54 : vector<8x324xf32>
    %c0_50 = arith.constant 0 : index
    %c0_51 = arith.constant 0 : index
    %56 = vector.load %arg4[%c0_50, %c0_51] : memref<8x1xf32, #tpu.memory_space<vmem>>, vector<8x1xf32>
    %57 = vector.broadcast %56 : vector<8x1xf32> to vector<8x324xf32>
    %58 = arith.addf %55, %57 : vector<8x324xf32>
    %cst_52 = arith.constant 0.000000e+00 : f32
    %59 = vector.broadcast %cst_52 : f32 to vector<8x324xf32>
    %60 = arith.maximumf %58, %59 : vector<8x324xf32>
    %cst_53 = arith.constant 0.000000e+00 : f32
    %61 = vector.broadcast %cst_53 : f32 to vector<1x324xf32>
    %62 = arith.cmpf ogt, %2, %61 : vector<1x324xf32>
    %cst_54 = arith.constant 0.000000e+00 : f32
    %63 = vector.shape_cast %62 : vector<1x324xi1> to vector<1x324xi1>
    %64 = vector.broadcast %63 : vector<1x324xi1> to vector<8x324xi1>
    %65 = vector.broadcast %cst_54 : f32 to vector<8x324xf32>
    %66 = arith.select %64, %60, %65 : vector<8x324xi1>, vector<8x324xf32>
    %c0_55 = arith.constant 0 : index
    %c0_56 = arith.constant 0 : index
    %c128_57 = arith.constant 128 : index
    %67 = vector.load %arg28[%c0_55, %c0_56, %c128_57] : memref<1x16x2560xf32, #tpu.memory_space<vmem>>, vector<1x8x324xf32>
    %68 = vector.shape_cast %67 : vector<1x8x324xf32> to vector<8x324xf32>
    %69 = vector.shape_cast %66 : vector<8x324xf32> to vector<1x8x324xf32>
    tpu.vector_store %arg28[%c0_55, %c0_56, %c128_57], %69 {strides = array<i32>} : memref<1x16x2560xf32, #tpu.memory_space<vmem>>, vector<1x8x324xf32>,
    %c0_58 = arith.constant 0 : index
    %c0_59 = arith.constant 0 : index
    %c109_60 = arith.constant 109 : index
    %70 = vector.load %arg28[%c0_58, %c0_59, %c109_60] : memref<1x16x2560xf32, #tpu.memory_space<vmem>>, vector<1x8x324xf32>
    %71 = vector.shape_cast %70 : vector<1x8x324xf32> to vector<8x324xf32>
    %c0_61 = arith.constant 0 : index
    %c0_62 = arith.constant 0 : index
    %c0_63 = arith.constant 0 : index
    %72 = vector.load %arg5[%c0_61, %c0_62, %c0_63] : memref<9x8x8xf32, #tpu.memory_space<vmem>>, vector<1x8x8xf32>
    %73 = vector.shape_cast %72 : vector<1x8x8xf32> to vector<8x8xf32>
    %cst_64 = arith.constant dense<0.000000e+00> : vector<8x324xf32>
    %74 = tpu.matmul %73, %71, %cst_64 {dimension_numbers = #tpu.dot_dimension_numbers<[1], [0], [0], [1], [0, 0, 1, 1], [], []>} : vector<8x8xf32>, vector<8x324xf32>, vector<8x324xf32> -> vector<8x324xf32>
    %c0_65 = arith.constant 0 : index
    %c0_66 = arith.constant 0 : index
    %c110_67 = arith.constant 110 : index
    %75 = vector.load %arg28[%c0_65, %c0_66, %c110_67] : memref<1x16x2560xf32, #tpu.memory_space<vmem>>, vector<1x8x324xf32>
    %76 = vector.shape_cast %75 : vector<1x8x324xf32> to vector<8x324xf32>
    %c1_68 = arith.constant 1 : index
    %c0_69 = arith.constant 0 : index
    %c0_70 = arith.constant 0 : index
    %77 = vector.load %arg5[%c1_68, %c0_69, %c0_70] : memref<9x8x8xf32, #tpu.memory_space<vmem>>, vector<1x8x8xf32>
    %78 = vector.shape_cast %77 : vector<1x8x8xf32> to vector<8x8xf32>
    %cst_71 = arith.constant dense<0.000000e+00> : vector<8x324xf32>
    %79 = tpu.matmul %78, %76, %cst_71 {dimension_numbers = #tpu.dot_dimension_numbers<[1], [0], [0], [1], [0, 0, 1, 1], [], []>} : vector<8x8xf32>, vector<8x324xf32>, vector<8x324xf32> -> vector<8x324xf32>
    %80 = arith.addf %74, %79 : vector<8x324xf32>
    %c0_72 = arith.constant 0 : index
    %c0_73 = arith.constant 0 : index
    %c111_74 = arith.constant 111 : index
    %81 = vector.load %arg28[%c0_72, %c0_73, %c111_74] : memref<1x16x2560xf32, #tpu.memory_space<vmem>>, vector<1x8x324xf32>
    %82 = vector.shape_cast %81 : vector<1x8x324xf32> to vector<8x324xf32>
    %c2_75 = arith.constant 2 : index
    %c0_76 = arith.constant 0 : index
    %c0_77 = arith.constant 0 : index
    %83 = vector.load %arg5[%c2_75, %c0_76, %c0_77] : memref<9x8x8xf32, #tpu.memory_space<vmem>>, vector<1x8x8xf32>
    %84 = vector.shape_cast %83 : vector<1x8x8xf32> to vector<8x8xf32>
    %cst_78 = arith.constant dense<0.000000e+00> : vector<8x324xf32>
    %85 = tpu.matmul %84, %82, %cst_78 {dimension_numbers = #tpu.dot_dimension_numbers<[1], [0], [0], [1], [0, 0, 1, 1], [], []>} : vector<8x8xf32>, vector<8x324xf32>, vector<8x324xf32> -> vector<8x324xf32>
    %86 = arith.addf %80, %85 : vector<8x324xf32>
    %c0_79 = arith.constant 0 : index
    %c0_80 = arith.constant 0 : index
    %c127_81 = arith.constant 127 : index
    %87 = vector.load %arg28[%c0_79, %c0_80, %c127_81] : memref<1x16x2560xf32, #tpu.memory_space<vmem>>, vector<1x8x324xf32>
    %88 = vector.shape_cast %87 : vector<1x8x324xf32> to vector<8x324xf32>
    %c3_82 = arith.constant 3 : index
    %c0_83 = arith.constant 0 : index
    %c0_84 = arith.constant 0 : index
    %89 = vector.load %arg5[%c3_82, %c0_83, %c0_84] : memref<9x8x8xf32, #tpu.memory_space<vmem>>, vector<1x8x8xf32>
    %90 = vector.shape_cast %89 : vector<1x8x8xf32> to vector<8x8xf32>
    %cst_85 = arith.constant dense<0.000000e+00> : vector<8x324xf32>
    %91 = tpu.matmul %90, %88, %cst_85 {dimension_numbers = #tpu.dot_dimension_numbers<[1], [0], [0], [1], [0, 0, 1, 1], [], []>} : vector<8x8xf32>, vector<8x324xf32>, vector<8x324xf32> -> vector<8x324xf32>
    %92 = arith.addf %86, %91 : vector<8x324xf32>
    %c0_86 = arith.constant 0 : index
    %c0_87 = arith.constant 0 : index
    %c128_88 = arith.constant 128 : index
    %93 = vector.load %arg28[%c0_86, %c0_87, %c128_88] : memref<1x16x2560xf32, #tpu.memory_space<vmem>>, vector<1x8x324xf32>
    %94 = vector.shape_cast %93 : vector<1x8x324xf32> to vector<8x324xf32>
    %c4_89 = arith.constant 4 : index
    %c0_90 = arith.constant 0 : index
    %c0_91 = arith.constant 0 : index
    %95 = vector.load %arg5[%c4_89, %c0_90, %c0_91] : memref<9x8x8xf32, #tpu.memory_space<vmem>>, vector<1x8x8xf32>
    %96 = vector.shape_cast %95 : vector<1x8x8xf32> to vector<8x8xf32>
    %cst_92 = arith.constant dense<0.000000e+00> : vector<8x324xf32>
    %97 = tpu.matmul %96, %94, %cst_92 {dimension_numbers = #tpu.dot_dimension_numbers<[1], [0], [0], [1], [0, 0, 1, 1], [], []>} : vector<8x8xf32>, vector<8x324xf32>, vector<8x324xf32> -> vector<8x324xf32>
    %98 = arith.addf %92, %97 : vector<8x324xf32>
    %c0_93 = arith.constant 0 : index
    %c0_94 = arith.constant 0 : index
    %c129_95 = arith.constant 129 : index
    %99 = vector.load %arg28[%c0_93, %c0_94, %c129_95] : memref<1x16x2560xf32, #tpu.memory_space<vmem>>, vector<1x8x324xf32>
    %100 = vector.shape_cast %99 : vector<1x8x324xf32> to vector<8x324xf32>
    %c5_96 = arith.constant 5 : index
    %c0_97 = arith.constant 0 : index
    %c0_98 = arith.constant 0 : index
    %101 = vector.load %arg5[%c5_96, %c0_97, %c0_98] : memref<9x8x8xf32, #tpu.memory_space<vmem>>, vector<1x8x8xf32>
    %102 = vector.shape_cast %101 : vector<1x8x8xf32> to vector<8x8xf32>
    %cst_99 = arith.constant dense<0.000000e+00> : vector<8x324xf32>
    %103 = tpu.matmul %102, %100, %cst_99 {dimension_numbers = #tpu.dot_dimension_numbers<[1], [0], [0], [1], [0, 0, 1, 1], [], []>} : vector<8x8xf32>, vector<8x324xf32>, vector<8x324xf32> -> vector<8x324xf32>
    %104 = arith.addf %98, %103 : vector<8x324xf32>
    %c0_100 = arith.constant 0 : index
    %c0_101 = arith.constant 0 : index
    %c145_102 = arith.constant 145 : index
    %105 = vector.load %arg28[%c0_100, %c0_101, %c145_102] : memref<1x16x2560xf32, #tpu.memory_space<vmem>>, vector<1x8x324xf32>
    %106 = vector.shape_cast %105 : vector<1x8x324xf32> to vector<8x324xf32>
    %c6_103 = arith.constant 6 : index
    %c0_104 = arith.constant 0 : index
    %c0_105 = arith.constant 0 : index
    %107 = vector.load %arg5[%c6_103, %c0_104, %c0_105] : memref<9x8x8xf32, #tpu.memory_space<vmem>>, vector<1x8x8xf32>
    %108 = vector.shape_cast %107 : vector<1x8x8xf32> to vector<8x8xf32>
    %cst_106 = arith.constant dense<0.000000e+00> : vector<8x324xf32>
    %109 = tpu.matmul %108, %106, %cst_106 {dimension_numbers = #tpu.dot_dimension_numbers<[1], [0], [0], [1], [0, 0, 1, 1], [], []>} : vector<8x8xf32>, vector<8x324xf32>, vector<8x324xf32> -> vector<8x324xf32>
    %110 = arith.addf %104, %109 : vector<8x324xf32>
    %c0_107 = arith.constant 0 : index
    %c0_108 = arith.constant 0 : index
    %c146_109 = arith.constant 146 : index
    %111 = vector.load %arg28[%c0_107, %c0_108, %c146_109] : memref<1x16x2560xf32, #tpu.memory_space<vmem>>, vector<1x8x324xf32>
    %112 = vector.shape_cast %111 : vector<1x8x324xf32> to vector<8x324xf32>
    %c7_110 = arith.constant 7 : index
    %c0_111 = arith.constant 0 : index
    %c0_112 = arith.constant 0 : index
    %113 = vector.load %arg5[%c7_110, %c0_111, %c0_112] : memref<9x8x8xf32, #tpu.memory_space<vmem>>, vector<1x8x8xf32>
    %114 = vector.shape_cast %113 : vector<1x8x8xf32> to vector<8x8xf32>
    %cst_113 = arith.constant dense<0.000000e+00> : vector<8x324xf32>
    %115 = tpu.matmul %114, %112, %cst_113 {dimension_numbers = #tpu.dot_dimension_numbers<[1], [0], [0], [1], [0, 0, 1, 1], [], []>} : vector<8x8xf32>, vector<8x324xf32>, vector<8x324xf32> -> vector<8x324xf32>
    %116 = arith.addf %110, %115 : vector<8x324xf32>
    %c0_114 = arith.constant 0 : index
    %c0_115 = arith.constant 0 : index
    %c147_116 = arith.constant 147 : index
    %117 = vector.load %arg28[%c0_114, %c0_115, %c147_116] : memref<1x16x2560xf32, #tpu.memory_space<vmem>>, vector<1x8x324xf32>
    %118 = vector.shape_cast %117 : vector<1x8x324xf32> to vector<8x324xf32>
    %c8_117 = arith.constant 8 : index
    %c0_118 = arith.constant 0 : index
    %c0_119 = arith.constant 0 : index
    %119 = vector.load %arg5[%c8_117, %c0_118, %c0_119] : memref<9x8x8xf32, #tpu.memory_space<vmem>>, vector<1x8x8xf32>
    %120 = vector.shape_cast %119 : vector<1x8x8xf32> to vector<8x8xf32>
    %cst_120 = arith.constant dense<0.000000e+00> : vector<8x324xf32>
    %121 = tpu.matmul %120, %118, %cst_120 {dimension_numbers = #tpu.dot_dimension_numbers<[1], [0], [0], [1], [0, 0, 1, 1], [], []>} : vector<8x8xf32>, vector<8x324xf32>, vector<8x324xf32> -> vector<8x324xf32>
    %122 = arith.addf %116, %121 : vector<8x324xf32>
    %c0_121 = arith.constant 0 : index
    %c0_122 = arith.constant 0 : index
    %123 = vector.load %arg6[%c0_121, %c0_122] : memref<8x1xf32, #tpu.memory_space<vmem>>, vector<8x1xf32>
    %124 = vector.broadcast %123 : vector<8x1xf32> to vector<8x324xf32>
    %125 = arith.addf %122, %124 : vector<8x324xf32>
    %cst_123 = arith.constant 0.000000e+00 : f32
    %126 = vector.broadcast %cst_123 : f32 to vector<8x324xf32>
    %127 = arith.maximumf %125, %126 : vector<8x324xf32>
    %cst_124 = arith.constant 0.000000e+00 : f32
    %128 = vector.broadcast %cst_124 : f32 to vector<1x324xf32>
    %129 = arith.cmpf ogt, %2, %128 : vector<1x324xf32>
    %cst_125 = arith.constant 0.000000e+00 : f32
    %130 = vector.shape_cast %129 : vector<1x324xi1> to vector<1x324xi1>
    %131 = vector.broadcast %130 : vector<1x324xi1> to vector<8x324xi1>
    %132 = vector.broadcast %cst_125 : f32 to vector<8x324xf32>
    %133 = arith.select %131, %127, %132 : vector<8x324xi1>, vector<8x324xf32>
    %c0_126 = arith.constant 0 : index
    %c0_127 = arith.constant 0 : index
    %c512 = arith.constant 512 : index
    %134 = vector.load %arg28[%c0_126, %c0_127, %c512] : memref<1x16x2560xf32, #tpu.memory_space<vmem>>, vector<1x8x324xf32>
    %135 = vector.shape_cast %134 : vector<1x8x324xf32> to vector<8x324xf32>
    %136 = vector.shape_cast %133 : vector<8x324xf32> to vector<1x8x324xf32>
    tpu.vector_store %arg28[%c0_126, %c0_127, %c512], %136 {strides = array<i32>} : memref<1x16x2560xf32, #tpu.memory_space<vmem>>, vector<1x8x324xf32>,
    %c0_128 = arith.constant 0 : index
    %c0_129 = arith.constant 0 : index
    %c512_130 = arith.constant 512 : index
    %137 = vector.load %arg28[%c0_128, %c0_129, %c512_130] : memref<1x16x2560xf32, #tpu.memory_space<vmem>>, vector<1x8x324xf32>
    %138 = vector.shape_cast %137 : vector<1x8x324xf32> to vector<8x324xf32>
    %c0_131 = arith.constant 0 : index
    %c0_132 = arith.constant 0 : index
    %c513 = arith.constant 513 : index
    %139 = vector.load %arg28[%c0_131, %c0_132, %c513] : memref<1x16x2560xf32, #tpu.memory_space<vmem>>, vector<1x8x324xf32>
    %140 = vector.shape_cast %139 : vector<1x8x324xf32> to vector<8x324xf32>
    %c0_133 = arith.constant 0 : index
    %c0_134 = arith.constant 0 : index
    %c530 = arith.constant 530 : index
    %141 = vector.load %arg28[%c0_133, %c0_134, %c530] : memref<1x16x2560xf32, #tpu.memory_space<vmem>>, vector<1x8x324xf32>
    %142 = vector.shape_cast %141 : vector<1x8x324xf32> to vector<8x324xf32>
    %c0_135 = arith.constant 0 : index
    %c0_136 = arith.constant 0 : index
    %c531 = arith.constant 531 : index
    %143 = vector.load %arg28[%c0_135, %c0_136, %c531] : memref<1x16x2560xf32, #tpu.memory_space<vmem>>, vector<1x8x324xf32>
    %144 = vector.shape_cast %143 : vector<1x8x324xf32> to vector<8x324xf32>
    %145 = arith.maximumf %138, %140 : vector<8x324xf32>
    %146 = arith.maximumf %142, %144 : vector<8x324xf32>
    %147 = arith.maximumf %145, %146 : vector<8x324xf32>
    %c0_137 = arith.constant 0 : index
    %c0_138 = arith.constant 0 : index
    %148 = vector.load %arg7[%c0_137, %c0_138] : memref<324x100xf32, #tpu.memory_space<vmem>>, vector<324x100xf32>
    %cst_139 = arith.constant dense<0.000000e+00> : vector<8x100xf32>
    %149 = tpu.matmul %147, %148, %cst_139 {dimension_numbers = #tpu.dot_dimension_numbers<[1], [0], [0], [1], [0, 0, 1, 1], [], []>} : vector<8x324xf32>, vector<324x100xf32>, vector<8x100xf32> -> vector<8x100xf32>
    %c0_140 = arith.constant 0 : index
    %c0_141 = arith.constant 0 : index
    %c896 = arith.constant 896 : index
    %150 = vector.load %arg28[%c0_140, %c0_141, %c896] : memref<1x16x2560xf32, #tpu.memory_space<vmem>>, vector<1x8x100xf32>
    %151 = vector.shape_cast %150 : vector<1x8x100xf32> to vector<8x100xf32>
    %152 = vector.shape_cast %149 : vector<8x100xf32> to vector<1x8x100xf32>
    tpu.vector_store %arg28[%c0_140, %c0_141, %c896], %152 {strides = array<i32>} : memref<1x16x2560xf32, #tpu.memory_space<vmem>>, vector<1x8x100xf32>,
    %c1_142 = arith.constant 1 : index
    %c0_143 = arith.constant 0 : index
    %153 = vector.load %arg2[%c1_142, %c0_143] : memref<5x384xf32, #tpu.memory_space<vmem>>, vector<1x100xf32>
    %c0_144 = arith.constant 0 : index
    %c0_145 = arith.constant 0 : index
    %c885 = arith.constant 885 : index
    %154 = vector.load %arg28[%c0_144, %c0_145, %c885] : memref<1x16x2560xf32, #tpu.memory_space<vmem>>, vector<1x8x100xf32>
    %155 = vector.shape_cast %154 : vector<1x8x100xf32> to vector<8x100xf32>
    %c0_146 = arith.constant 0 : index
    %c0_147 = arith.constant 0 : index
    %c0_148 = arith.constant 0 : index
    %156 = vector.load %arg8[%c0_146, %c0_147, %c0_148] : memref<9x8x8xf32, #tpu.memory_space<vmem>>, vector<1x8x8xf32>
    %157 = vector.shape_cast %156 : vector<1x8x8xf32> to vector<8x8xf32>
    %cst_149 = arith.constant dense<0.000000e+00> : vector<8x100xf32>
    %158 = tpu.matmul %157, %155, %cst_149 {dimension_numbers = #tpu.dot_dimension_numbers<[1], [0], [0], [1], [0, 0, 1, 1], [], []>} : vector<8x8xf32>, vector<8x100xf32>, vector<8x100xf32> -> vector<8x100xf32>
    %c0_150 = arith.constant 0 : index
    %c0_151 = arith.constant 0 : index
    %c886 = arith.constant 886 : index
    %159 = vector.load %arg28[%c0_150, %c0_151, %c886] : memref<1x16x2560xf32, #tpu.memory_space<vmem>>, vector<1x8x100xf32>
    %160 = vector.shape_cast %159 : vector<1x8x100xf32> to vector<8x100xf32>
    %c1_152 = arith.constant 1 : index
    %c0_153 = arith.constant 0 : index
    %c0_154 = arith.constant 0 : index
    %161 = vector.load %arg8[%c1_152, %c0_153, %c0_154] : memref<9x8x8xf32, #tpu.memory_space<vmem>>, vector<1x8x8xf32>
    %162 = vector.shape_cast %161 : vector<1x8x8xf32> to vector<8x8xf32>
    %cst_155 = arith.constant dense<0.000000e+00> : vector<8x100xf32>
    %163 = tpu.matmul %162, %160, %cst_155 {dimension_numbers = #tpu.dot_dimension_numbers<[1], [0], [0], [1], [0, 0, 1, 1], [], []>} : vector<8x8xf32>, vector<8x100xf32>, vector<8x100xf32> -> vector<8x100xf32>
    %164 = arith.addf %158, %163 : vector<8x100xf32>
    %c0_156 = arith.constant 0 : index
    %c0_157 = arith.constant 0 : index
    %c887 = arith.constant 887 : index
    %165 = vector.load %arg28[%c0_156, %c0_157, %c887] : memref<1x16x2560xf32, #tpu.memory_space<vmem>>, vector<1x8x100xf32>
    %166 = vector.shape_cast %165 : vector<1x8x100xf32> to vector<8x100xf32>
    %c2_158 = arith.constant 2 : index
    %c0_159 = arith.constant 0 : index
    %c0_160 = arith.constant 0 : index
    %167 = vector.load %arg8[%c2_158, %c0_159, %c0_160] : memref<9x8x8xf32, #tpu.memory_space<vmem>>, vector<1x8x8xf32>
    %168 = vector.shape_cast %167 : vector<1x8x8xf32> to vector<8x8xf32>
    %cst_161 = arith.constant dense<0.000000e+00> : vector<8x100xf32>
    %169 = tpu.matmul %168, %166, %cst_161 {dimension_numbers = #tpu.dot_dimension_numbers<[1], [0], [0], [1], [0, 0, 1, 1], [], []>} : vector<8x8xf32>, vector<8x100xf32>, vector<8x100xf32> -> vector<8x100xf32>
    %170 = arith.addf %164, %169 : vector<8x100xf32>
    %c0_162 = arith.constant 0 : index
    %c0_163 = arith.constant 0 : index
    %c895 = arith.constant 895 : index
    %171 = vector.load %arg28[%c0_162, %c0_163, %c895] : memref<1x16x2560xf32, #tpu.memory_space<vmem>>, vector<1x8x100xf32>
    %172 = vector.shape_cast %171 : vector<1x8x100xf32> to vector<8x100xf32>
    %c3_164 = arith.constant 3 : index
    %c0_165 = arith.constant 0 : index
    %c0_166 = arith.constant 0 : index
    %173 = vector.load %arg8[%c3_164, %c0_165, %c0_166] : memref<9x8x8xf32, #tpu.memory_space<vmem>>, vector<1x8x8xf32>
    %174 = vector.shape_cast %173 : vector<1x8x8xf32> to vector<8x8xf32>
    %cst_167 = arith.constant dense<0.000000e+00> : vector<8x100xf32>
    %175 = tpu.matmul %174, %172, %cst_167 {dimension_numbers = #tpu.dot_dimension_numbers<[1], [0], [0], [1], [0, 0, 1, 1], [], []>} : vector<8x8xf32>, vector<8x100xf32>, vector<8x100xf32> -> vector<8x100xf32>
    %176 = arith.addf %170, %175 : vector<8x100xf32>
    %c0_168 = arith.constant 0 : index
    %c0_169 = arith.constant 0 : index
    %c896_170 = arith.constant 896 : index
    %177 = vector.load %arg28[%c0_168, %c0_169, %c896_170] : memref<1x16x2560xf32, #tpu.memory_space<vmem>>, vector<1x8x100xf32>
    %178 = vector.shape_cast %177 : vector<1x8x100xf32> to vector<8x100xf32>
    %c4_171 = arith.constant 4 : index
    %c0_172 = arith.constant 0 : index
    %c0_173 = arith.constant 0 : index
    %179 = vector.load %arg8[%c4_171, %c0_172, %c0_173] : memref<9x8x8xf32, #tpu.memory_space<vmem>>, vector<1x8x8xf32>
    %180 = vector.shape_cast %179 : vector<1x8x8xf32> to vector<8x8xf32>
    %cst_174 = arith.constant dense<0.000000e+00> : vector<8x100xf32>
    %181 = tpu.matmul %180, %178, %cst_174 {dimension_numbers = #tpu.dot_dimension_numbers<[1], [0], [0], [1], [0, 0, 1, 1], [], []>} : vector<8x8xf32>, vector<8x100xf32>, vector<8x100xf32> -> vector<8x100xf32>
    %182 = arith.addf %176, %181 : vector<8x100xf32>
    %c0_175 = arith.constant 0 : index
    %c0_176 = arith.constant 0 : index
    %c897 = arith.constant 897 : index
    %183 = vector.load %arg28[%c0_175, %c0_176, %c897] : memref<1x16x2560xf32, #tpu.memory_space<vmem>>, vector<1x8x100xf32>
    %184 = vector.shape_cast %183 : vector<1x8x100xf32> to vector<8x100xf32>
    %c5_177 = arith.constant 5 : index
    %c0_178 = arith.constant 0 : index
    %c0_179 = arith.constant 0 : index
    %185 = vector.load %arg8[%c5_177, %c0_178, %c0_179] : memref<9x8x8xf32, #tpu.memory_space<vmem>>, vector<1x8x8xf32>
    %186 = vector.shape_cast %185 : vector<1x8x8xf32> to vector<8x8xf32>
    %cst_180 = arith.constant dense<0.000000e+00> : vector<8x100xf32>
    %187 = tpu.matmul %186, %184, %cst_180 {dimension_numbers = #tpu.dot_dimension_numbers<[1], [0], [0], [1], [0, 0, 1, 1], [], []>} : vector<8x8xf32>, vector<8x100xf32>, vector<8x100xf32> -> vector<8x100xf32>
    %188 = arith.addf %182, %187 : vector<8x100xf32>
    %c0_181 = arith.constant 0 : index
    %c0_182 = arith.constant 0 : index
    %c905 = arith.constant 905 : index
    %189 = vector.load %arg28[%c0_181, %c0_182, %c905] : memref<1x16x2560xf32, #tpu.memory_space<vmem>>, vector<1x8x100xf32>
    %190 = vector.shape_cast %189 : vector<1x8x100xf32> to vector<8x100xf32>
    %c6_183 = arith.constant 6 : index
    %c0_184 = arith.constant 0 : index
    %c0_185 = arith.constant 0 : index
    %191 = vector.load %arg8[%c6_183, %c0_184, %c0_185] : memref<9x8x8xf32, #tpu.memory_space<vmem>>, vector<1x8x8xf32>
    %192 = vector.shape_cast %191 : vector<1x8x8xf32> to vector<8x8xf32>
    %cst_186 = arith.constant dense<0.000000e+00> : vector<8x100xf32>
    %193 = tpu.matmul %192, %190, %cst_186 {dimension_numbers = #tpu.dot_dimension_numbers<[1], [0], [0], [1], [0, 0, 1, 1], [], []>} : vector<8x8xf32>, vector<8x100xf32>, vector<8x100xf32> -> vector<8x100xf32>
    %194 = arith.addf %188, %193 : vector<8x100xf32>
    %c0_187 = arith.constant 0 : index
    %c0_188 = arith.constant 0 : index
    %c906 = arith.constant 906 : index
    %195 = vector.load %arg28[%c0_187, %c0_188, %c906] : memref<1x16x2560xf32, #tpu.memory_space<vmem>>, vector<1x8x100xf32>
    %196 = vector.shape_cast %195 : vector<1x8x100xf32> to vector<8x100xf32>
    %c7_189 = arith.constant 7 : index
    %c0_190 = arith.constant 0 : index
    %c0_191 = arith.constant 0 : index
    %197 = vector.load %arg8[%c7_189, %c0_190, %c0_191] : memref<9x8x8xf32, #tpu.memory_space<vmem>>, vector<1x8x8xf32>
    %198 = vector.shape_cast %197 : vector<1x8x8xf32> to vector<8x8xf32>
    %cst_192 = arith.constant dense<0.000000e+00> : vector<8x100xf32>
    %199 = tpu.matmul %198, %196, %cst_192 {dimension_numbers = #tpu.dot_dimension_numbers<[1], [0], [0], [1], [0, 0, 1, 1], [], []>} : vector<8x8xf32>, vector<8x100xf32>, vector<8x100xf32> -> vector<8x100xf32>
    %200 = arith.addf %194, %199 : vector<8x100xf32>
    %c0_193 = arith.constant 0 : index
    %c0_194 = arith.constant 0 : index
    %c907 = arith.constant 907 : index
    %201 = vector.load %arg28[%c0_193, %c0_194, %c907] : memref<1x16x2560xf32, #tpu.memory_space<vmem>>, vector<1x8x100xf32>
    %202 = vector.shape_cast %201 : vector<1x8x100xf32> to vector<8x100xf32>
    %c8_195 = arith.constant 8 : index
    %c0_196 = arith.constant 0 : index
    %c0_197 = arith.constant 0 : index
    %203 = vector.load %arg8[%c8_195, %c0_196, %c0_197] : memref<9x8x8xf32, #tpu.memory_space<vmem>>, vector<1x8x8xf32>
    %204 = vector.shape_cast %203 : vector<1x8x8xf32> to vector<8x8xf32>
    %cst_198 = arith.constant dense<0.000000e+00> : vector<8x100xf32>
    %205 = tpu.matmul %204, %202, %cst_198 {dimension_numbers = #tpu.dot_dimension_numbers<[1], [0], [0], [1], [0, 0, 1, 1], [], []>} : vector<8x8xf32>, vector<8x100xf32>, vector<8x100xf32> -> vector<8x100xf32>
    %206 = arith.addf %200, %205 : vector<8x100xf32>
    %c0_199 = arith.constant 0 : index
    %c0_200 = arith.constant 0 : index
    %207 = vector.load %arg9[%c0_199, %c0_200] : memref<8x1xf32, #tpu.memory_space<vmem>>, vector<8x1xf32>
    %208 = vector.broadcast %207 : vector<8x1xf32> to vector<8x100xf32>
    %209 = arith.addf %206, %208 : vector<8x100xf32>
    %cst_201 = arith.constant 0.000000e+00 : f32
    %210 = vector.broadcast %cst_201 : f32 to vector<8x100xf32>
    %211 = arith.maximumf %209, %210 : vector<8x100xf32>
    %cst_202 = arith.constant 0.000000e+00 : f32
    %212 = vector.broadcast %cst_202 : f32 to vector<1x100xf32>
    %213 = arith.cmpf ogt, %153, %212 : vector<1x100xf32>
    %cst_203 = arith.constant 0.000000e+00 : f32
    %214 = vector.shape_cast %213 : vector<1x100xi1> to vector<1x100xi1>
    %215 = vector.broadcast %214 : vector<1x100xi1> to vector<8x100xi1>
    %216 = vector.broadcast %cst_203 : f32 to vector<8x100xf32>
    %217 = arith.select %215, %211, %216 : vector<8x100xi1>, vector<8x100xf32>
    %c0_204 = arith.constant 0 : index
    %c0_205 = arith.constant 0 : index
    %c1024 = arith.constant 1024 : index
    %218 = vector.load %arg28[%c0_204, %c0_205, %c1024] : memref<1x16x2560xf32, #tpu.memory_space<vmem>>, vector<1x8x100xf32>
    %219 = vector.shape_cast %218 : vector<1x8x100xf32> to vector<8x100xf32>
    %220 = vector.shape_cast %217 : vector<8x100xf32> to vector<1x8x100xf32>
    tpu.vector_store %arg28[%c0_204, %c0_205, %c1024], %220 {strides = array<i32>} : memref<1x16x2560xf32, #tpu.memory_space<vmem>>, vector<1x8x100xf32>,
    %c0_206 = arith.constant 0 : index
    %c0_207 = arith.constant 0 : index
    %c1013 = arith.constant 1013 : index
    %221 = vector.load %arg28[%c0_206, %c0_207, %c1013] : memref<1x16x2560xf32, #tpu.memory_space<vmem>>, vector<1x8x100xf32>
    %222 = vector.shape_cast %221 : vector<1x8x100xf32> to vector<8x100xf32>
    %c0_208 = arith.constant 0 : index
    %c0_209 = arith.constant 0 : index
    %c0_210 = arith.constant 0 : index
    %223 = vector.load %arg10[%c0_208, %c0_209, %c0_210] : memref<9x8x8xf32, #tpu.memory_space<vmem>>, vector<1x8x8xf32>
    %224 = vector.shape_cast %223 : vector<1x8x8xf32> to vector<8x8xf32>
    %cst_211 = arith.constant dense<0.000000e+00> : vector<8x100xf32>
    %225 = tpu.matmul %224, %222, %cst_211 {dimension_numbers = #tpu.dot_dimension_numbers<[1], [0], [0], [1], [0, 0, 1, 1], [], []>} : vector<8x8xf32>, vector<8x100xf32>, vector<8x100xf32> -> vector<8x100xf32>
    %c0_212 = arith.constant 0 : index
    %c0_213 = arith.constant 0 : index
    %c1014 = arith.constant 1014 : index
    %226 = vector.load %arg28[%c0_212, %c0_213, %c1014] : memref<1x16x2560xf32, #tpu.memory_space<vmem>>, vector<1x8x100xf32>
    %227 = vector.shape_cast %226 : vector<1x8x100xf32> to vector<8x100xf32>
    %c1_214 = arith.constant 1 : index
    %c0_215 = arith.constant 0 : index
    %c0_216 = arith.constant 0 : index
    %228 = vector.load %arg10[%c1_214, %c0_215, %c0_216] : memref<9x8x8xf32, #tpu.memory_space<vmem>>, vector<1x8x8xf32>
    %229 = vector.shape_cast %228 : vector<1x8x8xf32> to vector<8x8xf32>
    %cst_217 = arith.constant dense<0.000000e+00> : vector<8x100xf32>
    %230 = tpu.matmul %229, %227, %cst_217 {dimension_numbers = #tpu.dot_dimension_numbers<[1], [0], [0], [1], [0, 0, 1, 1], [], []>} : vector<8x8xf32>, vector<8x100xf32>, vector<8x100xf32> -> vector<8x100xf32>
    %231 = arith.addf %225, %230 : vector<8x100xf32>
    %c0_218 = arith.constant 0 : index
    %c0_219 = arith.constant 0 : index
    %c1015 = arith.constant 1015 : index
    %232 = vector.load %arg28[%c0_218, %c0_219, %c1015] : memref<1x16x2560xf32, #tpu.memory_space<vmem>>, vector<1x8x100xf32>
    %233 = vector.shape_cast %232 : vector<1x8x100xf32> to vector<8x100xf32>
    %c2_220 = arith.constant 2 : index
    %c0_221 = arith.constant 0 : index
    %c0_222 = arith.constant 0 : index
    %234 = vector.load %arg10[%c2_220, %c0_221, %c0_222] : memref<9x8x8xf32, #tpu.memory_space<vmem>>, vector<1x8x8xf32>
    %235 = vector.shape_cast %234 : vector<1x8x8xf32> to vector<8x8xf32>
    %cst_223 = arith.constant dense<0.000000e+00> : vector<8x100xf32>
    %236 = tpu.matmul %235, %233, %cst_223 {dimension_numbers = #tpu.dot_dimension_numbers<[1], [0], [0], [1], [0, 0, 1, 1], [], []>} : vector<8x8xf32>, vector<8x100xf32>, vector<8x100xf32> -> vector<8x100xf32>
    %237 = arith.addf %231, %236 : vector<8x100xf32>
    %c0_224 = arith.constant 0 : index
    %c0_225 = arith.constant 0 : index
    %c1023 = arith.constant 1023 : index
    %238 = vector.load %arg28[%c0_224, %c0_225, %c1023] : memref<1x16x2560xf32, #tpu.memory_space<vmem>>, vector<1x8x100xf32>
    %239 = vector.shape_cast %238 : vector<1x8x100xf32> to vector<8x100xf32>
    %c3_226 = arith.constant 3 : index
    %c0_227 = arith.constant 0 : index
    %c0_228 = arith.constant 0 : index
    %240 = vector.load %arg10[%c3_226, %c0_227, %c0_228] : memref<9x8x8xf32, #tpu.memory_space<vmem>>, vector<1x8x8xf32>
    %241 = vector.shape_cast %240 : vector<1x8x8xf32> to vector<8x8xf32>
    %cst_229 = arith.constant dense<0.000000e+00> : vector<8x100xf32>
    %242 = tpu.matmul %241, %239, %cst_229 {dimension_numbers = #tpu.dot_dimension_numbers<[1], [0], [0], [1], [0, 0, 1, 1], [], []>} : vector<8x8xf32>, vector<8x100xf32>, vector<8x100xf32> -> vector<8x100xf32>
    %243 = arith.addf %237, %242 : vector<8x100xf32>
    %c0_230 = arith.constant 0 : index
    %c0_231 = arith.constant 0 : index
    %c1024_232 = arith.constant 1024 : index
    %244 = vector.load %arg28[%c0_230, %c0_231, %c1024_232] : memref<1x16x2560xf32, #tpu.memory_space<vmem>>, vector<1x8x100xf32>
    %245 = vector.shape_cast %244 : vector<1x8x100xf32> to vector<8x100xf32>
    %c4_233 = arith.constant 4 : index
    %c0_234 = arith.constant 0 : index
    %c0_235 = arith.constant 0 : index
    %246 = vector.load %arg10[%c4_233, %c0_234, %c0_235] : memref<9x8x8xf32, #tpu.memory_space<vmem>>, vector<1x8x8xf32>
    %247 = vector.shape_cast %246 : vector<1x8x8xf32> to vector<8x8xf32>
    %cst_236 = arith.constant dense<0.000000e+00> : vector<8x100xf32>
    %248 = tpu.matmul %247, %245, %cst_236 {dimension_numbers = #tpu.dot_dimension_numbers<[1], [0], [0], [1], [0, 0, 1, 1], [], []>} : vector<8x8xf32>, vector<8x100xf32>, vector<8x100xf32> -> vector<8x100xf32>
    %249 = arith.addf %243, %248 : vector<8x100xf32>
    %c0_237 = arith.constant 0 : index
    %c0_238 = arith.constant 0 : index
    %c1025 = arith.constant 1025 : index
    %250 = vector.load %arg28[%c0_237, %c0_238, %c1025] : memref<1x16x2560xf32, #tpu.memory_space<vmem>>, vector<1x8x100xf32>
    %251 = vector.shape_cast %250 : vector<1x8x100xf32> to vector<8x100xf32>
    %c5_239 = arith.constant 5 : index
    %c0_240 = arith.constant 0 : index
    %c0_241 = arith.constant 0 : index
    %252 = vector.load %arg10[%c5_239, %c0_240, %c0_241] : memref<9x8x8xf32, #tpu.memory_space<vmem>>, vector<1x8x8xf32>
    %253 = vector.shape_cast %252 : vector<1x8x8xf32> to vector<8x8xf32>
    %cst_242 = arith.constant dense<0.000000e+00> : vector<8x100xf32>
    %254 = tpu.matmul %253, %251, %cst_242 {dimension_numbers = #tpu.dot_dimension_numbers<[1], [0], [0], [1], [0, 0, 1, 1], [], []>} : vector<8x8xf32>, vector<8x100xf32>, vector<8x100xf32> -> vector<8x100xf32>
    %255 = arith.addf %249, %254 : vector<8x100xf32>
    %c0_243 = arith.constant 0 : index
    %c0_244 = arith.constant 0 : index
    %c1033 = arith.constant 1033 : index
    %256 = vector.load %arg28[%c0_243, %c0_244, %c1033] : memref<1x16x2560xf32, #tpu.memory_space<vmem>>, vector<1x8x100xf32>
    %257 = vector.shape_cast %256 : vector<1x8x100xf32> to vector<8x100xf32>
    %c6_245 = arith.constant 6 : index
    %c0_246 = arith.constant 0 : index
    %c0_247 = arith.constant 0 : index
    %258 = vector.load %arg10[%c6_245, %c0_246, %c0_247] : memref<9x8x8xf32, #tpu.memory_space<vmem>>, vector<1x8x8xf32>
    %259 = vector.shape_cast %258 : vector<1x8x8xf32> to vector<8x8xf32>
    %cst_248 = arith.constant dense<0.000000e+00> : vector<8x100xf32>
    %260 = tpu.matmul %259, %257, %cst_248 {dimension_numbers = #tpu.dot_dimension_numbers<[1], [0], [0], [1], [0, 0, 1, 1], [], []>} : vector<8x8xf32>, vector<8x100xf32>, vector<8x100xf32> -> vector<8x100xf32>
    %261 = arith.addf %255, %260 : vector<8x100xf32>
    %c0_249 = arith.constant 0 : index
    %c0_250 = arith.constant 0 : index
    %c1034 = arith.constant 1034 : index
    %262 = vector.load %arg28[%c0_249, %c0_250, %c1034] : memref<1x16x2560xf32, #tpu.memory_space<vmem>>, vector<1x8x100xf32>
    %263 = vector.shape_cast %262 : vector<1x8x100xf32> to vector<8x100xf32>
    %c7_251 = arith.constant 7 : index
    %c0_252 = arith.constant 0 : index
    %c0_253 = arith.constant 0 : index
    %264 = vector.load %arg10[%c7_251, %c0_252, %c0_253] : memref<9x8x8xf32, #tpu.memory_space<vmem>>, vector<1x8x8xf32>
    %265 = vector.shape_cast %264 : vector<1x8x8xf32> to vector<8x8xf32>
    %cst_254 = arith.constant dense<0.000000e+00> : vector<8x100xf32>
    %266 = tpu.matmul %265, %263, %cst_254 {dimension_numbers = #tpu.dot_dimension_numbers<[1], [0], [0], [1], [0, 0, 1, 1], [], []>} : vector<8x8xf32>, vector<8x100xf32>, vector<8x100xf32> -> vector<8x100xf32>
    %267 = arith.addf %261, %266 : vector<8x100xf32>
    %c0_255 = arith.constant 0 : index
    %c0_256 = arith.constant 0 : index
    %c1035 = arith.constant 1035 : index
    %268 = vector.load %arg28[%c0_255, %c0_256, %c1035] : memref<1x16x2560xf32, #tpu.memory_space<vmem>>, vector<1x8x100xf32>
    %269 = vector.shape_cast %268 : vector<1x8x100xf32> to vector<8x100xf32>
    %c8_257 = arith.constant 8 : index
    %c0_258 = arith.constant 0 : index
    %c0_259 = arith.constant 0 : index
    %270 = vector.load %arg10[%c8_257, %c0_258, %c0_259] : memref<9x8x8xf32, #tpu.memory_space<vmem>>, vector<1x8x8xf32>
    %271 = vector.shape_cast %270 : vector<1x8x8xf32> to vector<8x8xf32>
    %cst_260 = arith.constant dense<0.000000e+00> : vector<8x100xf32>
    %272 = tpu.matmul %271, %269, %cst_260 {dimension_numbers = #tpu.dot_dimension_numbers<[1], [0], [0], [1], [0, 0, 1, 1], [], []>} : vector<8x8xf32>, vector<8x100xf32>, vector<8x100xf32> -> vector<8x100xf32>
    %273 = arith.addf %267, %272 : vector<8x100xf32>
    %c0_261 = arith.constant 0 : index
    %c0_262 = arith.constant 0 : index
    %274 = vector.load %arg11[%c0_261, %c0_262] : memref<8x1xf32, #tpu.memory_space<vmem>>, vector<8x1xf32>
    %275 = vector.broadcast %274 : vector<8x1xf32> to vector<8x100xf32>
    %276 = arith.addf %273, %275 : vector<8x100xf32>
    %cst_263 = arith.constant 0.000000e+00 : f32
    %277 = vector.broadcast %cst_263 : f32 to vector<8x100xf32>
    %278 = arith.maximumf %276, %277 : vector<8x100xf32>
    %cst_264 = arith.constant 0.000000e+00 : f32
    %279 = vector.broadcast %cst_264 : f32 to vector<1x100xf32>
    %280 = arith.cmpf ogt, %153, %279 : vector<1x100xf32>
    %cst_265 = arith.constant 0.000000e+00 : f32
    %281 = vector.shape_cast %280 : vector<1x100xi1> to vector<1x100xi1>
    %282 = vector.broadcast %281 : vector<1x100xi1> to vector<8x100xi1>
    %283 = vector.broadcast %cst_265 : f32 to vector<8x100xf32>
    %284 = arith.select %282, %278, %283 : vector<8x100xi1>, vector<8x100xf32>
    %c0_266 = arith.constant 0 : index
    %c0_267 = arith.constant 0 : index
    %c1152 = arith.constant 1152 : index
    %285 = vector.load %arg28[%c0_266, %c0_267, %c1152] : memref<1x16x2560xf32, #tpu.memory_space<vmem>>, vector<1x8x100xf32>
    %286 = vector.shape_cast %285 : vector<1x8x100xf32> to vector<8x100xf32>
    %287 = vector.shape_cast %284 : vector<8x100xf32> to vector<1x8x100xf32>
    tpu.vector_store %arg28[%c0_266, %c0_267, %c1152], %287 {strides = array<i32>} : memref<1x16x2560xf32, #tpu.memory_space<vmem>>, vector<1x8x100xf32>,
    %c0_268 = arith.constant 0 : index
    %c0_269 = arith.constant 0 : index
    %c1152_270 = arith.constant 1152 : index
    %288 = vector.load %arg28[%c0_268, %c0_269, %c1152_270] : memref<1x16x2560xf32, #tpu.memory_space<vmem>>, vector<1x8x100xf32>
    %289 = vector.shape_cast %288 : vector<1x8x100xf32> to vector<8x100xf32>
    %c0_271 = arith.constant 0 : index
    %c0_272 = arith.constant 0 : index
    %c1153 = arith.constant 1153 : index
    %290 = vector.load %arg28[%c0_271, %c0_272, %c1153] : memref<1x16x2560xf32, #tpu.memory_space<vmem>>, vector<1x8x100xf32>
    %291 = vector.shape_cast %290 : vector<1x8x100xf32> to vector<8x100xf32>
    %c0_273 = arith.constant 0 : index
    %c0_274 = arith.constant 0 : index
    %c1162 = arith.constant 1162 : index
    %292 = vector.load %arg28[%c0_273, %c0_274, %c1162] : memref<1x16x2560xf32, #tpu.memory_space<vmem>>, vector<1x8x100xf32>
    %293 = vector.shape_cast %292 : vector<1x8x100xf32> to vector<8x100xf32>
    %c0_275 = arith.constant 0 : index
    %c0_276 = arith.constant 0 : index
    %c1163 = arith.constant 1163 : index
    %294 = vector.load %arg28[%c0_275, %c0_276, %c1163] : memref<1x16x2560xf32, #tpu.memory_space<vmem>>, vector<1x8x100xf32>
    %295 = vector.shape_cast %294 : vector<1x8x100xf32> to vector<8x100xf32>
    %296 = arith.maximumf %289, %291 : vector<8x100xf32>
    %297 = arith.maximumf %293, %295 : vector<8x100xf32>
    %298 = arith.maximumf %296, %297 : vector<8x100xf32>
    %c0_277 = arith.constant 0 : index
    %c0_278 = arith.constant 0 : index
    %299 = vector.load %arg12[%c0_277, %c0_278] : memref<100x36xf32, #tpu.memory_space<vmem>>, vector<100x36xf32>
    %cst_279 = arith.constant dense<0.000000e+00> : vector<8x36xf32>
    %300 = tpu.matmul %298, %299, %cst_279 {dimension_numbers = #tpu.dot_dimension_numbers<[1], [0], [0], [1], [0, 0, 1, 1], [], []>} : vector<8x100xf32>, vector<100x36xf32>, vector<8x36xf32> -> vector<8x36xf32>
    %c0_280 = arith.constant 0 : index
    %c0_281 = arith.constant 0 : index
    %c1280 = arith.constant 1280 : index
    %301 = vector.load %arg28[%c0_280, %c0_281, %c1280] : memref<1x16x2560xf32, #tpu.memory_space<vmem>>, vector<1x8x36xf32>
    %302 = vector.shape_cast %301 : vector<1x8x36xf32> to vector<8x36xf32>
    %303 = vector.shape_cast %300 : vector<8x36xf32> to vector<1x8x36xf32>
    tpu.vector_store %arg28[%c0_280, %c0_281, %c1280], %303 {strides = array<i32>} : memref<1x16x2560xf32, #tpu.memory_space<vmem>>, vector<1x8x36xf32>,
    %c2_282 = arith.constant 2 : index
    %c0_283 = arith.constant 0 : index
    %304 = vector.load %arg2[%c2_282, %c0_283] : memref<5x384xf32, #tpu.memory_space<vmem>>, vector<1x36xf32>
    %c0_284 = arith.constant 0 : index
    %c0_285 = arith.constant 0 : index
    %c1273 = arith.constant 1273 : index
    %305 = vector.load %arg28[%c0_284, %c0_285, %c1273] : memref<1x16x2560xf32, #tpu.memory_space<vmem>>, vector<1x8x36xf32>
    %306 = vector.shape_cast %305 : vector<1x8x36xf32> to vector<8x36xf32>
    %c0_286 = arith.constant 0 : index
    %c0_287 = arith.constant 0 : index
    %c0_288 = arith.constant 0 : index
    %307 = vector.load %arg13[%c0_286, %c0_287, %c0_288] : memref<9x16x8xf32, #tpu.memory_space<vmem>>, vector<1x16x8xf32>
    %308 = vector.shape_cast %307 : vector<1x16x8xf32> to vector<16x8xf32>
    %cst_289 = arith.constant dense<0.000000e+00> : vector<16x36xf32>
    %309 = tpu.matmul %308, %306, %cst_289 {dimension_numbers = #tpu.dot_dimension_numbers<[1], [0], [0], [1], [0, 0, 1, 1], [], []>} : vector<16x8xf32>, vector<8x36xf32>, vector<16x36xf32> -> vector<16x36xf32>
    %c0_290 = arith.constant 0 : index
    %c0_291 = arith.constant 0 : index
    %c1274 = arith.constant 1274 : index
    %310 = vector.load %arg28[%c0_290, %c0_291, %c1274] : memref<1x16x2560xf32, #tpu.memory_space<vmem>>, vector<1x8x36xf32>
    %311 = vector.shape_cast %310 : vector<1x8x36xf32> to vector<8x36xf32>
    %c1_292 = arith.constant 1 : index
    %c0_293 = arith.constant 0 : index
    %c0_294 = arith.constant 0 : index
    %312 = vector.load %arg13[%c1_292, %c0_293, %c0_294] : memref<9x16x8xf32, #tpu.memory_space<vmem>>, vector<1x16x8xf32>
    %313 = vector.shape_cast %312 : vector<1x16x8xf32> to vector<16x8xf32>
    %cst_295 = arith.constant dense<0.000000e+00> : vector<16x36xf32>
    %314 = tpu.matmul %313, %311, %cst_295 {dimension_numbers = #tpu.dot_dimension_numbers<[1], [0], [0], [1], [0, 0, 1, 1], [], []>} : vector<16x8xf32>, vector<8x36xf32>, vector<16x36xf32> -> vector<16x36xf32>
    %315 = arith.addf %309, %314 : vector<16x36xf32>
    %c0_296 = arith.constant 0 : index
    %c0_297 = arith.constant 0 : index
    %c1275 = arith.constant 1275 : index
    %316 = vector.load %arg28[%c0_296, %c0_297, %c1275] : memref<1x16x2560xf32, #tpu.memory_space<vmem>>, vector<1x8x36xf32>
    %317 = vector.shape_cast %316 : vector<1x8x36xf32> to vector<8x36xf32>
    %c2_298 = arith.constant 2 : index
    %c0_299 = arith.constant 0 : index
    %c0_300 = arith.constant 0 : index
    %318 = vector.load %arg13[%c2_298, %c0_299, %c0_300] : memref<9x16x8xf32, #tpu.memory_space<vmem>>, vector<1x16x8xf32>
    %319 = vector.shape_cast %318 : vector<1x16x8xf32> to vector<16x8xf32>
    %cst_301 = arith.constant dense<0.000000e+00> : vector<16x36xf32>
    %320 = tpu.matmul %319, %317, %cst_301 {dimension_numbers = #tpu.dot_dimension_numbers<[1], [0], [0], [1], [0, 0, 1, 1], [], []>} : vector<16x8xf32>, vector<8x36xf32>, vector<16x36xf32> -> vector<16x36xf32>
    %321 = arith.addf %315, %320 : vector<16x36xf32>
    %c0_302 = arith.constant 0 : index
    %c0_303 = arith.constant 0 : index
    %c1279 = arith.constant 1279 : index
    %322 = vector.load %arg28[%c0_302, %c0_303, %c1279] : memref<1x16x2560xf32, #tpu.memory_space<vmem>>, vector<1x8x36xf32>
    %323 = vector.shape_cast %322 : vector<1x8x36xf32> to vector<8x36xf32>
    %c3_304 = arith.constant 3 : index
    %c0_305 = arith.constant 0 : index
    %c0_306 = arith.constant 0 : index
    %324 = vector.load %arg13[%c3_304, %c0_305, %c0_306] : memref<9x16x8xf32, #tpu.memory_space<vmem>>, vector<1x16x8xf32>
    %325 = vector.shape_cast %324 : vector<1x16x8xf32> to vector<16x8xf32>
    %cst_307 = arith.constant dense<0.000000e+00> : vector<16x36xf32>
    %326 = tpu.matmul %325, %323, %cst_307 {dimension_numbers = #tpu.dot_dimension_numbers<[1], [0], [0], [1], [0, 0, 1, 1], [], []>} : vector<16x8xf32>, vector<8x36xf32>, vector<16x36xf32> -> vector<16x36xf32>
    %327 = arith.addf %321, %326 : vector<16x36xf32>
    %c0_308 = arith.constant 0 : index
    %c0_309 = arith.constant 0 : index
    %c1280_310 = arith.constant 1280 : index
    %328 = vector.load %arg28[%c0_308, %c0_309, %c1280_310] : memref<1x16x2560xf32, #tpu.memory_space<vmem>>, vector<1x8x36xf32>
    %329 = vector.shape_cast %328 : vector<1x8x36xf32> to vector<8x36xf32>
    %c4_311 = arith.constant 4 : index
    %c0_312 = arith.constant 0 : index
    %c0_313 = arith.constant 0 : index
    %330 = vector.load %arg13[%c4_311, %c0_312, %c0_313] : memref<9x16x8xf32, #tpu.memory_space<vmem>>, vector<1x16x8xf32>
    %331 = vector.shape_cast %330 : vector<1x16x8xf32> to vector<16x8xf32>
    %cst_314 = arith.constant dense<0.000000e+00> : vector<16x36xf32>
    %332 = tpu.matmul %331, %329, %cst_314 {dimension_numbers = #tpu.dot_dimension_numbers<[1], [0], [0], [1], [0, 0, 1, 1], [], []>} : vector<16x8xf32>, vector<8x36xf32>, vector<16x36xf32> -> vector<16x36xf32>
    %333 = arith.addf %327, %332 : vector<16x36xf32>
    %c0_315 = arith.constant 0 : index
    %c0_316 = arith.constant 0 : index
    %c1281 = arith.constant 1281 : index
    %334 = vector.load %arg28[%c0_315, %c0_316, %c1281] : memref<1x16x2560xf32, #tpu.memory_space<vmem>>, vector<1x8x36xf32>
    %335 = vector.shape_cast %334 : vector<1x8x36xf32> to vector<8x36xf32>
    %c5_317 = arith.constant 5 : index
    %c0_318 = arith.constant 0 : index
    %c0_319 = arith.constant 0 : index
    %336 = vector.load %arg13[%c5_317, %c0_318, %c0_319] : memref<9x16x8xf32, #tpu.memory_space<vmem>>, vector<1x16x8xf32>
    %337 = vector.shape_cast %336 : vector<1x16x8xf32> to vector<16x8xf32>
    %cst_320 = arith.constant dense<0.000000e+00> : vector<16x36xf32>
    %338 = tpu.matmul %337, %335, %cst_320 {dimension_numbers = #tpu.dot_dimension_numbers<[1], [0], [0], [1], [0, 0, 1, 1], [], []>} : vector<16x8xf32>, vector<8x36xf32>, vector<16x36xf32> -> vector<16x36xf32>
    %339 = arith.addf %333, %338 : vector<16x36xf32>
    %c0_321 = arith.constant 0 : index
    %c0_322 = arith.constant 0 : index
    %c1285 = arith.constant 1285 : index
    %340 = vector.load %arg28[%c0_321, %c0_322, %c1285] : memref<1x16x2560xf32, #tpu.memory_space<vmem>>, vector<1x8x36xf32>
    %341 = vector.shape_cast %340 : vector<1x8x36xf32> to vector<8x36xf32>
    %c6_323 = arith.constant 6 : index
    %c0_324 = arith.constant 0 : index
    %c0_325 = arith.constant 0 : index
    %342 = vector.load %arg13[%c6_323, %c0_324, %c0_325] : memref<9x16x8xf32, #tpu.memory_space<vmem>>, vector<1x16x8xf32>
    %343 = vector.shape_cast %342 : vector<1x16x8xf32> to vector<16x8xf32>
    %cst_326 = arith.constant dense<0.000000e+00> : vector<16x36xf32>
    %344 = tpu.matmul %343, %341, %cst_326 {dimension_numbers = #tpu.dot_dimension_numbers<[1], [0], [0], [1], [0, 0, 1, 1], [], []>} : vector<16x8xf32>, vector<8x36xf32>, vector<16x36xf32> -> vector<16x36xf32>
    %345 = arith.addf %339, %344 : vector<16x36xf32>
    %c0_327 = arith.constant 0 : index
    %c0_328 = arith.constant 0 : index
    %c1286 = arith.constant 1286 : index
    %346 = vector.load %arg28[%c0_327, %c0_328, %c1286] : memref<1x16x2560xf32, #tpu.memory_space<vmem>>, vector<1x8x36xf32>
    %347 = vector.shape_cast %346 : vector<1x8x36xf32> to vector<8x36xf32>
    %c7_329 = arith.constant 7 : index
    %c0_330 = arith.constant 0 : index
    %c0_331 = arith.constant 0 : index
    %348 = vector.load %arg13[%c7_329, %c0_330, %c0_331] : memref<9x16x8xf32, #tpu.memory_space<vmem>>, vector<1x16x8xf32>
    %349 = vector.shape_cast %348 : vector<1x16x8xf32> to vector<16x8xf32>
    %cst_332 = arith.constant dense<0.000000e+00> : vector<16x36xf32>
    %350 = tpu.matmul %349, %347, %cst_332 {dimension_numbers = #tpu.dot_dimension_numbers<[1], [0], [0], [1], [0, 0, 1, 1], [], []>} : vector<16x8xf32>, vector<8x36xf32>, vector<16x36xf32> -> vector<16x36xf32>
    %351 = arith.addf %345, %350 : vector<16x36xf32>
    %c0_333 = arith.constant 0 : index
    %c0_334 = arith.constant 0 : index
    %c1287 = arith.constant 1287 : index
    %352 = vector.load %arg28[%c0_333, %c0_334, %c1287] : memref<1x16x2560xf32, #tpu.memory_space<vmem>>, vector<1x8x36xf32>
    %353 = vector.shape_cast %352 : vector<1x8x36xf32> to vector<8x36xf32>
    %c8_335 = arith.constant 8 : index
    %c0_336 = arith.constant 0 : index
    %c0_337 = arith.constant 0 : index
    %354 = vector.load %arg13[%c8_335, %c0_336, %c0_337] : memref<9x16x8xf32, #tpu.memory_space<vmem>>, vector<1x16x8xf32>
    %355 = vector.shape_cast %354 : vector<1x16x8xf32> to vector<16x8xf32>
    %cst_338 = arith.constant dense<0.000000e+00> : vector<16x36xf32>
    %356 = tpu.matmul %355, %353, %cst_338 {dimension_numbers = #tpu.dot_dimension_numbers<[1], [0], [0], [1], [0, 0, 1, 1], [], []>} : vector<16x8xf32>, vector<8x36xf32>, vector<16x36xf32> -> vector<16x36xf32>
    %357 = arith.addf %351, %356 : vector<16x36xf32>
    %c0_339 = arith.constant 0 : index
    %c0_340 = arith.constant 0 : index
    %358 = vector.load %arg14[%c0_339, %c0_340] : memref<16x1xf32, #tpu.memory_space<vmem>>, vector<16x1xf32>
    %359 = vector.broadcast %358 : vector<16x1xf32> to vector<16x36xf32>
    %360 = arith.addf %357, %359 : vector<16x36xf32>
    %cst_341 = arith.constant 0.000000e+00 : f32
    %361 = vector.broadcast %cst_341 : f32 to vector<16x36xf32>
    %362 = arith.maximumf %360, %361 : vector<16x36xf32>
    %cst_342 = arith.constant 0.000000e+00 : f32
    %363 = vector.broadcast %cst_342 : f32 to vector<1x36xf32>
    %364 = arith.cmpf ogt, %304, %363 : vector<1x36xf32>
    %cst_343 = arith.constant 0.000000e+00 : f32
    %365 = vector.shape_cast %364 : vector<1x36xi1> to vector<1x36xi1>
    %366 = vector.broadcast %365 : vector<1x36xi1> to vector<16x36xi1>
    %367 = vector.broadcast %cst_343 : f32 to vector<16x36xf32>
    %368 = arith.select %366, %362, %367 : vector<16x36xi1>, vector<16x36xf32>
    %c0_344 = arith.constant 0 : index
    %c0_345 = arith.constant 0 : index
    %c1408 = arith.constant 1408 : index
    %369 = vector.load %arg28[%c0_344, %c0_345, %c1408] : memref<1x16x2560xf32, #tpu.memory_space<vmem>>, vector<1x16x36xf32>
    %370 = vector.shape_cast %369 : vector<1x16x36xf32> to vector<16x36xf32>
    %371 = vector.shape_cast %368 : vector<16x36xf32> to vector<1x16x36xf32>
    tpu.vector_store %arg28[%c0_344, %c0_345, %c1408], %371 {strides = array<i32>} : memref<1x16x2560xf32, #tpu.memory_space<vmem>>, vector<1x16x36xf32>,
    %c0_346 = arith.constant 0 : index
    %c0_347 = arith.constant 0 : index
    %c1401 = arith.constant 1401 : index
    %372 = vector.load %arg28[%c0_346, %c0_347, %c1401] : memref<1x16x2560xf32, #tpu.memory_space<vmem>>, vector<1x16x36xf32>
    %373 = vector.shape_cast %372 : vector<1x16x36xf32> to vector<16x36xf32>
    %c0_348 = arith.constant 0 : index
    %c0_349 = arith.constant 0 : index
    %c0_350 = arith.constant 0 : index
    %374 = vector.load %arg15[%c0_348, %c0_349, %c0_350] : memref<9x16x16xf32, #tpu.memory_space<vmem>>, vector<1x16x16xf32>
    %375 = vector.shape_cast %374 : vector<1x16x16xf32> to vector<16x16xf32>
    %cst_351 = arith.constant dense<0.000000e+00> : vector<16x36xf32>
    %376 = tpu.matmul %375, %373, %cst_351 {dimension_numbers = #tpu.dot_dimension_numbers<[1], [0], [0], [1], [0, 0, 1, 1], [], []>} : vector<16x16xf32>, vector<16x36xf32>, vector<16x36xf32> -> vector<16x36xf32>
    %c0_352 = arith.constant 0 : index
    %c0_353 = arith.constant 0 : index
    %c1402 = arith.constant 1402 : index
    %377 = vector.load %arg28[%c0_352, %c0_353, %c1402] : memref<1x16x2560xf32, #tpu.memory_space<vmem>>, vector<1x16x36xf32>
    %378 = vector.shape_cast %377 : vector<1x16x36xf32> to vector<16x36xf32>
    %c1_354 = arith.constant 1 : index
    %c0_355 = arith.constant 0 : index
    %c0_356 = arith.constant 0 : index
    %379 = vector.load %arg15[%c1_354, %c0_355, %c0_356] : memref<9x16x16xf32, #tpu.memory_space<vmem>>, vector<1x16x16xf32>
    %380 = vector.shape_cast %379 : vector<1x16x16xf32> to vector<16x16xf32>
    %cst_357 = arith.constant dense<0.000000e+00> : vector<16x36xf32>
    %381 = tpu.matmul %380, %378, %cst_357 {dimension_numbers = #tpu.dot_dimension_numbers<[1], [0], [0], [1], [0, 0, 1, 1], [], []>} : vector<16x16xf32>, vector<16x36xf32>, vector<16x36xf32> -> vector<16x36xf32>
    %382 = arith.addf %376, %381 : vector<16x36xf32>
    %c0_358 = arith.constant 0 : index
    %c0_359 = arith.constant 0 : index
    %c1403 = arith.constant 1403 : index
    %383 = vector.load %arg28[%c0_358, %c0_359, %c1403] : memref<1x16x2560xf32, #tpu.memory_space<vmem>>, vector<1x16x36xf32>
    %384 = vector.shape_cast %383 : vector<1x16x36xf32> to vector<16x36xf32>
    %c2_360 = arith.constant 2 : index
    %c0_361 = arith.constant 0 : index
    %c0_362 = arith.constant 0 : index
    %385 = vector.load %arg15[%c2_360, %c0_361, %c0_362] : memref<9x16x16xf32, #tpu.memory_space<vmem>>, vector<1x16x16xf32>
    %386 = vector.shape_cast %385 : vector<1x16x16xf32> to vector<16x16xf32>
    %cst_363 = arith.constant dense<0.000000e+00> : vector<16x36xf32>
    %387 = tpu.matmul %386, %384, %cst_363 {dimension_numbers = #tpu.dot_dimension_numbers<[1], [0], [0], [1], [0, 0, 1, 1], [], []>} : vector<16x16xf32>, vector<16x36xf32>, vector<16x36xf32> -> vector<16x36xf32>
    %388 = arith.addf %382, %387 : vector<16x36xf32>
    %c0_364 = arith.constant 0 : index
    %c0_365 = arith.constant 0 : index
    %c1407 = arith.constant 1407 : index
    %389 = vector.load %arg28[%c0_364, %c0_365, %c1407] : memref<1x16x2560xf32, #tpu.memory_space<vmem>>, vector<1x16x36xf32>
    %390 = vector.shape_cast %389 : vector<1x16x36xf32> to vector<16x36xf32>
    %c3_366 = arith.constant 3 : index
    %c0_367 = arith.constant 0 : index
    %c0_368 = arith.constant 0 : index
    %391 = vector.load %arg15[%c3_366, %c0_367, %c0_368] : memref<9x16x16xf32, #tpu.memory_space<vmem>>, vector<1x16x16xf32>
    %392 = vector.shape_cast %391 : vector<1x16x16xf32> to vector<16x16xf32>
    %cst_369 = arith.constant dense<0.000000e+00> : vector<16x36xf32>
    %393 = tpu.matmul %392, %390, %cst_369 {dimension_numbers = #tpu.dot_dimension_numbers<[1], [0], [0], [1], [0, 0, 1, 1], [], []>} : vector<16x16xf32>, vector<16x36xf32>, vector<16x36xf32> -> vector<16x36xf32>
    %394 = arith.addf %388, %393 : vector<16x36xf32>
    %c0_370 = arith.constant 0 : index
    %c0_371 = arith.constant 0 : index
    %c1408_372 = arith.constant 1408 : index
    %395 = vector.load %arg28[%c0_370, %c0_371, %c1408_372] : memref<1x16x2560xf32, #tpu.memory_space<vmem>>, vector<1x16x36xf32>
    %396 = vector.shape_cast %395 : vector<1x16x36xf32> to vector<16x36xf32>
    %c4_373 = arith.constant 4 : index
    %c0_374 = arith.constant 0 : index
    %c0_375 = arith.constant 0 : index
    %397 = vector.load %arg15[%c4_373, %c0_374, %c0_375] : memref<9x16x16xf32, #tpu.memory_space<vmem>>, vector<1x16x16xf32>
    %398 = vector.shape_cast %397 : vector<1x16x16xf32> to vector<16x16xf32>
    %cst_376 = arith.constant dense<0.000000e+00> : vector<16x36xf32>
    %399 = tpu.matmul %398, %396, %cst_376 {dimension_numbers = #tpu.dot_dimension_numbers<[1], [0], [0], [1], [0, 0, 1, 1], [], []>} : vector<16x16xf32>, vector<16x36xf32>, vector<16x36xf32> -> vector<16x36xf32>
    %400 = arith.addf %394, %399 : vector<16x36xf32>
    %c0_377 = arith.constant 0 : index
    %c0_378 = arith.constant 0 : index
    %c1409 = arith.constant 1409 : index
    %401 = vector.load %arg28[%c0_377, %c0_378, %c1409] : memref<1x16x2560xf32, #tpu.memory_space<vmem>>, vector<1x16x36xf32>
    %402 = vector.shape_cast %401 : vector<1x16x36xf32> to vector<16x36xf32>
    %c5_379 = arith.constant 5 : index
    %c0_380 = arith.constant 0 : index
    %c0_381 = arith.constant 0 : index
    %403 = vector.load %arg15[%c5_379, %c0_380, %c0_381] : memref<9x16x16xf32, #tpu.memory_space<vmem>>, vector<1x16x16xf32>
    %404 = vector.shape_cast %403 : vector<1x16x16xf32> to vector<16x16xf32>
    %cst_382 = arith.constant dense<0.000000e+00> : vector<16x36xf32>
    %405 = tpu.matmul %404, %402, %cst_382 {dimension_numbers = #tpu.dot_dimension_numbers<[1], [0], [0], [1], [0, 0, 1, 1], [], []>} : vector<16x16xf32>, vector<16x36xf32>, vector<16x36xf32> -> vector<16x36xf32>
    %406 = arith.addf %400, %405 : vector<16x36xf32>
    %c0_383 = arith.constant 0 : index
    %c0_384 = arith.constant 0 : index
    %c1413 = arith.constant 1413 : index
    %407 = vector.load %arg28[%c0_383, %c0_384, %c1413] : memref<1x16x2560xf32, #tpu.memory_space<vmem>>, vector<1x16x36xf32>
    %408 = vector.shape_cast %407 : vector<1x16x36xf32> to vector<16x36xf32>
    %c6_385 = arith.constant 6 : index
    %c0_386 = arith.constant 0 : index
    %c0_387 = arith.constant 0 : index
    %409 = vector.load %arg15[%c6_385, %c0_386, %c0_387] : memref<9x16x16xf32, #tpu.memory_space<vmem>>, vector<1x16x16xf32>
    %410 = vector.shape_cast %409 : vector<1x16x16xf32> to vector<16x16xf32>
    %cst_388 = arith.constant dense<0.000000e+00> : vector<16x36xf32>
    %411 = tpu.matmul %410, %408, %cst_388 {dimension_numbers = #tpu.dot_dimension_numbers<[1], [0], [0], [1], [0, 0, 1, 1], [], []>} : vector<16x16xf32>, vector<16x36xf32>, vector<16x36xf32> -> vector<16x36xf32>
    %412 = arith.addf %406, %411 : vector<16x36xf32>
    %c0_389 = arith.constant 0 : index
    %c0_390 = arith.constant 0 : index
    %c1414 = arith.constant 1414 : index
    %413 = vector.load %arg28[%c0_389, %c0_390, %c1414] : memref<1x16x2560xf32, #tpu.memory_space<vmem>>, vector<1x16x36xf32>
    %414 = vector.shape_cast %413 : vector<1x16x36xf32> to vector<16x36xf32>
    %c7_391 = arith.constant 7 : index
    %c0_392 = arith.constant 0 : index
    %c0_393 = arith.constant 0 : index
    %415 = vector.load %arg15[%c7_391, %c0_392, %c0_393] : memref<9x16x16xf32, #tpu.memory_space<vmem>>, vector<1x16x16xf32>
    %416 = vector.shape_cast %415 : vector<1x16x16xf32> to vector<16x16xf32>
    %cst_394 = arith.constant dense<0.000000e+00> : vector<16x36xf32>
    %417 = tpu.matmul %416, %414, %cst_394 {dimension_numbers = #tpu.dot_dimension_numbers<[1], [0], [0], [1], [0, 0, 1, 1], [], []>} : vector<16x16xf32>, vector<16x36xf32>, vector<16x36xf32> -> vector<16x36xf32>
    %418 = arith.addf %412, %417 : vector<16x36xf32>
    %c0_395 = arith.constant 0 : index
    %c0_396 = arith.constant 0 : index
    %c1415 = arith.constant 1415 : index
    %419 = vector.load %arg28[%c0_395, %c0_396, %c1415] : memref<1x16x2560xf32, #tpu.memory_space<vmem>>, vector<1x16x36xf32>
    %420 = vector.shape_cast %419 : vector<1x16x36xf32> to vector<16x36xf32>
    %c8_397 = arith.constant 8 : index
    %c0_398 = arith.constant 0 : index
    %c0_399 = arith.constant 0 : index
    %421 = vector.load %arg15[%c8_397, %c0_398, %c0_399] : memref<9x16x16xf32, #tpu.memory_space<vmem>>, vector<1x16x16xf32>
    %422 = vector.shape_cast %421 : vector<1x16x16xf32> to vector<16x16xf32>
    %cst_400 = arith.constant dense<0.000000e+00> : vector<16x36xf32>
    %423 = tpu.matmul %422, %420, %cst_400 {dimension_numbers = #tpu.dot_dimension_numbers<[1], [0], [0], [1], [0, 0, 1, 1], [], []>} : vector<16x16xf32>, vector<16x36xf32>, vector<16x36xf32> -> vector<16x36xf32>
    %424 = arith.addf %418, %423 : vector<16x36xf32>
    %c0_401 = arith.constant 0 : index
    %c0_402 = arith.constant 0 : index
    %425 = vector.load %arg16[%c0_401, %c0_402] : memref<16x1xf32, #tpu.memory_space<vmem>>, vector<16x1xf32>
    %426 = vector.broadcast %425 : vector<16x1xf32> to vector<16x36xf32>
    %427 = arith.addf %424, %426 : vector<16x36xf32>
    %cst_403 = arith.constant 0.000000e+00 : f32
    %428 = vector.broadcast %cst_403 : f32 to vector<16x36xf32>
    %429 = arith.maximumf %427, %428 : vector<16x36xf32>
    %cst_404 = arith.constant 0.000000e+00 : f32
    %430 = vector.broadcast %cst_404 : f32 to vector<1x36xf32>
    %431 = arith.cmpf ogt, %304, %430 : vector<1x36xf32>
    %cst_405 = arith.constant 0.000000e+00 : f32
    %432 = vector.shape_cast %431 : vector<1x36xi1> to vector<1x36xi1>
    %433 = vector.broadcast %432 : vector<1x36xi1> to vector<16x36xi1>
    %434 = vector.broadcast %cst_405 : f32 to vector<16x36xf32>
    %435 = arith.select %433, %429, %434 : vector<16x36xi1>, vector<16x36xf32>
    %c0_406 = arith.constant 0 : index
    %c0_407 = arith.constant 0 : index
    %c1536 = arith.constant 1536 : index
    %436 = vector.load %arg28[%c0_406, %c0_407, %c1536] : memref<1x16x2560xf32, #tpu.memory_space<vmem>>, vector<1x16x36xf32>
    %437 = vector.shape_cast %436 : vector<1x16x36xf32> to vector<16x36xf32>
    %438 = vector.shape_cast %435 : vector<16x36xf32> to vector<1x16x36xf32>
    tpu.vector_store %arg28[%c0_406, %c0_407, %c1536], %438 {strides = array<i32>} : memref<1x16x2560xf32, #tpu.memory_space<vmem>>, vector<1x16x36xf32>,
    %c0_408 = arith.constant 0 : index
    %c0_409 = arith.constant 0 : index
    %c1536_410 = arith.constant 1536 : index
    %439 = vector.load %arg28[%c0_408, %c0_409, %c1536_410] : memref<1x16x2560xf32, #tpu.memory_space<vmem>>, vector<1x16x36xf32>
    %440 = vector.shape_cast %439 : vector<1x16x36xf32> to vector<16x36xf32>
    %c0_411 = arith.constant 0 : index
    %c0_412 = arith.constant 0 : index
    %c1537 = arith.constant 1537 : index
    %441 = vector.load %arg28[%c0_411, %c0_412, %c1537] : memref<1x16x2560xf32, #tpu.memory_space<vmem>>, vector<1x16x36xf32>
    %442 = vector.shape_cast %441 : vector<1x16x36xf32> to vector<16x36xf32>
    %c0_413 = arith.constant 0 : index
    %c0_414 = arith.constant 0 : index
    %c1542 = arith.constant 1542 : index
    %443 = vector.load %arg28[%c0_413, %c0_414, %c1542] : memref<1x16x2560xf32, #tpu.memory_space<vmem>>, vector<1x16x36xf32>
    %444 = vector.shape_cast %443 : vector<1x16x36xf32> to vector<16x36xf32>
    %c0_415 = arith.constant 0 : index
    %c0_416 = arith.constant 0 : index
    %c1543 = arith.constant 1543 : index
    %445 = vector.load %arg28[%c0_415, %c0_416, %c1543] : memref<1x16x2560xf32, #tpu.memory_space<vmem>>, vector<1x16x36xf32>
    %446 = vector.shape_cast %445 : vector<1x16x36xf32> to vector<16x36xf32>
    %447 = arith.maximumf %440, %442 : vector<16x36xf32>
    %448 = arith.maximumf %444, %446 : vector<16x36xf32>
    %449 = arith.maximumf %447, %448 : vector<16x36xf32>
    %c0_417 = arith.constant 0 : index
    %c0_418 = arith.constant 0 : index
    %450 = vector.load %arg17[%c0_417, %c0_418] : memref<36x25xf32, #tpu.memory_space<vmem>>, vector<36x25xf32>
    %cst_419 = arith.constant dense<0.000000e+00> : vector<16x25xf32>
    %451 = tpu.matmul %449, %450, %cst_419 {dimension_numbers = #tpu.dot_dimension_numbers<[1], [0], [0], [1], [0, 0, 1, 1], [], []>} : vector<16x36xf32>, vector<36x25xf32>, vector<16x25xf32> -> vector<16x25xf32>
    %c0_420 = arith.constant 0 : index
    %c0_421 = arith.constant 0 : index
    %c1664 = arith.constant 1664 : index
    %452 = vector.load %arg28[%c0_420, %c0_421, %c1664] : memref<1x16x2560xf32, #tpu.memory_space<vmem>>, vector<1x16x25xf32>
    %453 = vector.shape_cast %452 : vector<1x16x25xf32> to vector<16x25xf32>
    %454 = vector.shape_cast %451 : vector<16x25xf32> to vector<1x16x25xf32>
    tpu.vector_store %arg28[%c0_420, %c0_421, %c1664], %454 {strides = array<i32>} : memref<1x16x2560xf32, #tpu.memory_space<vmem>>, vector<1x16x25xf32>,
    %c3_422 = arith.constant 3 : index
    %c0_423 = arith.constant 0 : index
    %455 = vector.load %arg2[%c3_422, %c0_423] : memref<5x384xf32, #tpu.memory_space<vmem>>, vector<1x25xf32>
    %c0_424 = arith.constant 0 : index
    %c0_425 = arith.constant 0 : index
    %c1658 = arith.constant 1658 : index
    %456 = vector.load %arg28[%c0_424, %c0_425, %c1658] : memref<1x16x2560xf32, #tpu.memory_space<vmem>>, vector<1x16x25xf32>
    %457 = vector.shape_cast %456 : vector<1x16x25xf32> to vector<16x25xf32>
    %c0_426 = arith.constant 0 : index
    %c0_427 = arith.constant 0 : index
    %c0_428 = arith.constant 0 : index
    %458 = vector.load %arg18[%c0_426, %c0_427, %c0_428] : memref<9x16x16xf32, #tpu.memory_space<vmem>>, vector<1x16x16xf32>
    %459 = vector.shape_cast %458 : vector<1x16x16xf32> to vector<16x16xf32>
    %cst_429 = arith.constant dense<0.000000e+00> : vector<16x25xf32>
    %460 = tpu.matmul %459, %457, %cst_429 {dimension_numbers = #tpu.dot_dimension_numbers<[1], [0], [0], [1], [0, 0, 1, 1], [], []>} : vector<16x16xf32>, vector<16x25xf32>, vector<16x25xf32> -> vector<16x25xf32>
    %c0_430 = arith.constant 0 : index
    %c0_431 = arith.constant 0 : index
    %c1659 = arith.constant 1659 : index
    %461 = vector.load %arg28[%c0_430, %c0_431, %c1659] : memref<1x16x2560xf32, #tpu.memory_space<vmem>>, vector<1x16x25xf32>
    %462 = vector.shape_cast %461 : vector<1x16x25xf32> to vector<16x25xf32>
    %c1_432 = arith.constant 1 : index
    %c0_433 = arith.constant 0 : index
    %c0_434 = arith.constant 0 : index
    %463 = vector.load %arg18[%c1_432, %c0_433, %c0_434] : memref<9x16x16xf32, #tpu.memory_space<vmem>>, vector<1x16x16xf32>
    %464 = vector.shape_cast %463 : vector<1x16x16xf32> to vector<16x16xf32>
    %cst_435 = arith.constant dense<0.000000e+00> : vector<16x25xf32>
    %465 = tpu.matmul %464, %462, %cst_435 {dimension_numbers = #tpu.dot_dimension_numbers<[1], [0], [0], [1], [0, 0, 1, 1], [], []>} : vector<16x16xf32>, vector<16x25xf32>, vector<16x25xf32> -> vector<16x25xf32>
    %466 = arith.addf %460, %465 : vector<16x25xf32>
    %c0_436 = arith.constant 0 : index
    %c0_437 = arith.constant 0 : index
    %c1660 = arith.constant 1660 : index
    %467 = vector.load %arg28[%c0_436, %c0_437, %c1660] : memref<1x16x2560xf32, #tpu.memory_space<vmem>>, vector<1x16x25xf32>
    %468 = vector.shape_cast %467 : vector<1x16x25xf32> to vector<16x25xf32>
    %c2_438 = arith.constant 2 : index
    %c0_439 = arith.constant 0 : index
    %c0_440 = arith.constant 0 : index
    %469 = vector.load %arg18[%c2_438, %c0_439, %c0_440] : memref<9x16x16xf32, #tpu.memory_space<vmem>>, vector<1x16x16xf32>
    %470 = vector.shape_cast %469 : vector<1x16x16xf32> to vector<16x16xf32>
    %cst_441 = arith.constant dense<0.000000e+00> : vector<16x25xf32>
    %471 = tpu.matmul %470, %468, %cst_441 {dimension_numbers = #tpu.dot_dimension_numbers<[1], [0], [0], [1], [0, 0, 1, 1], [], []>} : vector<16x16xf32>, vector<16x25xf32>, vector<16x25xf32> -> vector<16x25xf32>
    %472 = arith.addf %466, %471 : vector<16x25xf32>
    %c0_442 = arith.constant 0 : index
    %c0_443 = arith.constant 0 : index
    %c1663 = arith.constant 1663 : index
    %473 = vector.load %arg28[%c0_442, %c0_443, %c1663] : memref<1x16x2560xf32, #tpu.memory_space<vmem>>, vector<1x16x25xf32>
    %474 = vector.shape_cast %473 : vector<1x16x25xf32> to vector<16x25xf32>
    %c3_444 = arith.constant 3 : index
    %c0_445 = arith.constant 0 : index
    %c0_446 = arith.constant 0 : index
    %475 = vector.load %arg18[%c3_444, %c0_445, %c0_446] : memref<9x16x16xf32, #tpu.memory_space<vmem>>, vector<1x16x16xf32>
    %476 = vector.shape_cast %475 : vector<1x16x16xf32> to vector<16x16xf32>
    %cst_447 = arith.constant dense<0.000000e+00> : vector<16x25xf32>
    %477 = tpu.matmul %476, %474, %cst_447 {dimension_numbers = #tpu.dot_dimension_numbers<[1], [0], [0], [1], [0, 0, 1, 1], [], []>} : vector<16x16xf32>, vector<16x25xf32>, vector<16x25xf32> -> vector<16x25xf32>
    %478 = arith.addf %472, %477 : vector<16x25xf32>
    %c0_448 = arith.constant 0 : index
    %c0_449 = arith.constant 0 : index
    %c1664_450 = arith.constant 1664 : index
    %479 = vector.load %arg28[%c0_448, %c0_449, %c1664_450] : memref<1x16x2560xf32, #tpu.memory_space<vmem>>, vector<1x16x25xf32>
    %480 = vector.shape_cast %479 : vector<1x16x25xf32> to vector<16x25xf32>
    %c4_451 = arith.constant 4 : index
    %c0_452 = arith.constant 0 : index
    %c0_453 = arith.constant 0 : index
    %481 = vector.load %arg18[%c4_451, %c0_452, %c0_453] : memref<9x16x16xf32, #tpu.memory_space<vmem>>, vector<1x16x16xf32>
    %482 = vector.shape_cast %481 : vector<1x16x16xf32> to vector<16x16xf32>
    %cst_454 = arith.constant dense<0.000000e+00> : vector<16x25xf32>
    %483 = tpu.matmul %482, %480, %cst_454 {dimension_numbers = #tpu.dot_dimension_numbers<[1], [0], [0], [1], [0, 0, 1, 1], [], []>} : vector<16x16xf32>, vector<16x25xf32>, vector<16x25xf32> -> vector<16x25xf32>
    %484 = arith.addf %478, %483 : vector<16x25xf32>
    %c0_455 = arith.constant 0 : index
    %c0_456 = arith.constant 0 : index
    %c1665 = arith.constant 1665 : index
    %485 = vector.load %arg28[%c0_455, %c0_456, %c1665] : memref<1x16x2560xf32, #tpu.memory_space<vmem>>, vector<1x16x25xf32>
    %486 = vector.shape_cast %485 : vector<1x16x25xf32> to vector<16x25xf32>
    %c5_457 = arith.constant 5 : index
    %c0_458 = arith.constant 0 : index
    %c0_459 = arith.constant 0 : index
    %487 = vector.load %arg18[%c5_457, %c0_458, %c0_459] : memref<9x16x16xf32, #tpu.memory_space<vmem>>, vector<1x16x16xf32>
    %488 = vector.shape_cast %487 : vector<1x16x16xf32> to vector<16x16xf32>
    %cst_460 = arith.constant dense<0.000000e+00> : vector<16x25xf32>
    %489 = tpu.matmul %488, %486, %cst_460 {dimension_numbers = #tpu.dot_dimension_numbers<[1], [0], [0], [1], [0, 0, 1, 1], [], []>} : vector<16x16xf32>, vector<16x25xf32>, vector<16x25xf32> -> vector<16x25xf32>
    %490 = arith.addf %484, %489 : vector<16x25xf32>
    %c0_461 = arith.constant 0 : index
    %c0_462 = arith.constant 0 : index
    %c1668 = arith.constant 1668 : index
    %491 = vector.load %arg28[%c0_461, %c0_462, %c1668] : memref<1x16x2560xf32, #tpu.memory_space<vmem>>, vector<1x16x25xf32>
    %492 = vector.shape_cast %491 : vector<1x16x25xf32> to vector<16x25xf32>
    %c6_463 = arith.constant 6 : index
    %c0_464 = arith.constant 0 : index
    %c0_465 = arith.constant 0 : index
    %493 = vector.load %arg18[%c6_463, %c0_464, %c0_465] : memref<9x16x16xf32, #tpu.memory_space<vmem>>, vector<1x16x16xf32>
    %494 = vector.shape_cast %493 : vector<1x16x16xf32> to vector<16x16xf32>
    %cst_466 = arith.constant dense<0.000000e+00> : vector<16x25xf32>
    %495 = tpu.matmul %494, %492, %cst_466 {dimension_numbers = #tpu.dot_dimension_numbers<[1], [0], [0], [1], [0, 0, 1, 1], [], []>} : vector<16x16xf32>, vector<16x25xf32>, vector<16x25xf32> -> vector<16x25xf32>
    %496 = arith.addf %490, %495 : vector<16x25xf32>
    %c0_467 = arith.constant 0 : index
    %c0_468 = arith.constant 0 : index
    %c1669 = arith.constant 1669 : index
    %497 = vector.load %arg28[%c0_467, %c0_468, %c1669] : memref<1x16x2560xf32, #tpu.memory_space<vmem>>, vector<1x16x25xf32>
    %498 = vector.shape_cast %497 : vector<1x16x25xf32> to vector<16x25xf32>
    %c7_469 = arith.constant 7 : index
    %c0_470 = arith.constant 0 : index
    %c0_471 = arith.constant 0 : index
    %499 = vector.load %arg18[%c7_469, %c0_470, %c0_471] : memref<9x16x16xf32, #tpu.memory_space<vmem>>, vector<1x16x16xf32>
    %500 = vector.shape_cast %499 : vector<1x16x16xf32> to vector<16x16xf32>
    %cst_472 = arith.constant dense<0.000000e+00> : vector<16x25xf32>
    %501 = tpu.matmul %500, %498, %cst_472 {dimension_numbers = #tpu.dot_dimension_numbers<[1], [0], [0], [1], [0, 0, 1, 1], [], []>} : vector<16x16xf32>, vector<16x25xf32>, vector<16x25xf32> -> vector<16x25xf32>
    %502 = arith.addf %496, %501 : vector<16x25xf32>
    %c0_473 = arith.constant 0 : index
    %c0_474 = arith.constant 0 : index
    %c1670 = arith.constant 1670 : index
    %503 = vector.load %arg28[%c0_473, %c0_474, %c1670] : memref<1x16x2560xf32, #tpu.memory_space<vmem>>, vector<1x16x25xf32>
    %504 = vector.shape_cast %503 : vector<1x16x25xf32> to vector<16x25xf32>
    %c8_475 = arith.constant 8 : index
    %c0_476 = arith.constant 0 : index
    %c0_477 = arith.constant 0 : index
    %505 = vector.load %arg18[%c8_475, %c0_476, %c0_477] : memref<9x16x16xf32, #tpu.memory_space<vmem>>, vector<1x16x16xf32>
    %506 = vector.shape_cast %505 : vector<1x16x16xf32> to vector<16x16xf32>
    %cst_478 = arith.constant dense<0.000000e+00> : vector<16x25xf32>
    %507 = tpu.matmul %506, %504, %cst_478 {dimension_numbers = #tpu.dot_dimension_numbers<[1], [0], [0], [1], [0, 0, 1, 1], [], []>} : vector<16x16xf32>, vector<16x25xf32>, vector<16x25xf32> -> vector<16x25xf32>
    %508 = arith.addf %502, %507 : vector<16x25xf32>
    %c0_479 = arith.constant 0 : index
    %c0_480 = arith.constant 0 : index
    %509 = vector.load %arg19[%c0_479, %c0_480] : memref<16x1xf32, #tpu.memory_space<vmem>>, vector<16x1xf32>
    %510 = vector.broadcast %509 : vector<16x1xf32> to vector<16x25xf32>
    %511 = arith.addf %508, %510 : vector<16x25xf32>
    %cst_481 = arith.constant 0.000000e+00 : f32
    %512 = vector.broadcast %cst_481 : f32 to vector<16x25xf32>
    %513 = arith.maximumf %511, %512 : vector<16x25xf32>
    %cst_482 = arith.constant 0.000000e+00 : f32
    %514 = vector.broadcast %cst_482 : f32 to vector<1x25xf32>
    %515 = arith.cmpf ogt, %455, %514 : vector<1x25xf32>
    %cst_483 = arith.constant 0.000000e+00 : f32
    %516 = vector.shape_cast %515 : vector<1x25xi1> to vector<1x25xi1>
    %517 = vector.broadcast %516 : vector<1x25xi1> to vector<16x25xi1>
    %518 = vector.broadcast %cst_483 : f32 to vector<16x25xf32>
    %519 = arith.select %517, %513, %518 : vector<16x25xi1>, vector<16x25xf32>
    %c0_484 = arith.constant 0 : index
    %c0_485 = arith.constant 0 : index
    %c1792 = arith.constant 1792 : index
    %520 = vector.load %arg28[%c0_484, %c0_485, %c1792] : memref<1x16x2560xf32, #tpu.memory_space<vmem>>, vector<1x16x25xf32>
    %521 = vector.shape_cast %520 : vector<1x16x25xf32> to vector<16x25xf32>
    %522 = vector.shape_cast %519 : vector<16x25xf32> to vector<1x16x25xf32>
    tpu.vector_store %arg28[%c0_484, %c0_485, %c1792], %522 {strides = array<i32>} : memref<1x16x2560xf32, #tpu.memory_space<vmem>>, vector<1x16x25xf32>,
    %c0_486 = arith.constant 0 : index
    %c0_487 = arith.constant 0 : index
    %c1786 = arith.constant 1786 : index
    %523 = vector.load %arg28[%c0_486, %c0_487, %c1786] : memref<1x16x2560xf32, #tpu.memory_space<vmem>>, vector<1x16x25xf32>
    %524 = vector.shape_cast %523 : vector<1x16x25xf32> to vector<16x25xf32>
    %c0_488 = arith.constant 0 : index
    %c0_489 = arith.constant 0 : index
    %c0_490 = arith.constant 0 : index
    %525 = vector.load %arg20[%c0_488, %c0_489, %c0_490] : memref<9x16x16xf32, #tpu.memory_space<vmem>>, vector<1x16x16xf32>
    %526 = vector.shape_cast %525 : vector<1x16x16xf32> to vector<16x16xf32>
    %cst_491 = arith.constant dense<0.000000e+00> : vector<16x25xf32>
    %527 = tpu.matmul %526, %524, %cst_491 {dimension_numbers = #tpu.dot_dimension_numbers<[1], [0], [0], [1], [0, 0, 1, 1], [], []>} : vector<16x16xf32>, vector<16x25xf32>, vector<16x25xf32> -> vector<16x25xf32>
    %c0_492 = arith.constant 0 : index
    %c0_493 = arith.constant 0 : index
    %c1787 = arith.constant 1787 : index
    %528 = vector.load %arg28[%c0_492, %c0_493, %c1787] : memref<1x16x2560xf32, #tpu.memory_space<vmem>>, vector<1x16x25xf32>
    %529 = vector.shape_cast %528 : vector<1x16x25xf32> to vector<16x25xf32>
    %c1_494 = arith.constant 1 : index
    %c0_495 = arith.constant 0 : index
    %c0_496 = arith.constant 0 : index
    %530 = vector.load %arg20[%c1_494, %c0_495, %c0_496] : memref<9x16x16xf32, #tpu.memory_space<vmem>>, vector<1x16x16xf32>
    %531 = vector.shape_cast %530 : vector<1x16x16xf32> to vector<16x16xf32>
    %cst_497 = arith.constant dense<0.000000e+00> : vector<16x25xf32>
    %532 = tpu.matmul %531, %529, %cst_497 {dimension_numbers = #tpu.dot_dimension_numbers<[1], [0], [0], [1], [0, 0, 1, 1], [], []>} : vector<16x16xf32>, vector<16x25xf32>, vector<16x25xf32> -> vector<16x25xf32>
    %533 = arith.addf %527, %532 : vector<16x25xf32>
    %c0_498 = arith.constant 0 : index
    %c0_499 = arith.constant 0 : index
    %c1788 = arith.constant 1788 : index
    %534 = vector.load %arg28[%c0_498, %c0_499, %c1788] : memref<1x16x2560xf32, #tpu.memory_space<vmem>>, vector<1x16x25xf32>
    %535 = vector.shape_cast %534 : vector<1x16x25xf32> to vector<16x25xf32>
    %c2_500 = arith.constant 2 : index
    %c0_501 = arith.constant 0 : index
    %c0_502 = arith.constant 0 : index
    %536 = vector.load %arg20[%c2_500, %c0_501, %c0_502] : memref<9x16x16xf32, #tpu.memory_space<vmem>>, vector<1x16x16xf32>
    %537 = vector.shape_cast %536 : vector<1x16x16xf32> to vector<16x16xf32>
    %cst_503 = arith.constant dense<0.000000e+00> : vector<16x25xf32>
    %538 = tpu.matmul %537, %535, %cst_503 {dimension_numbers = #tpu.dot_dimension_numbers<[1], [0], [0], [1], [0, 0, 1, 1], [], []>} : vector<16x16xf32>, vector<16x25xf32>, vector<16x25xf32> -> vector<16x25xf32>
    %539 = arith.addf %533, %538 : vector<16x25xf32>
    %c0_504 = arith.constant 0 : index
    %c0_505 = arith.constant 0 : index
    %c1791 = arith.constant 1791 : index
    %540 = vector.load %arg28[%c0_504, %c0_505, %c1791] : memref<1x16x2560xf32, #tpu.memory_space<vmem>>, vector<1x16x25xf32>
    %541 = vector.shape_cast %540 : vector<1x16x25xf32> to vector<16x25xf32>
    %c3_506 = arith.constant 3 : index
    %c0_507 = arith.constant 0 : index
    %c0_508 = arith.constant 0 : index
    %542 = vector.load %arg20[%c3_506, %c0_507, %c0_508] : memref<9x16x16xf32, #tpu.memory_space<vmem>>, vector<1x16x16xf32>
    %543 = vector.shape_cast %542 : vector<1x16x16xf32> to vector<16x16xf32>
    %cst_509 = arith.constant dense<0.000000e+00> : vector<16x25xf32>
    %544 = tpu.matmul %543, %541, %cst_509 {dimension_numbers = #tpu.dot_dimension_numbers<[1], [0], [0], [1], [0, 0, 1, 1], [], []>} : vector<16x16xf32>, vector<16x25xf32>, vector<16x25xf32> -> vector<16x25xf32>
    %545 = arith.addf %539, %544 : vector<16x25xf32>
    %c0_510 = arith.constant 0 : index
    %c0_511 = arith.constant 0 : index
    %c1792_512 = arith.constant 1792 : index
    %546 = vector.load %arg28[%c0_510, %c0_511, %c1792_512] : memref<1x16x2560xf32, #tpu.memory_space<vmem>>, vector<1x16x25xf32>
    %547 = vector.shape_cast %546 : vector<1x16x25xf32> to vector<16x25xf32>
    %c4_513 = arith.constant 4 : index
    %c0_514 = arith.constant 0 : index
    %c0_515 = arith.constant 0 : index
    %548 = vector.load %arg20[%c4_513, %c0_514, %c0_515] : memref<9x16x16xf32, #tpu.memory_space<vmem>>, vector<1x16x16xf32>
    %549 = vector.shape_cast %548 : vector<1x16x16xf32> to vector<16x16xf32>
    %cst_516 = arith.constant dense<0.000000e+00> : vector<16x25xf32>
    %550 = tpu.matmul %549, %547, %cst_516 {dimension_numbers = #tpu.dot_dimension_numbers<[1], [0], [0], [1], [0, 0, 1, 1], [], []>} : vector<16x16xf32>, vector<16x25xf32>, vector<16x25xf32> -> vector<16x25xf32>
    %551 = arith.addf %545, %550 : vector<16x25xf32>
    %c0_517 = arith.constant 0 : index
    %c0_518 = arith.constant 0 : index
    %c1793 = arith.constant 1793 : index
    %552 = vector.load %arg28[%c0_517, %c0_518, %c1793] : memref<1x16x2560xf32, #tpu.memory_space<vmem>>, vector<1x16x25xf32>
    %553 = vector.shape_cast %552 : vector<1x16x25xf32> to vector<16x25xf32>
    %c5_519 = arith.constant 5 : index
    %c0_520 = arith.constant 0 : index
    %c0_521 = arith.constant 0 : index
    %554 = vector.load %arg20[%c5_519, %c0_520, %c0_521] : memref<9x16x16xf32, #tpu.memory_space<vmem>>, vector<1x16x16xf32>
    %555 = vector.shape_cast %554 : vector<1x16x16xf32> to vector<16x16xf32>
    %cst_522 = arith.constant dense<0.000000e+00> : vector<16x25xf32>
    %556 = tpu.matmul %555, %553, %cst_522 {dimension_numbers = #tpu.dot_dimension_numbers<[1], [0], [0], [1], [0, 0, 1, 1], [], []>} : vector<16x16xf32>, vector<16x25xf32>, vector<16x25xf32> -> vector<16x25xf32>
    %557 = arith.addf %551, %556 : vector<16x25xf32>
    %c0_523 = arith.constant 0 : index
    %c0_524 = arith.constant 0 : index
    %c1796 = arith.constant 1796 : index
    %558 = vector.load %arg28[%c0_523, %c0_524, %c1796] : memref<1x16x2560xf32, #tpu.memory_space<vmem>>, vector<1x16x25xf32>
    %559 = vector.shape_cast %558 : vector<1x16x25xf32> to vector<16x25xf32>
    %c6_525 = arith.constant 6 : index
    %c0_526 = arith.constant 0 : index
    %c0_527 = arith.constant 0 : index
    %560 = vector.load %arg20[%c6_525, %c0_526, %c0_527] : memref<9x16x16xf32, #tpu.memory_space<vmem>>, vector<1x16x16xf32>
    %561 = vector.shape_cast %560 : vector<1x16x16xf32> to vector<16x16xf32>
    %cst_528 = arith.constant dense<0.000000e+00> : vector<16x25xf32>
    %562 = tpu.matmul %561, %559, %cst_528 {dimension_numbers = #tpu.dot_dimension_numbers<[1], [0], [0], [1], [0, 0, 1, 1], [], []>} : vector<16x16xf32>, vector<16x25xf32>, vector<16x25xf32> -> vector<16x25xf32>
    %563 = arith.addf %557, %562 : vector<16x25xf32>
    %c0_529 = arith.constant 0 : index
    %c0_530 = arith.constant 0 : index
    %c1797 = arith.constant 1797 : index
    %564 = vector.load %arg28[%c0_529, %c0_530, %c1797] : memref<1x16x2560xf32, #tpu.memory_space<vmem>>, vector<1x16x25xf32>
    %565 = vector.shape_cast %564 : vector<1x16x25xf32> to vector<16x25xf32>
    %c7_531 = arith.constant 7 : index
    %c0_532 = arith.constant 0 : index
    %c0_533 = arith.constant 0 : index
    %566 = vector.load %arg20[%c7_531, %c0_532, %c0_533] : memref<9x16x16xf32, #tpu.memory_space<vmem>>, vector<1x16x16xf32>
    %567 = vector.shape_cast %566 : vector<1x16x16xf32> to vector<16x16xf32>
    %cst_534 = arith.constant dense<0.000000e+00> : vector<16x25xf32>
    %568 = tpu.matmul %567, %565, %cst_534 {dimension_numbers = #tpu.dot_dimension_numbers<[1], [0], [0], [1], [0, 0, 1, 1], [], []>} : vector<16x16xf32>, vector<16x25xf32>, vector<16x25xf32> -> vector<16x25xf32>
    %569 = arith.addf %563, %568 : vector<16x25xf32>
    %c0_535 = arith.constant 0 : index
    %c0_536 = arith.constant 0 : index
    %c1798 = arith.constant 1798 : index
    %570 = vector.load %arg28[%c0_535, %c0_536, %c1798] : memref<1x16x2560xf32, #tpu.memory_space<vmem>>, vector<1x16x25xf32>
    %571 = vector.shape_cast %570 : vector<1x16x25xf32> to vector<16x25xf32>
    %c8_537 = arith.constant 8 : index
    %c0_538 = arith.constant 0 : index
    %c0_539 = arith.constant 0 : index
    %572 = vector.load %arg20[%c8_537, %c0_538, %c0_539] : memref<9x16x16xf32, #tpu.memory_space<vmem>>, vector<1x16x16xf32>
    %573 = vector.shape_cast %572 : vector<1x16x16xf32> to vector<16x16xf32>
    %cst_540 = arith.constant dense<0.000000e+00> : vector<16x25xf32>
    %574 = tpu.matmul %573, %571, %cst_540 {dimension_numbers = #tpu.dot_dimension_numbers<[1], [0], [0], [1], [0, 0, 1, 1], [], []>} : vector<16x16xf32>, vector<16x25xf32>, vector<16x25xf32> -> vector<16x25xf32>
    %575 = arith.addf %569, %574 : vector<16x25xf32>
    %c0_541 = arith.constant 0 : index
    %c0_542 = arith.constant 0 : index
    %576 = vector.load %arg21[%c0_541, %c0_542] : memref<16x1xf32, #tpu.memory_space<vmem>>, vector<16x1xf32>
    %577 = vector.broadcast %576 : vector<16x1xf32> to vector<16x25xf32>
    %578 = arith.addf %575, %577 : vector<16x25xf32>
    %cst_543 = arith.constant 0.000000e+00 : f32
    %579 = vector.broadcast %cst_543 : f32 to vector<16x25xf32>
    %580 = arith.maximumf %578, %579 : vector<16x25xf32>
    %cst_544 = arith.constant 0.000000e+00 : f32
    %581 = vector.broadcast %cst_544 : f32 to vector<1x25xf32>
    %582 = arith.cmpf ogt, %455, %581 : vector<1x25xf32>
    %cst_545 = arith.constant 0.000000e+00 : f32
    %583 = vector.shape_cast %582 : vector<1x25xi1> to vector<1x25xi1>
    %584 = vector.broadcast %583 : vector<1x25xi1> to vector<16x25xi1>
    %585 = vector.broadcast %cst_545 : f32 to vector<16x25xf32>
    %586 = arith.select %584, %580, %585 : vector<16x25xi1>, vector<16x25xf32>
    %c0_546 = arith.constant 0 : index
    %c0_547 = arith.constant 0 : index
    %c1920 = arith.constant 1920 : index
    %587 = vector.load %arg28[%c0_546, %c0_547, %c1920] : memref<1x16x2560xf32, #tpu.memory_space<vmem>>, vector<1x16x25xf32>
    %588 = vector.shape_cast %587 : vector<1x16x25xf32> to vector<16x25xf32>
    %589 = vector.shape_cast %586 : vector<16x25xf32> to vector<1x16x25xf32>
    tpu.vector_store %arg28[%c0_546, %c0_547, %c1920], %589 {strides = array<i32>} : memref<1x16x2560xf32, #tpu.memory_space<vmem>>, vector<1x16x25xf32>,
    %c0_548 = arith.constant 0 : index
    %c0_549 = arith.constant 0 : index
    %c1920_550 = arith.constant 1920 : index
    %590 = vector.load %arg28[%c0_548, %c0_549, %c1920_550] : memref<1x16x2560xf32, #tpu.memory_space<vmem>>, vector<1x16x25xf32>
    %591 = vector.shape_cast %590 : vector<1x16x25xf32> to vector<16x25xf32>
    %c0_551 = arith.constant 0 : index
    %c0_552 = arith.constant 0 : index
    %c1921 = arith.constant 1921 : index
    %592 = vector.load %arg28[%c0_551, %c0_552, %c1921] : memref<1x16x2560xf32, #tpu.memory_space<vmem>>, vector<1x16x25xf32>
    %593 = vector.shape_cast %592 : vector<1x16x25xf32> to vector<16x25xf32>
    %c0_553 = arith.constant 0 : index
    %c0_554 = arith.constant 0 : index
    %c1925 = arith.constant 1925 : index
    %594 = vector.load %arg28[%c0_553, %c0_554, %c1925] : memref<1x16x2560xf32, #tpu.memory_space<vmem>>, vector<1x16x25xf32>
    %595 = vector.shape_cast %594 : vector<1x16x25xf32> to vector<16x25xf32>
    %c0_555 = arith.constant 0 : index
    %c0_556 = arith.constant 0 : index
    %c1926 = arith.constant 1926 : index
    %596 = vector.load %arg28[%c0_555, %c0_556, %c1926] : memref<1x16x2560xf32, #tpu.memory_space<vmem>>, vector<1x16x25xf32>
    %597 = vector.shape_cast %596 : vector<1x16x25xf32> to vector<16x25xf32>
    %598 = arith.maximumf %591, %593 : vector<16x25xf32>
    %599 = arith.maximumf %595, %597 : vector<16x25xf32>
    %600 = arith.maximumf %598, %599 : vector<16x25xf32>
    %c0_557 = arith.constant 0 : index
    %c0_558 = arith.constant 0 : index
    %601 = vector.load %arg22[%c0_557, %c0_558] : memref<25x16xf32, #tpu.memory_space<vmem>>, vector<25x16xf32>
    %cst_559 = arith.constant dense<0.000000e+00> : vector<16x16xf32>
    %602 = tpu.matmul %600, %601, %cst_559 {dimension_numbers = #tpu.dot_dimension_numbers<[1], [0], [0], [1], [0, 0, 1, 1], [], []>} : vector<16x25xf32>, vector<25x16xf32>, vector<16x16xf32> -> vector<16x16xf32>
    %c0_560 = arith.constant 0 : index
    %c0_561 = arith.constant 0 : index
    %c2048 = arith.constant 2048 : index
    %603 = vector.load %arg28[%c0_560, %c0_561, %c2048] : memref<1x16x2560xf32, #tpu.memory_space<vmem>>, vector<1x16x16xf32>
    %604 = vector.shape_cast %603 : vector<1x16x16xf32> to vector<16x16xf32>
    %605 = vector.shape_cast %602 : vector<16x16xf32> to vector<1x16x16xf32>
    tpu.vector_store %arg28[%c0_560, %c0_561, %c2048], %605 {strides = array<i32>} : memref<1x16x2560xf32, #tpu.memory_space<vmem>>, vector<1x16x16xf32>,
    %c4_562 = arith.constant 4 : index
    %c0_563 = arith.constant 0 : index
    %606 = vector.load %arg2[%c4_562, %c0_563] : memref<5x384xf32, #tpu.memory_space<vmem>>, vector<1x16xf32>
    %c0_564 = arith.constant 0 : index
    %c0_565 = arith.constant 0 : index
    %c2043 = arith.constant 2043 : index
    %607 = vector.load %arg28[%c0_564, %c0_565, %c2043] : memref<1x16x2560xf32, #tpu.memory_space<vmem>>, vector<1x16x16xf32>
    %608 = vector.shape_cast %607 : vector<1x16x16xf32> to vector<16x16xf32>
    %c0_566 = arith.constant 0 : index
    %c0_567 = arith.constant 0 : index
    %c0_568 = arith.constant 0 : index
    %609 = vector.load %arg23[%c0_566, %c0_567, %c0_568] : memref<9x16x16xf32, #tpu.memory_space<vmem>>, vector<1x16x16xf32>
    %610 = vector.shape_cast %609 : vector<1x16x16xf32> to vector<16x16xf32>
    %cst_569 = arith.constant dense<0.000000e+00> : vector<16x16xf32>
    %611 = tpu.matmul %610, %608, %cst_569 {dimension_numbers = #tpu.dot_dimension_numbers<[1], [0], [0], [1], [0, 0, 1, 1], [], []>} : vector<16x16xf32>, vector<16x16xf32>, vector<16x16xf32> -> vector<16x16xf32>
    %c0_570 = arith.constant 0 : index
    %c0_571 = arith.constant 0 : index
    %c2044 = arith.constant 2044 : index
    %612 = vector.load %arg28[%c0_570, %c0_571, %c2044] : memref<1x16x2560xf32, #tpu.memory_space<vmem>>, vector<1x16x16xf32>
    %613 = vector.shape_cast %612 : vector<1x16x16xf32> to vector<16x16xf32>
    %c1_572 = arith.constant 1 : index
    %c0_573 = arith.constant 0 : index
    %c0_574 = arith.constant 0 : index
    %614 = vector.load %arg23[%c1_572, %c0_573, %c0_574] : memref<9x16x16xf32, #tpu.memory_space<vmem>>, vector<1x16x16xf32>
    %615 = vector.shape_cast %614 : vector<1x16x16xf32> to vector<16x16xf32>
    %cst_575 = arith.constant dense<0.000000e+00> : vector<16x16xf32>
    %616 = tpu.matmul %615, %613, %cst_575 {dimension_numbers = #tpu.dot_dimension_numbers<[1], [0], [0], [1], [0, 0, 1, 1], [], []>} : vector<16x16xf32>, vector<16x16xf32>, vector<16x16xf32> -> vector<16x16xf32>
    %617 = arith.addf %611, %616 : vector<16x16xf32>
    %c0_576 = arith.constant 0 : index
    %c0_577 = arith.constant 0 : index
    %c2045 = arith.constant 2045 : index
    %618 = vector.load %arg28[%c0_576, %c0_577, %c2045] : memref<1x16x2560xf32, #tpu.memory_space<vmem>>, vector<1x16x16xf32>
    %619 = vector.shape_cast %618 : vector<1x16x16xf32> to vector<16x16xf32>
    %c2_578 = arith.constant 2 : index
    %c0_579 = arith.constant 0 : index
    %c0_580 = arith.constant 0 : index
    %620 = vector.load %arg23[%c2_578, %c0_579, %c0_580] : memref<9x16x16xf32, #tpu.memory_space<vmem>>, vector<1x16x16xf32>
    %621 = vector.shape_cast %620 : vector<1x16x16xf32> to vector<16x16xf32>
    %cst_581 = arith.constant dense<0.000000e+00> : vector<16x16xf32>
    %622 = tpu.matmul %621, %619, %cst_581 {dimension_numbers = #tpu.dot_dimension_numbers<[1], [0], [0], [1], [0, 0, 1, 1], [], []>} : vector<16x16xf32>, vector<16x16xf32>, vector<16x16xf32> -> vector<16x16xf32>
    %623 = arith.addf %617, %622 : vector<16x16xf32>
    %c0_582 = arith.constant 0 : index
    %c0_583 = arith.constant 0 : index
    %c2047 = arith.constant 2047 : index
    %624 = vector.load %arg28[%c0_582, %c0_583, %c2047] : memref<1x16x2560xf32, #tpu.memory_space<vmem>>, vector<1x16x16xf32>
    %625 = vector.shape_cast %624 : vector<1x16x16xf32> to vector<16x16xf32>
    %c3_584 = arith.constant 3 : index
    %c0_585 = arith.constant 0 : index
    %c0_586 = arith.constant 0 : index
    %626 = vector.load %arg23[%c3_584, %c0_585, %c0_586] : memref<9x16x16xf32, #tpu.memory_space<vmem>>, vector<1x16x16xf32>
    %627 = vector.shape_cast %626 : vector<1x16x16xf32> to vector<16x16xf32>
    %cst_587 = arith.constant dense<0.000000e+00> : vector<16x16xf32>
    %628 = tpu.matmul %627, %625, %cst_587 {dimension_numbers = #tpu.dot_dimension_numbers<[1], [0], [0], [1], [0, 0, 1, 1], [], []>} : vector<16x16xf32>, vector<16x16xf32>, vector<16x16xf32> -> vector<16x16xf32>
    %629 = arith.addf %623, %628 : vector<16x16xf32>
    %c0_588 = arith.constant 0 : index
    %c0_589 = arith.constant 0 : index
    %c2048_590 = arith.constant 2048 : index
    %630 = vector.load %arg28[%c0_588, %c0_589, %c2048_590] : memref<1x16x2560xf32, #tpu.memory_space<vmem>>, vector<1x16x16xf32>
    %631 = vector.shape_cast %630 : vector<1x16x16xf32> to vector<16x16xf32>
    %c4_591 = arith.constant 4 : index
    %c0_592 = arith.constant 0 : index
    %c0_593 = arith.constant 0 : index
    %632 = vector.load %arg23[%c4_591, %c0_592, %c0_593] : memref<9x16x16xf32, #tpu.memory_space<vmem>>, vector<1x16x16xf32>
    %633 = vector.shape_cast %632 : vector<1x16x16xf32> to vector<16x16xf32>
    %cst_594 = arith.constant dense<0.000000e+00> : vector<16x16xf32>
    %634 = tpu.matmul %633, %631, %cst_594 {dimension_numbers = #tpu.dot_dimension_numbers<[1], [0], [0], [1], [0, 0, 1, 1], [], []>} : vector<16x16xf32>, vector<16x16xf32>, vector<16x16xf32> -> vector<16x16xf32>
    %635 = arith.addf %629, %634 : vector<16x16xf32>
    %c0_595 = arith.constant 0 : index
    %c0_596 = arith.constant 0 : index
    %c2049 = arith.constant 2049 : index
    %636 = vector.load %arg28[%c0_595, %c0_596, %c2049] : memref<1x16x2560xf32, #tpu.memory_space<vmem>>, vector<1x16x16xf32>
    %637 = vector.shape_cast %636 : vector<1x16x16xf32> to vector<16x16xf32>
    %c5_597 = arith.constant 5 : index
    %c0_598 = arith.constant 0 : index
    %c0_599 = arith.constant 0 : index
    %638 = vector.load %arg23[%c5_597, %c0_598, %c0_599] : memref<9x16x16xf32, #tpu.memory_space<vmem>>, vector<1x16x16xf32>
    %639 = vector.shape_cast %638 : vector<1x16x16xf32> to vector<16x16xf32>
    %cst_600 = arith.constant dense<0.000000e+00> : vector<16x16xf32>
    %640 = tpu.matmul %639, %637, %cst_600 {dimension_numbers = #tpu.dot_dimension_numbers<[1], [0], [0], [1], [0, 0, 1, 1], [], []>} : vector<16x16xf32>, vector<16x16xf32>, vector<16x16xf32> -> vector<16x16xf32>
    %641 = arith.addf %635, %640 : vector<16x16xf32>
    %c0_601 = arith.constant 0 : index
    %c0_602 = arith.constant 0 : index
    %c2051 = arith.constant 2051 : index
    %642 = vector.load %arg28[%c0_601, %c0_602, %c2051] : memref<1x16x2560xf32, #tpu.memory_space<vmem>>, vector<1x16x16xf32>
    %643 = vector.shape_cast %642 : vector<1x16x16xf32> to vector<16x16xf32>
    %c6_603 = arith.constant 6 : index
    %c0_604 = arith.constant 0 : index
    %c0_605 = arith.constant 0 : index
    %644 = vector.load %arg23[%c6_603, %c0_604, %c0_605] : memref<9x16x16xf32, #tpu.memory_space<vmem>>, vector<1x16x16xf32>
    %645 = vector.shape_cast %644 : vector<1x16x16xf32> to vector<16x16xf32>
    %cst_606 = arith.constant dense<0.000000e+00> : vector<16x16xf32>
    %646 = tpu.matmul %645, %643, %cst_606 {dimension_numbers = #tpu.dot_dimension_numbers<[1], [0], [0], [1], [0, 0, 1, 1], [], []>} : vector<16x16xf32>, vector<16x16xf32>, vector<16x16xf32> -> vector<16x16xf32>
    %647 = arith.addf %641, %646 : vector<16x16xf32>
    %c0_607 = arith.constant 0 : index
    %c0_608 = arith.constant 0 : index
    %c2052 = arith.constant 2052 : index
    %648 = vector.load %arg28[%c0_607, %c0_608, %c2052] : memref<1x16x2560xf32, #tpu.memory_space<vmem>>, vector<1x16x16xf32>
    %649 = vector.shape_cast %648 : vector<1x16x16xf32> to vector<16x16xf32>
    %c7_609 = arith.constant 7 : index
    %c0_610 = arith.constant 0 : index
    %c0_611 = arith.constant 0 : index
    %650 = vector.load %arg23[%c7_609, %c0_610, %c0_611] : memref<9x16x16xf32, #tpu.memory_space<vmem>>, vector<1x16x16xf32>
    %651 = vector.shape_cast %650 : vector<1x16x16xf32> to vector<16x16xf32>
    %cst_612 = arith.constant dense<0.000000e+00> : vector<16x16xf32>
    %652 = tpu.matmul %651, %649, %cst_612 {dimension_numbers = #tpu.dot_dimension_numbers<[1], [0], [0], [1], [0, 0, 1, 1], [], []>} : vector<16x16xf32>, vector<16x16xf32>, vector<16x16xf32> -> vector<16x16xf32>
    %653 = arith.addf %647, %652 : vector<16x16xf32>
    %c0_613 = arith.constant 0 : index
    %c0_614 = arith.constant 0 : index
    %c2053 = arith.constant 2053 : index
    %654 = vector.load %arg28[%c0_613, %c0_614, %c2053] : memref<1x16x2560xf32, #tpu.memory_space<vmem>>, vector<1x16x16xf32>
    %655 = vector.shape_cast %654 : vector<1x16x16xf32> to vector<16x16xf32>
    %c8_615 = arith.constant 8 : index
    %c0_616 = arith.constant 0 : index
    %c0_617 = arith.constant 0 : index
    %656 = vector.load %arg23[%c8_615, %c0_616, %c0_617] : memref<9x16x16xf32, #tpu.memory_space<vmem>>, vector<1x16x16xf32>
    %657 = vector.shape_cast %656 : vector<1x16x16xf32> to vector<16x16xf32>
    %cst_618 = arith.constant dense<0.000000e+00> : vector<16x16xf32>
    %658 = tpu.matmul %657, %655, %cst_618 {dimension_numbers = #tpu.dot_dimension_numbers<[1], [0], [0], [1], [0, 0, 1, 1], [], []>} : vector<16x16xf32>, vector<16x16xf32>, vector<16x16xf32> -> vector<16x16xf32>
    %659 = arith.addf %653, %658 : vector<16x16xf32>
    %c0_619 = arith.constant 0 : index
    %c0_620 = arith.constant 0 : index
    %660 = vector.load %arg24[%c0_619, %c0_620] : memref<16x1xf32, #tpu.memory_space<vmem>>, vector<16x1xf32>
    %661 = vector.broadcast %660 : vector<16x1xf32> to vector<16x16xf32>
    %662 = arith.addf %659, %661 : vector<16x16xf32>
    %cst_621 = arith.constant 0.000000e+00 : f32
    %663 = vector.broadcast %cst_621 : f32 to vector<16x16xf32>
    %664 = arith.maximumf %662, %663 : vector<16x16xf32>
    %cst_622 = arith.constant 0.000000e+00 : f32
    %665 = vector.broadcast %cst_622 : f32 to vector<1x16xf32>
    %666 = arith.cmpf ogt, %606, %665 : vector<1x16xf32>
    %cst_623 = arith.constant 0.000000e+00 : f32
    %667 = vector.shape_cast %666 : vector<1x16xi1> to vector<1x16xi1>
    %668 = vector.broadcast %667 : vector<1x16xi1> to vector<16x16xi1>
    %669 = vector.broadcast %cst_623 : f32 to vector<16x16xf32>
    %670 = arith.select %668, %664, %669 : vector<16x16xi1>, vector<16x16xf32>
    %c0_624 = arith.constant 0 : index
    %c0_625 = arith.constant 0 : index
    %c2176 = arith.constant 2176 : index
    %671 = vector.load %arg28[%c0_624, %c0_625, %c2176] : memref<1x16x2560xf32, #tpu.memory_space<vmem>>, vector<1x16x16xf32>
    %672 = vector.shape_cast %671 : vector<1x16x16xf32> to vector<16x16xf32>
    %673 = vector.shape_cast %670 : vector<16x16xf32> to vector<1x16x16xf32>
    tpu.vector_store %arg28[%c0_624, %c0_625, %c2176], %673 {strides = array<i32>} : memref<1x16x2560xf32, #tpu.memory_space<vmem>>, vector<1x16x16xf32>,
    %c0_626 = arith.constant 0 : index
    %c0_627 = arith.constant 0 : index
    %c2171 = arith.constant 2171 : index
    %674 = vector.load %arg28[%c0_626, %c0_627, %c2171] : memref<1x16x2560xf32, #tpu.memory_space<vmem>>, vector<1x16x16xf32>
    %675 = vector.shape_cast %674 : vector<1x16x16xf32> to vector<16x16xf32>
    %c0_628 = arith.constant 0 : index
    %c0_629 = arith.constant 0 : index
    %c0_630 = arith.constant 0 : index
    %676 = vector.load %arg25[%c0_628, %c0_629, %c0_630] : memref<9x16x16xf32, #tpu.memory_space<vmem>>, vector<1x16x16xf32>
    %677 = vector.shape_cast %676 : vector<1x16x16xf32> to vector<16x16xf32>
    %cst_631 = arith.constant dense<0.000000e+00> : vector<16x16xf32>
    %678 = tpu.matmul %677, %675, %cst_631 {dimension_numbers = #tpu.dot_dimension_numbers<[1], [0], [0], [1], [0, 0, 1, 1], [], []>} : vector<16x16xf32>, vector<16x16xf32>, vector<16x16xf32> -> vector<16x16xf32>
    %c0_632 = arith.constant 0 : index
    %c0_633 = arith.constant 0 : index
    %c2172 = arith.constant 2172 : index
    %679 = vector.load %arg28[%c0_632, %c0_633, %c2172] : memref<1x16x2560xf32, #tpu.memory_space<vmem>>, vector<1x16x16xf32>
    %680 = vector.shape_cast %679 : vector<1x16x16xf32> to vector<16x16xf32>
    %c1_634 = arith.constant 1 : index
    %c0_635 = arith.constant 0 : index
    %c0_636 = arith.constant 0 : index
    %681 = vector.load %arg25[%c1_634, %c0_635, %c0_636] : memref<9x16x16xf32, #tpu.memory_space<vmem>>, vector<1x16x16xf32>
    %682 = vector.shape_cast %681 : vector<1x16x16xf32> to vector<16x16xf32>
    %cst_637 = arith.constant dense<0.000000e+00> : vector<16x16xf32>
    %683 = tpu.matmul %682, %680, %cst_637 {dimension_numbers = #tpu.dot_dimension_numbers<[1], [0], [0], [1], [0, 0, 1, 1], [], []>} : vector<16x16xf32>, vector<16x16xf32>, vector<16x16xf32> -> vector<16x16xf32>
    %684 = arith.addf %678, %683 : vector<16x16xf32>
    %c0_638 = arith.constant 0 : index
    %c0_639 = arith.constant 0 : index
    %c2173 = arith.constant 2173 : index
    %685 = vector.load %arg28[%c0_638, %c0_639, %c2173] : memref<1x16x2560xf32, #tpu.memory_space<vmem>>, vector<1x16x16xf32>
    %686 = vector.shape_cast %685 : vector<1x16x16xf32> to vector<16x16xf32>
    %c2_640 = arith.constant 2 : index
    %c0_641 = arith.constant 0 : index
    %c0_642 = arith.constant 0 : index
    %687 = vector.load %arg25[%c2_640, %c0_641, %c0_642] : memref<9x16x16xf32, #tpu.memory_space<vmem>>, vector<1x16x16xf32>
    %688 = vector.shape_cast %687 : vector<1x16x16xf32> to vector<16x16xf32>
    %cst_643 = arith.constant dense<0.000000e+00> : vector<16x16xf32>
    %689 = tpu.matmul %688, %686, %cst_643 {dimension_numbers = #tpu.dot_dimension_numbers<[1], [0], [0], [1], [0, 0, 1, 1], [], []>} : vector<16x16xf32>, vector<16x16xf32>, vector<16x16xf32> -> vector<16x16xf32>
    %690 = arith.addf %684, %689 : vector<16x16xf32>
    %c0_644 = arith.constant 0 : index
    %c0_645 = arith.constant 0 : index
    %c2175 = arith.constant 2175 : index
    %691 = vector.load %arg28[%c0_644, %c0_645, %c2175] : memref<1x16x2560xf32, #tpu.memory_space<vmem>>, vector<1x16x16xf32>
    %692 = vector.shape_cast %691 : vector<1x16x16xf32> to vector<16x16xf32>
    %c3_646 = arith.constant 3 : index
    %c0_647 = arith.constant 0 : index
    %c0_648 = arith.constant 0 : index
    %693 = vector.load %arg25[%c3_646, %c0_647, %c0_648] : memref<9x16x16xf32, #tpu.memory_space<vmem>>, vector<1x16x16xf32>
    %694 = vector.shape_cast %693 : vector<1x16x16xf32> to vector<16x16xf32>
    %cst_649 = arith.constant dense<0.000000e+00> : vector<16x16xf32>
    %695 = tpu.matmul %694, %692, %cst_649 {dimension_numbers = #tpu.dot_dimension_numbers<[1], [0], [0], [1], [0, 0, 1, 1], [], []>} : vector<16x16xf32>, vector<16x16xf32>, vector<16x16xf32> -> vector<16x16xf32>
    %696 = arith.addf %690, %695 : vector<16x16xf32>
    %c0_650 = arith.constant 0 : index
    %c0_651 = arith.constant 0 : index
    %c2176_652 = arith.constant 2176 : index
    %697 = vector.load %arg28[%c0_650, %c0_651, %c2176_652] : memref<1x16x2560xf32, #tpu.memory_space<vmem>>, vector<1x16x16xf32>
    %698 = vector.shape_cast %697 : vector<1x16x16xf32> to vector<16x16xf32>
    %c4_653 = arith.constant 4 : index
    %c0_654 = arith.constant 0 : index
    %c0_655 = arith.constant 0 : index
    %699 = vector.load %arg25[%c4_653, %c0_654, %c0_655] : memref<9x16x16xf32, #tpu.memory_space<vmem>>, vector<1x16x16xf32>
    %700 = vector.shape_cast %699 : vector<1x16x16xf32> to vector<16x16xf32>
    %cst_656 = arith.constant dense<0.000000e+00> : vector<16x16xf32>
    %701 = tpu.matmul %700, %698, %cst_656 {dimension_numbers = #tpu.dot_dimension_numbers<[1], [0], [0], [1], [0, 0, 1, 1], [], []>} : vector<16x16xf32>, vector<16x16xf32>, vector<16x16xf32> -> vector<16x16xf32>
    %702 = arith.addf %696, %701 : vector<16x16xf32>
    %c0_657 = arith.constant 0 : index
    %c0_658 = arith.constant 0 : index
    %c2177 = arith.constant 2177 : index
    %703 = vector.load %arg28[%c0_657, %c0_658, %c2177] : memref<1x16x2560xf32, #tpu.memory_space<vmem>>, vector<1x16x16xf32>
    %704 = vector.shape_cast %703 : vector<1x16x16xf32> to vector<16x16xf32>
    %c5_659 = arith.constant 5 : index
    %c0_660 = arith.constant 0 : index
    %c0_661 = arith.constant 0 : index
    %705 = vector.load %arg25[%c5_659, %c0_660, %c0_661] : memref<9x16x16xf32, #tpu.memory_space<vmem>>, vector<1x16x16xf32>
    %706 = vector.shape_cast %705 : vector<1x16x16xf32> to vector<16x16xf32>
    %cst_662 = arith.constant dense<0.000000e+00> : vector<16x16xf32>
    %707 = tpu.matmul %706, %704, %cst_662 {dimension_numbers = #tpu.dot_dimension_numbers<[1], [0], [0], [1], [0, 0, 1, 1], [], []>} : vector<16x16xf32>, vector<16x16xf32>, vector<16x16xf32> -> vector<16x16xf32>
    %708 = arith.addf %702, %707 : vector<16x16xf32>
    %c0_663 = arith.constant 0 : index
    %c0_664 = arith.constant 0 : index
    %c2179 = arith.constant 2179 : index
    %709 = vector.load %arg28[%c0_663, %c0_664, %c2179] : memref<1x16x2560xf32, #tpu.memory_space<vmem>>, vector<1x16x16xf32>
    %710 = vector.shape_cast %709 : vector<1x16x16xf32> to vector<16x16xf32>
    %c6_665 = arith.constant 6 : index
    %c0_666 = arith.constant 0 : index
    %c0_667 = arith.constant 0 : index
    %711 = vector.load %arg25[%c6_665, %c0_666, %c0_667] : memref<9x16x16xf32, #tpu.memory_space<vmem>>, vector<1x16x16xf32>
    %712 = vector.shape_cast %711 : vector<1x16x16xf32> to vector<16x16xf32>
    %cst_668 = arith.constant dense<0.000000e+00> : vector<16x16xf32>
    %713 = tpu.matmul %712, %710, %cst_668 {dimension_numbers = #tpu.dot_dimension_numbers<[1], [0], [0], [1], [0, 0, 1, 1], [], []>} : vector<16x16xf32>, vector<16x16xf32>, vector<16x16xf32> -> vector<16x16xf32>
    %714 = arith.addf %708, %713 : vector<16x16xf32>
    %c0_669 = arith.constant 0 : index
    %c0_670 = arith.constant 0 : index
    %c2180 = arith.constant 2180 : index
    %715 = vector.load %arg28[%c0_669, %c0_670, %c2180] : memref<1x16x2560xf32, #tpu.memory_space<vmem>>, vector<1x16x16xf32>
    %716 = vector.shape_cast %715 : vector<1x16x16xf32> to vector<16x16xf32>
    %c7_671 = arith.constant 7 : index
    %c0_672 = arith.constant 0 : index
    %c0_673 = arith.constant 0 : index
    %717 = vector.load %arg25[%c7_671, %c0_672, %c0_673] : memref<9x16x16xf32, #tpu.memory_space<vmem>>, vector<1x16x16xf32>
    %718 = vector.shape_cast %717 : vector<1x16x16xf32> to vector<16x16xf32>
    %cst_674 = arith.constant dense<0.000000e+00> : vector<16x16xf32>
    %719 = tpu.matmul %718, %716, %cst_674 {dimension_numbers = #tpu.dot_dimension_numbers<[1], [0], [0], [1], [0, 0, 1, 1], [], []>} : vector<16x16xf32>, vector<16x16xf32>, vector<16x16xf32> -> vector<16x16xf32>
    %720 = arith.addf %714, %719 : vector<16x16xf32>
    %c0_675 = arith.constant 0 : index
    %c0_676 = arith.constant 0 : index
    %c2181 = arith.constant 2181 : index
    %721 = vector.load %arg28[%c0_675, %c0_676, %c2181] : memref<1x16x2560xf32, #tpu.memory_space<vmem>>, vector<1x16x16xf32>
    %722 = vector.shape_cast %721 : vector<1x16x16xf32> to vector<16x16xf32>
    %c8_677 = arith.constant 8 : index
    %c0_678 = arith.constant 0 : index
    %c0_679 = arith.constant 0 : index
    %723 = vector.load %arg25[%c8_677, %c0_678, %c0_679] : memref<9x16x16xf32, #tpu.memory_space<vmem>>, vector<1x16x16xf32>
    %724 = vector.shape_cast %723 : vector<1x16x16xf32> to vector<16x16xf32>
    %cst_680 = arith.constant dense<0.000000e+00> : vector<16x16xf32>
    %725 = tpu.matmul %724, %722, %cst_680 {dimension_numbers = #tpu.dot_dimension_numbers<[1], [0], [0], [1], [0, 0, 1, 1], [], []>} : vector<16x16xf32>, vector<16x16xf32>, vector<16x16xf32> -> vector<16x16xf32>
    %726 = arith.addf %720, %725 : vector<16x16xf32>
    %c0_681 = arith.constant 0 : index
    %c0_682 = arith.constant 0 : index
    %727 = vector.load %arg26[%c0_681, %c0_682] : memref<16x1xf32, #tpu.memory_space<vmem>>, vector<16x1xf32>
    %728 = vector.broadcast %727 : vector<16x1xf32> to vector<16x16xf32>
    %729 = arith.addf %726, %728 : vector<16x16xf32>
    %cst_683 = arith.constant 0.000000e+00 : f32
    %730 = vector.broadcast %cst_683 : f32 to vector<16x16xf32>
    %731 = arith.maximumf %729, %730 : vector<16x16xf32>
    %cst_684 = arith.constant 0.000000e+00 : f32
    %732 = vector.broadcast %cst_684 : f32 to vector<1x16xf32>
    %733 = arith.cmpf ogt, %606, %732 : vector<1x16xf32>
    %cst_685 = arith.constant 0.000000e+00 : f32
    %734 = vector.shape_cast %733 : vector<1x16xi1> to vector<1x16xi1>
    %735 = vector.broadcast %734 : vector<1x16xi1> to vector<16x16xi1>
    %736 = vector.broadcast %cst_685 : f32 to vector<16x16xf32>
    %737 = arith.select %735, %731, %736 : vector<16x16xi1>, vector<16x16xf32>
    %c0_686 = arith.constant 0 : index
    %c0_687 = arith.constant 0 : index
    %c2304 = arith.constant 2304 : index
    %738 = vector.load %arg28[%c0_686, %c0_687, %c2304] : memref<1x16x2560xf32, #tpu.memory_space<vmem>>, vector<1x16x16xf32>
    %739 = vector.shape_cast %738 : vector<1x16x16xf32> to vector<16x16xf32>
    %740 = vector.shape_cast %737 : vector<16x16xf32> to vector<1x16x16xf32>
    tpu.vector_store %arg28[%c0_686, %c0_687, %c2304], %740 {strides = array<i32>} : memref<1x16x2560xf32, #tpu.memory_space<vmem>>, vector<1x16x16xf32>,
    %c0_688 = arith.constant 0 : index
    %c0_689 = arith.constant 0 : index
    %c2304_690 = arith.constant 2304 : index
    %741 = vector.load %arg28[%c0_688, %c0_689, %c2304_690] : memref<1x16x2560xf32, #tpu.memory_space<vmem>>, vector<1x16x16xf32>
    %742 = vector.shape_cast %741 : vector<1x16x16xf32> to vector<16x16xf32>
    %c0_691 = arith.constant 0 : index
    %c0_692 = arith.constant 0 : index
    %c2305 = arith.constant 2305 : index
    %743 = vector.load %arg28[%c0_691, %c0_692, %c2305] : memref<1x16x2560xf32, #tpu.memory_space<vmem>>, vector<1x16x16xf32>
    %744 = vector.shape_cast %743 : vector<1x16x16xf32> to vector<16x16xf32>
    %c0_693 = arith.constant 0 : index
    %c0_694 = arith.constant 0 : index
    %c2308 = arith.constant 2308 : index
    %745 = vector.load %arg28[%c0_693, %c0_694, %c2308] : memref<1x16x2560xf32, #tpu.memory_space<vmem>>, vector<1x16x16xf32>
    %746 = vector.shape_cast %745 : vector<1x16x16xf32> to vector<16x16xf32>
    %c0_695 = arith.constant 0 : index
    %c0_696 = arith.constant 0 : index
    %c2309 = arith.constant 2309 : index
    %747 = vector.load %arg28[%c0_695, %c0_696, %c2309] : memref<1x16x2560xf32, #tpu.memory_space<vmem>>, vector<1x16x16xf32>
    %748 = vector.shape_cast %747 : vector<1x16x16xf32> to vector<16x16xf32>
    %749 = arith.maximumf %742, %744 : vector<16x16xf32>
    %750 = arith.maximumf %746, %748 : vector<16x16xf32>
    %751 = arith.maximumf %749, %750 : vector<16x16xf32>
    %c0_697 = arith.constant 0 : index
    %c0_698 = arith.constant 0 : index
    %752 = vector.load %arg27[%c0_697, %c0_698] : memref<16x9xf32, #tpu.memory_space<vmem>>, vector<16x9xf32>
    %cst_699 = arith.constant dense<0.000000e+00> : vector<16x9xf32>
    %753 = tpu.matmul %751, %752, %cst_699 {dimension_numbers = #tpu.dot_dimension_numbers<[1], [0], [0], [1], [0, 0, 1, 1], [], []>} : vector<16x16xf32>, vector<16x9xf32>, vector<16x9xf32> -> vector<16x9xf32>
    %c0_700 = arith.constant 0 : index
    %c0_701 = arith.constant 0 : index
    %c2432 = arith.constant 2432 : index
    %754 = vector.load %arg28[%c0_700, %c0_701, %c2432] : memref<1x16x2560xf32, #tpu.memory_space<vmem>>, vector<1x16x9xf32>
    %755 = vector.shape_cast %754 : vector<1x16x9xf32> to vector<16x9xf32>
    %756 = vector.shape_cast %753 : vector<16x9xf32> to vector<1x16x9xf32>
    tpu.vector_store %arg28[%c0_700, %c0_701, %c2432], %756 {strides = array<i32>} : memref<1x16x2560xf32, #tpu.memory_space<vmem>>, vector<1x16x9xf32>,
    return
  }
  func.func @transform_0(%arg0: i32) -> (i32, i32, i32) {
    %c0_i32 = arith.constant 0 : i32
    %c0_i32_0 = arith.constant 0 : i32
    %c0_i32_1 = arith.constant 0 : i32
    return %arg0, %c0_i32, %c0_i32_0 : i32, i32, i32
  }
  func.func @transform_1(%arg0: i32) -> (i32, i32) {
    %c0_i32 = arith.constant 0 : i32
    %c0_i32_0 = arith.constant 0 : i32
    %c0_i32_1 = arith.constant 0 : i32
    return %c0_i32, %c0_i32_0 : i32, i32
  }
  func.func @transform_2(%arg0: i32) -> (i32, i32, i32) {
    %c0_i32 = arith.constant 0 : i32
    %c0_i32_0 = arith.constant 0 : i32
    %c0_i32_1 = arith.constant 0 : i32
    %c0_i32_2 = arith.constant 0 : i32
    return %c0_i32, %c0_i32_0, %c0_i32_1 : i32, i32, i32
  }
  func.func @transform_3(%arg0: i32) -> (i32, i32) {
    %c0_i32 = arith.constant 0 : i32
    %c0_i32_0 = arith.constant 0 : i32
    %c0_i32_1 = arith.constant 0 : i32
    return %c0_i32, %c0_i32_0 : i32, i32
  }
  func.func @transform_4(%arg0: i32) -> (i32, i32, i32) {
    %c0_i32 = arith.constant 0 : i32
    %c0_i32_0 = arith.constant 0 : i32
    %c0_i32_1 = arith.constant 0 : i32
    %c0_i32_2 = arith.constant 0 : i32
    return %c0_i32, %c0_i32_0, %c0_i32_1 : i32, i32, i32
  }
  func.func @transform_5(%arg0: i32) -> (i32, i32) {
    %c0_i32 = arith.constant 0 : i32
    %c0_i32_0 = arith.constant 0 : i32
    %c0_i32_1 = arith.constant 0 : i32
    return %c0_i32, %c0_i32_0 : i32, i32
  }
  func.func @transform_6(%arg0: i32) -> (i32, i32) {
    %c0_i32 = arith.constant 0 : i32
    %c0_i32_0 = arith.constant 0 : i32
    %c0_i32_1 = arith.constant 0 : i32
    return %c0_i32, %c0_i32_0 : i32, i32
  }
  func.func @transform_7(%arg0: i32) -> (i32, i32, i32) {
    %c0_i32 = arith.constant 0 : i32
    %c0_i32_0 = arith.constant 0 : i32
    %c0_i32_1 = arith.constant 0 : i32
    %c0_i32_2 = arith.constant 0 : i32
    return %c0_i32, %c0_i32_0, %c0_i32_1 : i32, i32, i32
  }
  func.func @transform_8(%arg0: i32) -> (i32, i32) {
    %c0_i32 = arith.constant 0 : i32
    %c0_i32_0 = arith.constant 0 : i32
    %c0_i32_1 = arith.constant 0 : i32
    return %c0_i32, %c0_i32_0 : i32, i32
  }
  func.func @transform_9(%arg0: i32) -> (i32, i32, i32) {
    %c0_i32 = arith.constant 0 : i32
    %c0_i32_0 = arith.constant 0 : i32
    %c0_i32_1 = arith.constant 0 : i32
    %c0_i32_2 = arith.constant 0 : i32
    return %c0_i32, %c0_i32_0, %c0_i32_1 : i32, i32, i32
  }
  func.func @transform_10(%arg0: i32) -> (i32, i32) {
    %c0_i32 = arith.constant 0 : i32
    %c0_i32_0 = arith.constant 0 : i32
    %c0_i32_1 = arith.constant 0 : i32
    return %c0_i32, %c0_i32_0 : i32, i32
  }
  func.func @transform_11(%arg0: i32) -> (i32, i32) {
    %c0_i32 = arith.constant 0 : i32
    %c0_i32_0 = arith.constant 0 : i32
    %c0_i32_1 = arith.constant 0 : i32
    return %c0_i32, %c0_i32_0 : i32, i32
  }
  func.func @transform_12(%arg0: i32) -> (i32, i32, i32) {
    %c0_i32 = arith.constant 0 : i32
    %c0_i32_0 = arith.constant 0 : i32
    %c0_i32_1 = arith.constant 0 : i32
    %c0_i32_2 = arith.constant 0 : i32
    return %c0_i32, %c0_i32_0, %c0_i32_1 : i32, i32, i32
  }
  func.func @transform_13(%arg0: i32) -> (i32, i32) {
    %c0_i32 = arith.constant 0 : i32
    %c0_i32_0 = arith.constant 0 : i32
    %c0_i32_1 = arith.constant 0 : i32
    return %c0_i32, %c0_i32_0 : i32, i32
  }
  func.func @transform_14(%arg0: i32) -> (i32, i32, i32) {
    %c0_i32 = arith.constant 0 : i32
    %c0_i32_0 = arith.constant 0 : i32
    %c0_i32_1 = arith.constant 0 : i32
    %c0_i32_2 = arith.constant 0 : i32
    return %c0_i32, %c0_i32_0, %c0_i32_1 : i32, i32, i32
  }
  func.func @transform_15(%arg0: i32) -> (i32, i32) {
    %c0_i32 = arith.constant 0 : i32
    %c0_i32_0 = arith.constant 0 : i32
    %c0_i32_1 = arith.constant 0 : i32
    return %c0_i32, %c0_i32_0 : i32, i32
  }
  func.func @transform_16(%arg0: i32) -> (i32, i32) {
    %c0_i32 = arith.constant 0 : i32
    %c0_i32_0 = arith.constant 0 : i32
    %c0_i32_1 = arith.constant 0 : i32
    return %c0_i32, %c0_i32_0 : i32, i32
  }
  func.func @transform_17(%arg0: i32) -> (i32, i32, i32) {
    %c0_i32 = arith.constant 0 : i32
    %c0_i32_0 = arith.constant 0 : i32
    %c0_i32_1 = arith.constant 0 : i32
    %c0_i32_2 = arith.constant 0 : i32
    return %c0_i32, %c0_i32_0, %c0_i32_1 : i32, i32, i32
  }
  func.func @transform_18(%arg0: i32) -> (i32, i32) {
    %c0_i32 = arith.constant 0 : i32
    %c0_i32_0 = arith.constant 0 : i32
    %c0_i32_1 = arith.constant 0 : i32
    return %c0_i32, %c0_i32_0 : i32, i32
  }
  func.func @transform_19(%arg0: i32) -> (i32, i32, i32) {
    %c0_i32 = arith.constant 0 : i32
    %c0_i32_0 = arith.constant 0 : i32
    %c0_i32_1 = arith.constant 0 : i32
    %c0_i32_2 = arith.constant 0 : i32
    return %c0_i32, %c0_i32_0, %c0_i32_1 : i32, i32, i32
  }
  func.func @transform_20(%arg0: i32) -> (i32, i32) {
    %c0_i32 = arith.constant 0 : i32
    %c0_i32_0 = arith.constant 0 : i32
    %c0_i32_1 = arith.constant 0 : i32
    return %c0_i32, %c0_i32_0 : i32, i32
  }
  func.func @transform_21(%arg0: i32) -> (i32, i32) {
    %c0_i32 = arith.constant 0 : i32
    %c0_i32_0 = arith.constant 0 : i32
    %c0_i32_1 = arith.constant 0 : i32
    return %c0_i32, %c0_i32_0 : i32, i32
  }
  func.func @transform_22(%arg0: i32) -> (i32, i32, i32) {
    %c0_i32 = arith.constant 0 : i32
    %c0_i32_0 = arith.constant 0 : i32
    %c0_i32_1 = arith.constant 0 : i32
    %c0_i32_2 = arith.constant 0 : i32
    return %c0_i32, %c0_i32_0, %c0_i32_1 : i32, i32, i32
  }
  func.func @transform_23(%arg0: i32) -> (i32, i32) {
    %c0_i32 = arith.constant 0 : i32
    %c0_i32_0 = arith.constant 0 : i32
    %c0_i32_1 = arith.constant 0 : i32
    return %c0_i32, %c0_i32_0 : i32, i32
  }
  func.func @transform_24(%arg0: i32) -> (i32, i32, i32) {
    %c0_i32 = arith.constant 0 : i32
    %c0_i32_0 = arith.constant 0 : i32
    %c0_i32_1 = arith.constant 0 : i32
    %c0_i32_2 = arith.constant 0 : i32
    return %c0_i32, %c0_i32_0, %c0_i32_1 : i32, i32, i32
  }
  func.func @transform_25(%arg0: i32) -> (i32, i32) {
    %c0_i32 = arith.constant 0 : i32
    %c0_i32_0 = arith.constant 0 : i32
    %c0_i32_1 = arith.constant 0 : i32
    return %c0_i32, %c0_i32_0 : i32, i32
  }
  func.func @transform_26(%arg0: i32) -> (i32, i32) {
    %c0_i32 = arith.constant 0 : i32
    %c0_i32_0 = arith.constant 0 : i32
    %c0_i32_1 = arith.constant 0 : i32
    return %c0_i32, %c0_i32_0 : i32, i32
  }
  func.func @transform_27(%arg0: i32) -> (i32, i32, i32) {
    %c0_i32 = arith.constant 0 : i32
    %c0_i32_0 = arith.constant 0 : i32
    %c0_i32_1 = arith.constant 0 : i32
    return %arg0, %c0_i32, %c0_i32_0 : i32, i32, i32
  }
}

</mosaic_0001>

<bundles_post_ra>
// kernel: down_forward.1
= control target key start
LH: loop header
LB: loop body
LE: loop exit
PB: predicated region body
PF: predicated region fallthrough
CT: control target
= control target key end

     0   :  { %s14633_s0 = inlined_call_operand.vmem [shape: f32[2,4,512], index: 0, kind: input, shape index: {}]   ;;  %s14634_s1 = inlined_call_operand.vmem [shape: f32[5,384], index: 1, kind: input, shape index: {}]   ;;  %s14635_s2 = inlined_call_operand.vmem [shape: f32[9,8,4], index: 2, kind: input, shape index: {}]   ;;  %s14636_s3 = inlined_call_operand.vmem [shape: f32[8,1], index: 3, kind: input, shape index: {}]   ;;  %s14637_s4 = inlined_call_operand.vmem [shape: f32[9,8,8], index: 4, kind: input, shape index: {}]   ;;  %s14638_s5 = inlined_call_operand.vmem [shape: f32[8,1], index: 5, kind: input, shape index: {}]   ;;  %s14639_s6 = inlined_call_operand.vmem [shape: f32[324,100], index: 6, kind: input, shape index: {}]   ;;  %s14640_s7 = inlined_call_operand.vmem [shape: f32[9,8,8], index: 7, kind: input, shape index: {}]   ;;  %s14641_s8 = inlined_call_operand.vmem [shape: f32[8,1], index: 8, kind: input, shape index: {}]   ;;  %s14642_s9 = inlined_call_operand.vmem [shape: f32[9,8,8], index: 9, kind: input, shape index: {}]   ;;  %s14643_s10 = inlined_call_operand.vmem [shape: f32[8,1], index: 10, kind: input, shape index: {}]   ;;  %s14644_s11 = inlined_call_operand.vmem [shape: f32[100,36], index: 11, kind: input, shape index: {}]   ;;  %s14645_s12 = inlined_call_operand.vmem [shape: f32[9,16,8], index: 12, kind: input, shape index: {}]   ;;  %s14646_s13 = inlined_call_operand.vmem [shape: f32[16,1], index: 13, kind: input, shape index: {}]   ;;  %s14647_s14 = inlined_call_operand.vmem [shape: f32[9,16,16], index: 14, kind: input, shape index: {}]   ;;  %s14648_s15 = inlined_call_operand.vmem [shape: f32[16,1], index: 15, kind: input, shape index: {}]   ;;  %s14649_s16 = inlined_call_operand.vmem [shape: f32[36,25], index: 16, kind: input, shape index: {}]   ;;  %s14650_s17 = inlined_call_operand.vmem [shape: f32[9,16,16], index: 17, kind: input, shape index: {}]   ;;  %s14651_s18 = inlined_call_operand.vmem [shape: f32[16,1], index: 18, kind: input, shape index: {}]   ;;  %s14652_s19 = inlined_call_operand.vmem [shape: f32[9,16,16], index: 19, kind: input, shape index: {}]   ;;  %s14653_s20 = inlined_call_operand.vmem [shape: f32[16,1], index: 20, kind: input, shape index: {}]   ;;  %s14654_s21 = inlined_call_operand.vmem [shape: f32[25,16], index: 21, kind: input, shape index: {}]   ;;  %s14655_s22 = inlined_call_operand.vmem [shape: f32[9,16,16], index: 22, kind: input, shape index: {}]   ;;  %s14656_s23 = inlined_call_operand.vmem [shape: f32[16,1], index: 23, kind: input, shape index: {}]   ;;  %s14657_s24 = inlined_call_operand.vmem [shape: f32[9,16,16], index: 24, kind: input, shape index: {}]   ;;  %s14658_s25 = inlined_call_operand.vmem [shape: f32[16,1], index: 25, kind: input, shape index: {}]   ;;  %s14659_s26 = inlined_call_operand.vmem [shape: f32[16,9], index: 26, kind: input, shape index: {}]   ;;  %s14660_s27 = inlined_call_operand.vmem [shape: f32[2,16,2560], index: 27, kind: output, shape index: {}]  }
   0x1   :  { %14696 = sst [smem:[#allocation2_spill]] %s14633_s0 }
   0x2   :  { %14697 = sst [smem:[#allocation3_spill]] %s14634_s1 }
   0x3   :  { %14698 = sst [smem:[#allocation4_spill]] %s14635_s2 }
   0x4   :  { %14699 = sst [smem:[#allocation5_spill]] %s14636_s3 }
   0x5   :  { %14700 = sst [smem:[#allocation6_spill]] %s14637_s4 }
   0x6   :  { %14701 = sst [smem:[#allocation7_spill]] %s14638_s5 }
   0x7   :  { %14702 = sst [smem:[#allocation8_spill]] %s14639_s6 }
   0x8   :  { %14703 = sst [smem:[#allocation9_spill]] %s14640_s7  ;;  %s12796_s7 = smov 0  }
   0x9   :  { %14704 = sst [smem:[#allocation10_spill]] %s14641_s8 }
   0xa   :  { %14705 = sst [smem:[#allocation11_spill]] %s14642_s9 }
   0xb   :  { %14706 = sst [smem:[#allocation12_spill]] %s14643_s10 }
   0xc   :  { %14707 = sst [smem:[#allocation13_spill]] %s14644_s11 }
   0xd   :  { %14708 = sst [smem:[#allocation14_spill]] %s14645_s12 }
   0xe   :  { %14709 = sst [smem:[#allocation15_spill]] %s14646_s13 }
   0xf   :  { %14710 = sst [smem:[#allocation16_spill]] %s14660_s27 }
  0x10 LB: > { %s11251_s4 = sadd.s32 4294967295, %s12627_s7   ;;  %p11255_p0 = scmp.ge.s32.totalorder %s12627_s7, 1  ;;  %s12627_s7 = sphi %s12796_s7, %s37_s7  }
  0x11   : > { %p737_p1 = scmp.lt.s32.totalorder %s12627_s7, 3 }
  0x13   : > { %p738_p2 = pnand %p11255_p0, %p737_p1 }
  0x14   : > { %p809_p3 = scmp.lt.s32.totalorder (!%p738_p2), %s11251_s4, 1  ;;  %s14711_s28 = sld [smem:[#allocation2_spill]] (!%p738_p2) }
  0x15   : > { %741 = sbr.rel (%p738_p2) target bundleno = 5869 (0x16ed), region = 128  ;;  %s14712_s27 = sld [smem:[#allocation16_spill]] (!%p738_p2) }
  0x16   : > { %s12630_s6 = smov (!%p738_p2), 18   ;;  %s12631_s11 = smov (!%p738_p2), 19  }
  0x17   : > { %s12633_s2 = smov (!%p738_p2), 17   ;;  %s14668_s3 = smov (!%p738_p2), 1  }
  0x18   : > { %s12639_s9 = smov (!%p738_p2), 109   ;;  %s14713_s10 = sld [smem:[#allocation5_spill]] (!%p738_p2) }
  0x19   : > { %s14722_s29 = sld [smem:[#allocation9_spill]] (!%p738_p2)  ;;  %s14679_s5 = smov (!%p738_p2), 118  }
  0x1a   : > { %s14739_s4 = smov (!%p809_p3, %s11251_s4), 1  ;;  %v12629_v0 = vmov 0.0   ;;  %vm12632_vm0 = vmmov 0   ;;  %v12637_v10 = vmov 0   ;;  %vm877_vm1 = vcmask 146432   ;;  %s14730_s12 = sld [smem:[#allocation14_spill]] }
  0x1b   : > { %s11590_s8 = sshll.u32 %s14739_s4, 4  ;;  %s12567_s30 = smul.u32 320, %s14739_s4  ;;  %956 = vmatprep.mubr.f32.mxu0 %v12629_v0  ;;  %11946 = vmatprep.subr.mxu1 %v12629_v0  ;;  %vm885_vm2 = vcmask 1043456   ;;  %vm1041_vm3 = vcmask 154624   ;;  %vm881_vm4 = vcmask 31744   ;;  %vm1211_vm5 = vcmask 138240  }
  0x1c   : > { %s12807_s0 = scalar_lea.vmem %s14711_s28, %s11590_s8  ;;  %11948 = vmatprep.mubr.msk.f32.mxu1 %vm12632_vm0, %v12629_v0  ;;  %s14672_s4 = smov 127   ;;  %12603 = vset.pattern.permute.xlu0 %v12637_v10  ;;  %vm1384_vm6 = vcmask 7168   ;;  %vm1714_vm7 = vcmask 1039360   ;;  %vm1883_vm8 = vcmask 908288   ;;  %vm2052_vm9 = vcmask 900096  }
  0x1d   : > { %s12814_s1 = scalar_lea.vmem %s14712_s27, %s12567_s30  ;;  %v861_v1 = vld [vmem:[%s12807_s0 + $0x8] sm:$0xff]  ;;  %v860_v2 = vld [vmem:[%s12807_s0] sm:$0xff]  ;;  %s12636_s8 = smov 111   ;;  %12614 = vset.pattern.permute.xlu1 %v12637_v10  ;;  %vm2221_vm10 = vcmask 891904   ;;  %vm2411_vm14 = vcmask 556032  }
  0x1e   : > { %873 = vrot.lane.b32.xlu0 %v861_v1, %s12630_s6  ;;  %869 = vrot.lane.b32.xlu1 %v860_v2, %s12630_s6  ;;  %839 = vst [vmem:[%s12814_s1 + $0xa0] sm:$0xff] %v12629_v0  ;;  %840 = vst [vmem:[%s12814_s1 + $0xa8] sm:$0xff] %v12629_v0  ;;  %v867_v3 = vcombine.high %v860_v2, %v860_v2  ;;  %v868_v4 = vcombine.high %v861_v1, %v861_v1  ;;  %s14670_s30 = smov 110   ;;  %s14714_s28 = sld [smem:[#allocation4_spill]] }
  0x1f   : > { %841 = vst [vmem:[%s12814_s1 + $0xb0] sm:$0xff] %v12629_v0  ;;  %842 = vst [vmem:[%s12814_s1 + $0xb8] sm:$0xff] %v12629_v0  ;;  %v12907_v5 = vld [vmem:[%s12807_s0 + $0x4] sm:$0xff]  ;;  %v1702_v7 = vld [vmem:[%s12807_s0 + $0xc] sm:$0xf]  ;;  %s14724_s27 = smov 10  }
  0x20   : > { %843 = vst [vmem:[%s12814_s1 + $0xc0] sm:$0xff] %v12629_v0  ;;  %844 = vst [vmem:[%s12814_s1 + $0xc8] sm:$0xff] %v12629_v0  ;;  %v12913_v6 = vcombine.high %v12907_v5, %v12907_v5  ;;  %v1871_v8 = vld [vmem:[%s12807_s0 + $0xc] sm:$0xf]  ;;  %v2377_v12 = vld [vmem:[%s14713_s10] sm:$0xff]  ;;  %s14716_s10 = sld [smem:[#allocation7_spill]] }
  0x21   : > { %845 = vst [vmem:[%s12814_s1 + $0xd0] sm:$0xff] %v12629_v0  ;;  %846 = vst [vmem:[%s12814_s1 + $0xd8] sm:$0xff] %v12629_v0  ;;  %v2040_v9 = vld [vmem:[%s12807_s0 + $0xc] sm:$0xf]  ;;  %s14732_s13 = sld [smem:[#allocation15_spill]] }
  0x22   : > { %847 = vst [vmem:[%s12814_s1 + $0xe0] sm:$0xff] %v12629_v0  ;;  %848 = vst [vmem:[%s12814_s1 + $0xe8] sm:$0xff] %v12629_v0  ;;  %1037 = vrot.lane.b32.xlu0 %v861_v1, %s12631_s11  ;;  %1033 = vrot.lane.b32.xlu1 %v860_v2, %s12631_s11 }
  0x23   : > { %819 = vst [vmem:[%s12814_s1] sm:$0xff] %v12629_v0  ;;  %822 = vst [vmem:[%s12814_s1 + $0x18] sm:$0xff] %v12629_v0  ;;  %v2209_v11 = vld [vmem:[%s12807_s0 + $0xc] sm:$0xf] }
  0x24   : > { %825 = vst [vmem:[%s12814_s1 + $0x30] sm:$0xff] %v12629_v0  ;;  %826 = vst [vmem:[%s12814_s1 + $0x38] sm:$0xff] %v12629_v0  ;;  %v11259_v21 = vld [vmem:[%s14714_s28 + $0x8] sm:$0xff]  ;;  %v862_v27 = vld [vmem:[%s14714_s28] sm:$0xff] }
  0x25   : > { %827 = vst [vmem:[%s12814_s1 + $0x40] sm:$0xff] %v12629_v0  ;;  %828 = vst [vmem:[%s12814_s1 + $0x48] sm:$0xff] %v12629_v0  ;;  %v11270_v32 = vld [vmem:[%s14714_s28 + $0x10] sm:$0xff]  ;;  %v11276_v40 = vld [vmem:[%s14714_s28 + $0x18] sm:$0xff] }
  0x26   : > { %829 = vst [vmem:[%s12814_s1 + $0x50] sm:$0xff] %v12629_v0  ;;  %830 = vst [vmem:[%s12814_s1 + $0x58] sm:$0xff] %v12629_v0  ;;  %1035 = vrot.lane.b32.xlu1 %v867_v3, %s12631_s11  ;;  %871 = vrot.lane.b32.xlu0 %v867_v3, %s12630_s6 }
  0x27   : > { %831 = vst [vmem:[%s12814_s1 + $0x60] sm:$0xff] %v12629_v0  ;;  %832 = vst [vmem:[%s12814_s1 + $0x68] sm:$0xff] %v12629_v0  ;;  %v11282_v44 = vld [vmem:[%s14714_s28 + $0x20] sm:$0xff]  ;;  %v1542_v49 = vld [vmem:[%s12807_s0 + $0xc] sm:$0xf]  ;;  %s14715_s0 = sld [smem:[#allocation3_spill]] }
  0x28   : > { %833 = vst [vmem:[%s12814_s1 + $0x70] sm:$0xff] %v12629_v0  ;;  %834 = vst [vmem:[%s12814_s1 + $0x78] sm:$0xff] %v12629_v0  ;;  %v11288_v52 = vld [vmem:[%s14714_s28 + $0x28] sm:$0xff]  ;;  %v11294_v58 = vld [vmem:[%s14714_s28 + $0x30] sm:$0xff] }
  0x29   : > { %835 = vst [vmem:[%s12814_s1 + $0x80] sm:$0xff] %v12629_v0  ;;  %836 = vst [vmem:[%s12814_s1 + $0x88] sm:$0xff] %v12629_v0 }
  0x2a   : > { %837 = vst [vmem:[%s12814_s1 + $0x90] sm:$0xff] %v12629_v0  ;;  %838 = vst [vmem:[%s12814_s1 + $0x98] sm:$0xff] %v12629_v0  ;;  %1205 = vrot.lane.b32.xlu1 %v867_v3, %s12633_s2  ;;  %875 = vrot.lane.b32.xlu0 %v868_v4, %s12630_s6 }
  0x2b   : > { %849 = vst [vmem:[%s12814_s1 + $0xf0] sm:$0xff] %v12629_v0  ;;  %850 = vst [vmem:[%s12814_s1 + $0xf8] sm:$0xff] %v12629_v0 }
  0x2c   : > { %851 = vst [vmem:[%s12814_s1 + $0x100] sm:$0xff] %v12629_v0  ;;  %852 = vst [vmem:[%s12814_s1 + $0x108] sm:$0xff] %v12629_v0 }
  0x2d   : > { %853 = vst [vmem:[%s12814_s1 + $0x110] sm:$0xff] %v12629_v0  ;;  %854 = vst [vmem:[%s12814_s1 + $0x118] sm:$0xff] %v12629_v0 }
  0x2e   : > { %855 = vst [vmem:[%s12814_s1 + $0x120] sm:$0xff] %v12629_v0  ;;  %856 = vst [vmem:[%s12814_s1 + $0x128] sm:$0xff] %v12629_v0  ;;  %1203 = vrot.lane.b32.xlu1 %v860_v2, %s12633_s2  ;;  %1207 = vrot.lane.b32.xlu0 %v861_v1, %s12633_s2 }
  0x2f   : > { %857 = vst [vmem:[%s12814_s1 + $0x130] sm:$0xff] %v12629_v0  ;;  %858 = vst [vmem:[%s12814_s1 + $0x138] sm:$0xff] %v12629_v0 }
  0x32   : > { %1378 = vrot.lane.b32.xlu1 %v867_v3, %s14668_s3  ;;  %1039 = vrot.lane.b32.xlu0 %v868_v4, %s12631_s11 }
  0x36   : > { %1376 = vrot.lane.b32.xlu1 %v860_v2, %s14668_s3  ;;  %1380 = vrot.lane.b32.xlu0 %v861_v1, %s14668_s3  ;;  %v11300_v1 = vld [vmem:[%s14714_s28 + $0x38] sm:$0xff] }
  0x3a   : > { %1382 = vrot.lane.b32.xlu1 %v868_v4, %s14668_s3  ;;  %1209 = vrot.lane.b32.xlu0 %v868_v4, %s12633_s2 }
  0x3e   : > { %1710 = vrot.lane.b32.xlu0 %v12913_v6, %s14672_s4  ;;  %1712 = vrot.lane.b32.xlu1 %v1702_v7, %s14672_s4 }
  0x42   : > { %1708 = vrot.lane.b32.xlu0 %v12907_v5, %s14672_s4  ;;  %1879 = vrot.lane.b32.xlu1 %v12913_v6, %s12636_s8 }
  0x46   : > { %1881 = vrot.lane.b32.xlu0 %v1871_v8, %s12636_s8  ;;  %1877 = vrot.lane.b32.xlu1 %v12907_v5, %s12636_s8 }
  0x4a   : > { %2048 = vrot.lane.b32.xlu0 %v12913_v6, %s14670_s30  ;;  %2050 = vrot.lane.b32.xlu1 %v2040_v9, %s14670_s30 }
  0x4e   : > { %2046 = vrot.lane.b32.xlu0 %v12907_v5, %s14670_s30  ;;  %2217 = vrot.lane.b32.xlu1 %v12913_v6, %s12639_s9 }
  0x52   : > { %2219 = vrot.lane.b32.xlu0 %v2209_v11, %s12639_s9  ;;  %2215 = vrot.lane.b32.xlu1 %v12907_v5, %s12639_s9 }
  0x56   : > { %2380 = vperm.xlu0 %12603, %v2377_v12  }
  0x5a   : > { %2424 = vrot.lane.b32.xlu0 %v12629_v0, %s12630_s6 }
  0x5e   : > { %2583 = vrot.lane.b32.xlu0 %v12629_v0, %s12631_s11 }
  0x62   : > { %2743 = vrot.lane.b32.xlu0 %v12629_v0, %s12633_s2 }
  0x66   : > { %2906 = vrot.lane.b32.xlu0 %v12629_v0, %s14668_s3 }
  0x90   : > { %v874_v13 = vpop.permute.xlu0 %873  ;;  %v870_v14 = vpop.permute.xlu1 %869 }
  0x94   : > { %v1038_v15 = vpop.permute.xlu0 %1037  ;;  %v1034_v16 = vpop.permute.xlu1 %1033 }
  0x98   : > { %v1036_v17 = vpop.permute.xlu1 %1035  ;;  %v872_v18 = vpop.permute.xlu0 %871 }
  0x99   : > { %v879_v19 = vsel %vm877_vm1, %v872_v18, %v874_v13  ;;  %v878_v20 = vsel %vm877_vm1, %v870_v14, %v872_v18  ;;  %v1043_v22 = vsel %vm1041_vm3, %v1036_v17, %v1038_v15  ;;  %v1042_v23 = vsel %vm1041_vm3, %v1034_v16, %v1036_v17 }
  0x9a   : > { %11260 = vmatprep.subr.msk.mxu0 %vm885_vm2, %v879_v19 }
  0x9b   : > { %11261 = vmatpush1.msk.msra.mxu0 %vm885_vm2, %v878_v20 }
  0x9c   : > { %v1206_v24 = vpop.permute.xlu1 %1205  ;;  %11265 = vmatprep.subr.msk.mxu0 %vm885_vm2, %v1043_v22  ;;  %v876_v25 = vpop.permute.xlu0 %875  ;;  %11262 = vmatmul.mubr.msk.f32.vlgmr.msra.gmra.mxu0 %vm881_vm4, %v11259_v21 }
  0x9d   : > { %11266 = vmatpush1.msk.msra.mxu0 %vm885_vm2, %v1042_v23  ;;  %v880_v26 = vsel %vm877_vm1, %v874_v13, %v876_v25  ;;  %1118 = vmatprep.mubr.f32.mxu0 %v12629_v0 }
  0x9e   : > { %11947 = vmatpush3.msk.msra.mxu1 %vm885_vm2, %v880_v26 }
  0x9f   : > { %11949 = vmatmul.mubr.msk.f32.vlgmr.msra.gmra.mxu1 %vm881_vm4, %v11259_v21  ;;  %11951 = vmatprep.subr.mxu1 %v12629_v0 }
  0xa0   : > { %v1204_v28 = vpop.permute.xlu1 %1203  ;;  %v1208_v29 = vpop.permute.xlu0 %1207  ;;  %11267 = vmatmul.mubr.msk.f32.vlgmr.msra.gmra.mxu0 %vm881_vm4, %v862_v27  ;;  %11953 = vmatprep.mubr.msk.f32.mxu1 %vm12632_vm0, %v12629_v0 }
  0xa1   : > { %v1212_v30 = vsel %vm1211_vm5, %v1204_v28, %v1206_v24  ;;  %v1213_v31 = vsel %vm1211_vm5, %v1206_v24, %v1208_v29  ;;  %1288 = vmatprep.mubr.f32.mxu0 %v12629_v0 }
  0xa2   : > { %11271 = vmatprep.subr.msk.mxu0 %vm885_vm2, %v1213_v31 }
  0xa3   : > { %11272 = vmatpush1.msk.msra.mxu0 %vm885_vm2, %v1212_v30 }
  0xa4   : > { %v1379_v33 = vpop.permute.xlu1 %1378  ;;  %v1040_v34 = vpop.permute.xlu0 %1039  ;;  %11273 = vmatmul.mubr.msk.f32.vlgmr.msra.gmra.mxu0 %vm881_vm4, %v11270_v32 }
  0xa5   : > { %v1044_v35 = vsel %vm1041_vm3, %v1038_v15, %v1040_v34  ;;  %1461 = vmatprep.mubr.f32.mxu0 %v12629_v0 }
  0xa6   : > { %11952 = vmatpush3.msk.msra.mxu1 %vm885_vm2, %v1044_v35 }
  0xa7   : > { %11954 = vmatmul.mubr.msk.f32.vlgmr.msra.gmra.mxu1 %vm881_vm4, %v862_v27  ;;  %11956 = vmatprep.subr.mxu1 %v12629_v0 }
  0xa8   : > { %v1377_v36 = vpop.permute.xlu1 %1376  ;;  %v1381_v37 = vpop.permute.xlu0 %1380  ;;  %11958 = vmatprep.mubr.msk.f32.mxu1 %vm12632_vm0, %v12629_v0 }
  0xa9   : > { %v1385_v38 = vsel %vm1384_vm6, %v1377_v36, %v1379_v33  ;;  %v1386_v39 = vsel %vm1384_vm6, %v1379_v33, %v1381_v37 }
  0xaa   : > { %11277 = vmatprep.subr.msk.mxu0 %vm885_vm2, %v1386_v39  ;;  %v2391_v39 = vlaneseq }
  0xab   : > { %11278 = vmatpush1.msk.msra.mxu0 %vm885_vm2, %v1385_v38 }
  0xac   : > { %v1383_v41 = vpop.permute.xlu1 %1382  ;;  %v1210_v42 = vpop.permute.xlu0 %1209  ;;  %11283 = vmatprep.subr.msk.mxu0 %vm885_vm2, %v12913_v6  ;;  %11279 = vmatmul.mubr.msk.f32.vlgmr.msra.gmra.mxu0 %vm881_vm4, %v11276_v40 }
  0xad   : > { %v1214_v43 = vsel %vm1211_vm5, %v1208_v29, %v1210_v42  ;;  %11284 = vmatpush1.msk.msra.mxu0 %vm885_vm2, %v12907_v5  ;;  %1621 = vmatprep.mubr.f32.mxu0 %v12629_v0  ;;  %v1387_v45 = vsel %vm1384_vm6, %v1381_v37, %v1383_v41  ;;  %v11306_v5 = vld [vmem:[%s14714_s28 + $0x40] sm:$0xff]  ;;  %s14687_s28 = smov 121  }
  0xae   : > { %11957 = vmatpush3.msk.msra.mxu1 %vm885_vm2, %v1214_v43 }
  0xaf   : > { %11959 = vmatmul.mubr.msk.f32.vlgmr.msra.gmra.mxu1 %vm881_vm4, %v11270_v32  ;;  %11961 = vmatprep.subr.mxu1 %v12629_v0 }
  0xb0   : > { %11962 = vmatpush3.msk.msra.mxu1 %vm885_vm2, %v1387_v45  ;;  %v1711_v46 = vpop.permute.xlu0 %1710  ;;  %v1713_v47 = vpop.permute.xlu1 %1712  ;;  %11963 = vmatprep.mubr.msk.f32.mxu1 %vm12632_vm0, %v12629_v0 }
  0xb1   : > { %v1716_v48 = vsel %vm1714_vm7, %v1711_v46, %v1713_v47  ;;  %11966 = vmatprep.subr.mxu1 %v12629_v0  ;;  %11285 = vmatmul.mubr.msk.f32.vlgmr.msra.gmra.mxu0 %vm881_vm4, %v11282_v44 }
  0xb2   : > { %11289 = vmatprep.subr.msk.mxu0 %vm885_vm2, %v1716_v48  ;;  %1790 = vmatprep.mubr.f32.mxu0 %v12629_v0  ;;  %v2392_v48 = vshrl.u32 %v2391_v39, 7 }
  0xb3   : > { %11964 = vmatmul.mubr.msk.f32.vlgmr.msra.gmra.mxu1 %vm881_vm4, %v11276_v40 }
  0xb4   : > { %v1709_v50 = vpop.permute.xlu0 %1708  ;;  %v1880_v51 = vpop.permute.xlu1 %1879  ;;  %11967 = vmatpush3.msk.msra.mxu1 %vm885_vm2, %v1542_v49  ;;  %11968 = vmatprep.mubr.msk.f32.mxu1 %vm12632_vm0, %v12629_v0 }
  0xb5   : > { %v1715_v53 = vsel %vm1714_vm7, %v1709_v50, %v1711_v46  ;;  %11971 = vmatprep.subr.mxu1 %v12629_v0  ;;  %v859_v46 = vld [vmem:[%s14715_s0] ss:$8 sm:$0x7] }
  0xb6   : > { %11290 = vmatpush1.msk.msra.mxu0 %vm885_vm2, %v1715_v53  ;;  %vm2389_vm11 = vcmp.gt.f32.partialorder %v859_v46, 0.0 }
  0xb7   : > { %11969 = vmatmul.mubr.msk.f32.vlgmr.msra.gmra.mxu1 %vm881_vm4, %v11282_v44  ;;  %11291 = vmatmul.mubr.msk.f32.vlgmr.msra.gmra.mxu0 %vm881_vm4, %v11288_v52 }
  0xb8   : > { %11972 = vmatpush3.msk.msra.mxu1 %vm885_vm2, %v1713_v47  ;;  %v1882_v54 = vpop.permute.xlu0 %1881  ;;  %v1878_v55 = vpop.permute.xlu1 %1877  ;;  %11973 = vmatprep.mubr.msk.f32.mxu1 %vm12632_vm0, %v12629_v0 }
  0xb9   : > { %v1884_v56 = vsel %vm1883_vm8, %v1878_v55, %v1880_v51  ;;  %v1885_v57 = vsel %vm1883_vm8, %v1880_v51, %v1882_v54  ;;  %11976 = vmatprep.subr.mxu1 %v12629_v0  ;;  %1959 = vmatprep.mubr.f32.mxu0 %v12629_v0 }
  0xba   : > { %11295 = vmatprep.subr.msk.mxu0 %vm885_vm2, %v1885_v57 }
  0xbb   : > { %11974 = vmatmul.mubr.msk.f32.vlgmr.msra.gmra.mxu1 %vm881_vm4, %v11288_v52  ;;  %11296 = vmatpush1.msk.msra.mxu0 %vm885_vm2, %v1884_v56  ;;  %v2401_v56 = vsub.s32 2, %v2392_v48 }
  0xbc   : > { %11977 = vmatpush3.msk.msra.mxu1 %vm885_vm2, %v1882_v54  ;;  %v2049_v59 = vpop.permute.xlu0 %2048  ;;  %v2051_v60 = vpop.permute.xlu1 %2050  ;;  %11978 = vmatprep.mubr.msk.f32.mxu1 %vm12632_vm0, %v12629_v0 }
  0xbd   : > { %11297 = vmatmul.mubr.msk.f32.vlgmr.msra.gmra.mxu0 %vm881_vm4, %v11294_v58  ;;  %v2054_v61 = vsel %vm2052_vm9, %v2049_v59, %v2051_v60  ;;  %11981 = vmatprep.subr.mxu1 %v12629_v0 }
  0xbe   : > { %11301 = vmatprep.subr.msk.mxu0 %vm885_vm2, %v2054_v61  ;;  %2128 = vmatprep.mubr.f32.mxu0 %v12629_v0  ;;  %v2390_v61 = vsel %vm2389_vm11, 1, %v12637_v10  ;;  %vm2438_vm11 = vcmask 64512  }
  0xbf   : > { %11979 = vmatmul.mubr.msk.f32.vlgmr.msra.gmra.mxu1 %vm881_vm4, %v11294_v58 }
  0xc0   : > { %v2047_v62 = vpop.permute.xlu0 %2046  ;;  %v2218_v63 = vpop.permute.xlu1 %2217  ;;  %11982 = vmatpush3.msk.msra.mxu1 %vm885_vm2, %v2051_v60  ;;  %11983 = vmatprep.mubr.msk.f32.mxu1 %vm12632_vm0, %v12629_v0  ;;  %v2393_v60 = vsub.s32 0, %v2392_v48 }
  0xc1   : > { %v2053_v2 = vsel %vm2052_vm9, %v2047_v62, %v2049_v59  ;;  %11986 = vmatprep.subr.mxu1 %v12629_v0 }
  0xc2   : > { %11302 = vmatpush1.msk.msra.mxu0 %vm885_vm2, %v2053_v2 }
  0xc3   : > { %11303 = vmatmul.mubr.msk.f32.vlgmr.msra.gmra.mxu0 %vm881_vm4, %v11300_v1  ;;  %11984 = vmatmul.mubr.msk.f32.vlgmr.msra.gmra.mxu1 %vm881_vm4, %v11300_v1 }
  0xc4   : > { %v2220_v3 = vpop.permute.xlu0 %2219  ;;  %v2216_v4 = vpop.permute.xlu1 %2215  ;;  %11988 = vmatprep.mubr.msk.f32.mxu1 %vm12632_vm0, %v12629_v0  ;;  %2297 = vmatprep.mubr.f32.mxu0 %v12629_v0 }
  0xc5   : > { %v2222_v6 = vsel %vm2221_vm10, %v2216_v4, %v2218_v63  ;;  %v2223_v7 = vsel %vm2221_vm10, %v2218_v63, %v2220_v3  ;;  %11987 = vmatpush3.msk.msra.mxu1 %vm885_vm2, %v2220_v3  ;;  %v2397_v3 = vsub.s32 1, %v2392_v48 }
  0xc6   : > { %11307 = vmatprep.subr.msk.mxu0 %vm885_vm2, %v2223_v7  ;;  %11991 = vmatprep.subr.mxu1 %v12629_v0 }
  0xc7   : > { %11308 = vmatpush1.msk.msra.mxu0 %vm885_vm2, %v2222_v6  ;;  %11989 = vmatmul.mubr.msk.f32.vlgmr.msra.gmra.mxu1 %vm881_vm4, %v11306_v5 }
  0xc8   : > { %11309 = vmatmul.mubr.msk.f32.vlgmr.msra.gmra.mxu0 %vm881_vm4, %v11306_v5  ;;  %11993 = vmatprep.mubr.msk.f32.mxu1 %vm12632_vm0, %v12629_v0  ;;  %v13087_v5 = vrot.slane %v2390_v61, %v2401_v56 }
  0xc9   : > { %2506 = vmatprep.mubr.f32.mxu0 %v12629_v0 }
  0xca   : > { %vm2405_vm12 = vcmp.eq.s32.totalorder %v13087_v5, 1 }
 0x15c   : > { %v958_v8 = vpop.f32.mrf.mxu0 }
 0x15e   : > { %v960_v9 = vpop.f32.mrf.mxu0 }
 0x15f   : > { %v1029_v11 = vpop.f32.mrf.mxu1 }
 0x160   : > { %v1120_v12 = vpop.f32.mrf.mxu0 }
 0x161   : > { %v11950_v13 = vpop.f32.mrf.mxu1  ;;  %v1121_v20 = vadd.f32 %v1120_v12, %v958_v8  ;;  %v2381_v8 = vpop.permute.xlu0 %2380 }
 0x162   : > { %v1122_v14 = vpop.f32.mrf.mxu0 }
 0x163   : > { %v1123_v22 = vadd.f32 %v1122_v14, %v960_v9  ;;  %v13089_v9 = vrot.slane %v2390_v61, %v2393_v60 }
 0x164   : > { %v1290_v15 = vpop.f32.mrf.mxu0 }
 0x165   : > { %v1365_v24 = vadd.f32 %v1290_v15, %v1121_v20  ;;  %v13091_v15 = vrot.slane %v2390_v61, %v2397_v3  ;;  %vm2403_vm13 = vcmp.eq.s32.totalorder %v13089_v9, 1 }
 0x166   : > { %v1292_v17 = vpop.f32.mrf.mxu0 }
 0x167   : > { %v1191_v16 = vpop.f32.mrf.mxu1  ;;  %v1366_v27 = vadd.f32 %v1292_v17, %v1123_v22  ;;  %vm2404_vm15 = vcmp.eq.s32.totalorder %v13091_v15, 1 }
 0x168   : > { %v1192_v38 = vadd.f32 %v1191_v16, %v1029_v11 }
 0x169   : > { %v11955_v18 = vpop.f32.mrf.mxu1 }
 0x16c   : > { %v1463_v19 = vpop.f32.mrf.mxu0 }
 0x16d   : > { %v1538_v30 = vadd.f32 %v1463_v19, %v1365_v24 }
 0x16e   : > { %v1465_v21 = vpop.f32.mrf.mxu0 }
 0x16f   : > { %v1361_v23 = vpop.f32.mrf.mxu1  ;;  %v1539_v32 = vadd.f32 %v1465_v21, %v1366_v27  ;;  %v3856_v27 = vld [vmem:[%s14716_s10] sm:$0xff]  ;;  %s14718_s10 = sld [smem:[#allocation8_spill]] }
 0x170   : > { %v1367_v42 = vadd.f32 %v1361_v23, %v1192_v38 }
 0x171   : > { %v11960_v25 = vpop.f32.mrf.mxu1  ;;  %v1623_v26 = vpop.f32.mrf.mxu0 }
 0x172   : > { %v1698_v35 = vadd.f32 %v1623_v26, %v1538_v30 }
 0x173   : > { %v1534_v28 = vpop.f32.mrf.mxu1  ;;  %v1625_v29 = vpop.f32.mrf.mxu0 }
 0x174   : > { %v1699_v40 = vadd.f32 %v1625_v29, %v1539_v32  ;;  %v1540_v47 = vadd.f32 %v1534_v28, %v1367_v42  ;;  %v2425_v28 = vpop.permute.xlu0 %2424 }
 0x175   : > { %v11965_v31 = vpop.f32.mrf.mxu1  ;;  %v3951_v9 = vld [vmem:[%s14718_s10 + $0x140] sm:$0xf]  ;;  %v3942_v15 = vld [vmem:[%s14718_s10 + $0xf8] sm:$0xff] }
 0x177   : > { %v1694_v33 = vpop.f32.mrf.mxu1  ;;  %v1792_v34 = vpop.f32.mrf.mxu0 }
 0x178   : > { %v1867_v43 = vadd.f32 %v1792_v34, %v1698_v35  ;;  %v1700_v52 = vadd.f32 %v1694_v33, %v1540_v47  ;;  %v2584_v29 = vpop.permute.xlu0 %2583 }
 0x179   : > { %v11970_v36 = vpop.f32.mrf.mxu1  ;;  %v1794_v37 = vpop.f32.mrf.mxu0 }
 0x17a   : > { %v1868_v49 = vadd.f32 %v1794_v37, %v1699_v40 }
 0x17b   : > { %v1863_v41 = vpop.f32.mrf.mxu1 }
 0x17c   : > { %v1869_v55 = vadd.f32 %v1863_v41, %v1700_v52  ;;  %v2744_v30 = vpop.permute.xlu0 %2743 }
 0x17d   : > { %v11975_v44 = vpop.f32.mrf.mxu1  ;;  %v1961_v45 = vpop.f32.mrf.mxu0 }
 0x17e   : > { %v2036_v53 = vadd.f32 %v1961_v45, %v1867_v43 }
 0x17f   : > { %v2032_v50 = vpop.f32.mrf.mxu1  ;;  %v1963_v51 = vpop.f32.mrf.mxu0 }
 0x180   : > { %v2037_v57 = vadd.f32 %v1963_v51, %v1868_v49  ;;  %v2038_v62 = vadd.f32 %v2032_v50, %v1869_v55  ;;  %v2907_v31 = vpop.permute.xlu0 %2906 }
 0x181   : > { %v11980_v54 = vpop.f32.mrf.mxu1 }
 0x183   : > { %v2130_v58 = vpop.f32.mrf.mxu0  ;;  %v2201_v59 = vpop.f32.mrf.mxu1 }
 0x184   : > { %v2205_v63 = vadd.f32 %v2130_v58, %v2036_v53  ;;  %v2207_v4 = vadd.f32 %v2201_v59, %v2038_v62 }
 0x185   : > { %v2132_v1 = vpop.f32.mrf.mxu0  ;;  %v11985_v2 = vpop.f32.mrf.mxu1 }
 0x186   : > { %v2206_v6 = vadd.f32 %v2132_v1, %v2037_v57 }
 0x187   : > { %v2370_v7 = vpop.f32.mrf.mxu1 }
 0x188   : > { %v2376_v11 = vadd.f32 %v2370_v7, %v2207_v4  ;;  %v2299_v12 = vpop.f32.mrf.mxu0 }
 0x189   : > { %v2374_v13 = vadd.f32 %v2299_v12, %v2205_v63  ;;  %v11990_v14 = vpop.f32.mrf.mxu1 }
 0x18a   : > { %v2385_v10 = vadd.f32 %v2381_v8, %v2376_v11  ;;  %v2301_v16 = vpop.f32.mrf.mxu0 }
 0x18b   : > { %v13094_v17 = vadd.f32 %v2381_v8, %v2374_v13  ;;  %v2375_v18 = vadd.f32 %v2301_v16, %v2206_v6 }
 0x18c   : > { %v2388_v19 = vmax.f32 %v2385_v10, 0.0 }
 0x18d   : > { %v2386_v20 = vmax.f32 %v13094_v17, 0.0  ;;  %v13098_v21 = vadd.f32 %v2381_v8, %v2375_v18 }
 0x18e   : > { %v2408_v22 = vsel %vm2405_vm12, %v2388_v19, 0.0 }
 0x18f   : > { %v2406_v23 = vsel %vm2403_vm13, %v2386_v20, 0.0  ;;  %2412 = vst.msk [vmem:[%s12814_s1 + $0x18] sm:$0xff] %vm2411_vm14, %v2408_v22  ;;  %v2387_v24 = vmax.f32 %v13098_v21, 0.0 }
 0x190   : > { %2409 = vst [vmem:[%s12814_s1 + $0x8] sm:$0xff] %v2406_v23  ;;  %2585 = vrot.lane.b32.xlu0 %v2406_v23, %s12631_s11 }
 0x191   : > { %v2407_v25 = vsel %vm2404_vm15, %v2387_v24, 0.0 }
 0x192   : > { %2410 = vst [vmem:[%s12814_s1 + $0x10] sm:$0xff] %v2407_v25 }
 0x194   : > { %2745 = vrot.lane.b32.xlu0 %v2406_v23, %s12633_s2 }
 0x196   : > { %v13119_v26 = vld [vmem:[%s12814_s1 + $0x18] sm:$0xff] }
 0x197   : > { %2430 = vrot.lane.b32.xlu1 %v13119_v26, %s12630_s6 }
 0x198   : > { %2908 = vrot.lane.b32.xlu0 %v2406_v23, %s14668_s3 }
 0x19b   : > { %2589 = vrot.lane.b32.xlu1 %v13119_v26, %s12631_s11 }
 0x19c   : > { %3218 = vrot.lane.b32.xlu0 %v2406_v23, %s14672_s4 }
 0x19f   : > { %2749 = vrot.lane.b32.xlu1 %v13119_v26, %s12633_s2 }
 0x1a0   : > { %3382 = vrot.lane.b32.xlu0 %v13119_v26, %s12636_s8 }
 0x1a3   : > { %2912 = vrot.lane.b32.xlu1 %v13119_v26, %s14668_s3 }
 0x1a4   : > { %3220 = vrot.lane.b32.xlu0 %v2407_v25, %s14672_s4 }
 0x1a7   : > { %2426 = vrot.lane.b32.xlu1 %v2406_v23, %s12630_s6 }
 0x1a8   : > { %3538 = vrot.lane.b32.xlu0 %v2406_v23, %s14670_s30 }
 0x1ab   : > { %2428 = vrot.lane.b32.xlu1 %v2407_v25, %s12630_s6  ;;  %s14719_s6 = smov 110  }
 0x1ac   : > { %3540 = vrot.lane.b32.xlu0 %v2407_v25, %s14670_s30 }
 0x1af   : > { %2587 = vrot.lane.b32.xlu1 %v2407_v25, %s12631_s11  ;;  %s14675_s11 = smov 10  }
 0x1b0   : > { %3702 = vrot.lane.b32.xlu0 %v13119_v26, %s12639_s9 }
 0x1b3   : > { %2747 = vrot.lane.b32.xlu1 %v2407_v25, %s12633_s2  ;;  %s14717_s2 = sld [smem:[#allocation6_spill]] }
 0x1b4   : > { %3859 = vperm.xlu0 %12603, %v3856_v27  }
 0x1b7   : > { %2910 = vrot.lane.b32.xlu1 %v2407_v25, %s14668_s3  ;;  %s12642_s3 = smov 9  }
 0x1b9   : > { %v11312_v41 = vld [vmem:[%s14717_s2 + $0x8] sm:$0xff]  ;;  %v2417_v47 = vld [vmem:[%s14717_s2] sm:$0xff]  ;;  %v11317_v53 = vld [vmem:[%s14717_s2 + $0x10] sm:$0xff] }
 0x1ba   : > { %v11320_v58 = vld [vmem:[%s14717_s2 + $0x18] sm:$0xff]  ;;  %v11323_v2 = vld [vmem:[%s14717_s2 + $0x20] sm:$0xff]  ;;  %v11326_v7 = vld [vmem:[%s14717_s2 + $0x28] sm:$0xff] }
 0x1bb   : > { %3222 = vrot.lane.b32.xlu1 %v13119_v26, %s14672_s4  ;;  %v11329_v13 = vld [vmem:[%s14717_s2 + $0x30] sm:$0xff]  ;;  %v11332_v17 = vld [vmem:[%s14717_s2 + $0x38] sm:$0xff]  ;;  %v11335_v22 = vld [vmem:[%s14717_s2 + $0x40] sm:$0xff]  ;;  %s12645_s2 = smov 117  }
 0x1bf   : > { %3378 = vrot.lane.b32.xlu1 %v2406_v23, %s12636_s8 }
 0x1c3   : > { %3380 = vrot.lane.b32.xlu1 %v2407_v25, %s12636_s8  ;;  %s12641_s8 = smov 11  }
 0x1c7   : > { %3542 = vrot.lane.b32.xlu1 %v13119_v26, %s14670_s30  ;;  %s14721_s30 = smov 127  }
 0x1cb   : > { %3700 = vrot.lane.b32.xlu1 %v2407_v25, %s12639_s9 }
 0x1cf   : > { %3698 = vrot.lane.b32.xlu1 %v2406_v23, %s12639_s9  ;;  %s14726_s9 = sld [smem:[#allocation12_spill]] }
 0x202   : > { %v2586_v33 = vpop.permute.xlu0 %2585 }
 0x203   : > { %v2591_v50 = vsel %vm1041_vm3, %v2584_v29, %v2586_v33 }
 0x206   : > { %v2746_v36 = vpop.permute.xlu0 %2745 }
 0x207   : > { %v2751_v56 = vsel %vm1211_vm5, %v2744_v30, %v2746_v36 }
 0x209   : > { %v2431_v32 = vpop.permute.xlu1 %2430 }
 0x20a   : > { %v2909_v38 = vpop.permute.xlu0 %2908 }
 0x20b   : > { %v2914_v62 = vsel %vm1384_vm6, %v2907_v31, %v2909_v38 }
 0x20d   : > { %v2590_v34 = vpop.permute.xlu1 %2589 }
 0x20e   : > { %v13159_v44 = vpop.permute.xlu0 %3218 }
 0x211   : > { %v2750_v35 = vpop.permute.xlu1 %2749 }
 0x212   : > { %v3383_v51 = vpop.permute.xlu0 %3382 }
 0x215   : > { %v2913_v37 = vpop.permute.xlu1 %2912 }
 0x216   : > { %v3221_v61 = vpop.permute.xlu0 %3220 }
 0x217   : > { %v3224_v6 = vsel %vm1714_vm7, %v13159_v44, %v3221_v61 }
 0x219   : > { %v2427_v39 = vpop.permute.xlu1 %2426 }
 0x21a   : > { %v2432_v45 = vsel %vm877_vm1, %v2425_v28, %v2427_v39  ;;  %v3539_v3 = vpop.permute.xlu0 %3538 }
 0x21d   : > { %v2429_v40 = vpop.permute.xlu1 %2428 }
 0x21e   : > { %v2433_v42 = vsel %vm877_vm1, %v2427_v39, %v2429_v40  ;;  %v2434_v43 = vsel %vm877_vm1, %v2429_v40, %v2431_v32  ;;  %v3541_v14 = vpop.permute.xlu0 %3540  ;;  %vm4098_vm1 = vcmask 818176  }
 0x21f   : > { %2472 = vmatprep.subr.mxu0 %v2433_v42  ;;  %11992 = vmatpush3.msra.mxu1 %v2434_v43  ;;  %v3544_v18 = vsel %vm2052_vm9, %v3539_v3, %v3541_v14 }
 0x220   : > { %2473 = vmatpush1.msra.mxu0 %v2432_v45  ;;  %11994 = vmatmul.mubr.msk.f32.vlgmr.msra.gmra.mxu1 %vm2438_vm11, %v11312_v41 }
 0x221   : > { %v2588_v46 = vpop.permute.xlu1 %2587  ;;  %11313 = vmatmul.mubr.msk.f32.vlgmr.msra.gmra.mxu0 %vm2438_vm11, %v11312_v41  ;;  %11996 = vmatprep.subr.mxu1 %v12629_v0 }
 0x222   : > { %v2592_v48 = vsel %vm1041_vm3, %v2586_v33, %v2588_v46  ;;  %v2593_v49 = vsel %vm1041_vm3, %v2588_v46, %v2590_v34  ;;  %11998 = vmatprep.mubr.msk.f32.mxu1 %vm12632_vm0, %v12629_v0  ;;  %2664 = vmatprep.mubr.f32.mxu0 %v12629_v0  ;;  %v3703_v19 = vpop.permute.xlu0 %3702  ;;  %vm4112_vm3 = vcmask 80896  }
 0x223   : > { %2630 = vmatprep.subr.mxu0 %v2592_v48  ;;  %11997 = vmatpush3.msra.mxu1 %v2593_v49 }
 0x224   : > { %2631 = vmatpush1.msra.mxu0 %v2591_v50  ;;  %11999 = vmatmul.mubr.msk.f32.vlgmr.msra.gmra.mxu1 %vm2438_vm11, %v2417_v47 }
 0x225   : > { %v2748_v52 = vpop.permute.xlu1 %2747  ;;  %11315 = vmatmul.mubr.msk.f32.vlgmr.msra.gmra.mxu0 %vm2438_vm11, %v2417_v47  ;;  %12001 = vmatprep.subr.mxu1 %v12629_v0 }
 0x226   : > { %v2752_v54 = vsel %vm1211_vm5, %v2746_v36, %v2748_v52  ;;  %v2753_v55 = vsel %vm1211_vm5, %v2748_v52, %v2750_v35  ;;  %12003 = vmatprep.mubr.msk.f32.mxu1 %vm12632_vm0, %v12629_v0  ;;  %2824 = vmatprep.mubr.f32.mxu0 %v12629_v0  ;;  %vm4192_vm5 = vcmask 89088  }
 0x227   : > { %2790 = vmatprep.subr.mxu0 %v2752_v54  ;;  %12002 = vmatpush3.msra.mxu1 %v2753_v55 }
 0x228   : > { %2791 = vmatpush1.msra.mxu0 %v2751_v56  ;;  %12004 = vmatmul.mubr.msk.f32.vlgmr.msra.gmra.mxu1 %vm2438_vm11, %v11317_v53 }
 0x229   : > { %v2911_v57 = vpop.permute.xlu1 %2910  ;;  %11318 = vmatmul.mubr.msk.f32.vlgmr.msra.gmra.mxu0 %vm2438_vm11, %v11317_v53  ;;  %12006 = vmatprep.subr.mxu1 %v12629_v0 }
 0x22a   : > { %v2915_v59 = vsel %vm1384_vm6, %v2909_v38, %v2911_v57  ;;  %v2916_v60 = vsel %vm1384_vm6, %v2911_v57, %v2913_v37  ;;  %12008 = vmatprep.mubr.msk.f32.mxu1 %vm12632_vm0, %v12629_v0  ;;  %2987 = vmatprep.mubr.f32.mxu0 %v12629_v0 }
 0x22b   : > { %2953 = vmatprep.subr.mxu0 %v2915_v59  ;;  %12007 = vmatpush3.msra.mxu1 %v2916_v60 }
 0x22c   : > { %2954 = vmatpush1.msra.mxu0 %v2914_v62  ;;  %12009 = vmatmul.mubr.msk.f32.vlgmr.msra.gmra.mxu1 %vm2438_vm11, %v11320_v58 }
 0x22d   : > { %12011 = vmatprep.subr.mxu1 %v12629_v0  ;;  %v3223_v63 = vpop.permute.xlu1 %3222  ;;  %11321 = vmatmul.mubr.msk.f32.vlgmr.msra.gmra.mxu0 %vm2438_vm11, %v11320_v58 }
 0x22e   : > { %12012 = vmatpush3.msra.mxu1 %v13119_v26  ;;  %12619 = vmatprep.subr.msk.mxu0 %vm2404_vm15, %v2387_v24  ;;  %v3225_v1 = vsel %vm1714_vm7, %v3221_v61, %v3223_v63 }
 0x22f   : > { %12620 = vmatpush1.msk.msra.mxu0 %vm2403_vm13, %v2386_v20  ;;  %12013 = vmatprep.mubr.msk.f32.mxu1 %vm12632_vm0, %v12629_v0 }
 0x230   : > { %3262 = vmatprep.subr.mxu0 %v3225_v1  ;;  %12016 = vmatprep.subr.mxu1 %v12629_v0 }
 0x231   : > { %3136 = vmatprep.mubr.f32.mxu0 %v12629_v0  ;;  %12014 = vmatmul.mubr.msk.f32.vlgmr.msra.gmra.mxu1 %vm2438_vm11, %v11323_v2  ;;  %v3379_v4 = vpop.permute.xlu1 %3378 }
 0x232   : > { %12017 = vmatpush3.msra.mxu1 %v3223_v63  ;;  %11324 = vmatmul.mubr.msk.f32.vlgmr.msra.gmra.mxu0 %vm2438_vm11, %v11323_v2 }
 0x233   : > { %3263 = vmatpush1.msra.mxu0 %v3224_v6  ;;  %12018 = vmatprep.mubr.msk.f32.mxu1 %vm12632_vm0, %v12629_v0 }
 0x234   : > { %12021 = vmatprep.subr.mxu1 %v12629_v0  ;;  %3296 = vmatprep.mubr.f32.mxu0 %v12629_v0 }
 0x235   : > { %12019 = vmatmul.mubr.msk.f32.vlgmr.msra.gmra.mxu1 %vm2438_vm11, %v11326_v7  ;;  %v3381_v8 = vpop.permute.xlu1 %3380 }
 0x236   : > { %12022 = vmatpush3.msra.mxu1 %v3383_v51  ;;  %11327 = vmatmul.mubr.msk.f32.vlgmr.msra.gmra.mxu0 %vm2438_vm11, %v11326_v7  ;;  %v3385_v11 = vsel %vm1883_vm8, %v3381_v8, %v3383_v51  ;;  %v3384_v12 = vsel %vm1883_vm8, %v3379_v4, %v3381_v8 }
 0x237   : > { %3422 = vmatprep.subr.mxu0 %v3385_v11  ;;  %12023 = vmatprep.mubr.msk.f32.mxu1 %vm12632_vm0, %v12629_v0 }
 0x238   : > { %3423 = vmatpush1.msra.mxu0 %v3384_v12  ;;  %3456 = vmatprep.mubr.f32.mxu0 %v12629_v0 }
 0x239   : > { %12024 = vmatmul.mubr.msk.f32.vlgmr.msra.gmra.mxu1 %vm2438_vm11, %v11329_v13  ;;  %v3543_v10 = vpop.permute.xlu1 %3542  ;;  %12026 = vmatprep.subr.mxu1 %v12629_v0 }
 0x23a   : > { %11330 = vmatmul.mubr.msk.f32.vlgmr.msra.gmra.mxu0 %vm2438_vm11, %v11329_v13  ;;  %12027 = vmatpush3.msra.mxu1 %v3543_v10  ;;  %v3545_v16 = vsel %vm2052_vm9, %v3541_v14, %v3543_v10 }
 0x23b   : > { %3582 = vmatprep.subr.mxu0 %v3545_v16  ;;  %12028 = vmatprep.mubr.msk.f32.mxu1 %vm12632_vm0, %v12629_v0  ;;  %v3860_v16 = vpop.permute.xlu0 %3859 }
 0x23c   : > { %12031 = vmatprep.subr.mxu1 %v12629_v0  ;;  %3583 = vmatpush1.msra.mxu0 %v3544_v18 }
 0x23d   : > { %3616 = vmatprep.mubr.f32.mxu0 %v12629_v0  ;;  %12029 = vmatmul.mubr.msk.f32.vlgmr.msra.gmra.mxu1 %vm2438_vm11, %v11332_v17  ;;  %v3701_v20 = vpop.permute.xlu1 %3700 }
 0x23e   : > { %12032 = vmatpush3.msra.mxu1 %v3703_v19  ;;  %11333 = vmatmul.mubr.msk.f32.vlgmr.msra.gmra.mxu0 %vm2438_vm11, %v11332_v17  ;;  %v3705_v21 = vsel %vm2221_vm10, %v3701_v20, %v3703_v19 }
 0x23f   : > { %3742 = vmatprep.subr.mxu0 %v3705_v21  ;;  %12033 = vmatprep.mubr.msk.f32.mxu1 %vm12632_vm0, %v12629_v0 }
 0x240   : > { %3776 = vmatprep.mubr.f32.mxu0 %v12629_v0  ;;  %12036 = vmatprep.subr.mxu1 %v12629_v0 }
 0x241   : > { %12034 = vmatmul.mubr.msk.f32.vlgmr.msra.gmra.mxu1 %vm2438_vm11, %v11335_v22  ;;  %v3699_v23 = vpop.permute.xlu1 %3698 }
 0x242   : > { %v3704_v24 = vsel %vm2221_vm10, %v3699_v23, %v3701_v20  ;;  %12054 = vmatprep.mubr.msk.f32.mxu1 %vm12632_vm0, %v12629_v0  ;;  %12037 = vmatpush3.msk.msra.mxu1 %vm885_vm2, %v3951_v9  ;;  %vm5773_vm10 = vcmask 56320  }
 0x243   : > { %3743 = vmatpush1.msra.mxu0 %v3704_v24 }
 0x244   : > { %11336 = vmatmul.mubr.msk.f32.vlgmr.msra.gmra.mxu0 %vm2438_vm11, %v11335_v22  ;;  %11627 = vmatprep.subr.mxu0 %v3942_v15 }
 0x2e0   : > { %v2579_v25 = vpop.f32.mrf.mxu1 }
 0x2e1   : > { %v2508_v26 = vpop.f32.mrf.mxu0 }
 0x2e2   : > { %v11995_v27 = vpop.f32.mrf.mxu1 }
 0x2e3   : > { %v2510_v28 = vpop.f32.mrf.mxu0 }
 0x2e4   : > { %v2737_v29 = vpop.f32.mrf.mxu1 }
 0x2e5   : > { %v2666_v30 = vpop.f32.mrf.mxu0  ;;  %v2738_v43 = vadd.f32 %v2737_v29, %v2579_v25 }
 0x2e6   : > { %v12000_v31 = vpop.f32.mrf.mxu1  ;;  %v2667_v48 = vadd.f32 %v2666_v30, %v2508_v26 }
 0x2e7   : > { %v2668_v32 = vpop.f32.mrf.mxu0 }
 0x2e8   : > { %v2897_v33 = vpop.f32.mrf.mxu1  ;;  %v2669_v52 = vadd.f32 %v2668_v32, %v2510_v28 }
 0x2e9   : > { %v2826_v34 = vpop.f32.mrf.mxu0  ;;  %v2903_v46 = vadd.f32 %v2897_v33, %v2738_v43  ;;  %v3939_v43 = vld [vmem:[%s14718_s10 + $0xe0] sm:$0xff] }
 0x2ea   : > { %v12005_v35 = vpop.f32.mrf.mxu1  ;;  %v2901_v53 = vadd.f32 %v2826_v34, %v2667_v48  ;;  %v3946_v48 = vld [vmem:[%s14718_s10 + $0x118] sm:$0xff] }
 0x2eb   : > { %v2828_v36 = vpop.f32.mrf.mxu0  ;;  %v3950_v35 = vld [vmem:[%s14718_s10 + $0x138] sm:$0xff] }
 0x2ec   : > { %v3060_v37 = vpop.f32.mrf.mxu1  ;;  %v2902_v57 = vadd.f32 %v2828_v36, %v2669_v52  ;;  %v3926_v36 = vld [vmem:[%s14718_s10 + $0x78] sm:$0xff]  ;;  %v3936_v52 = vld [vmem:[%s14718_s10 + $0xc8] sm:$0xff] }
 0x2ed   : > { %v2989_v38 = vpop.f32.mrf.mxu0  ;;  %v3066_v50 = vadd.f32 %v3060_v37, %v2903_v46  ;;  %v3941_v37 = vld [vmem:[%s14718_s10 + $0xf0] sm:$0xff]  ;;  %11628 = vmatpush3.msra.mxu0 %v3926_v36  ;;  %v3938_v46 = vld [vmem:[%s14718_s10 + $0xd8] sm:$0xff] }
 0x2ee   : > { %v12010_v39 = vpop.f32.mrf.mxu1  ;;  %v3064_v58 = vadd.f32 %v2989_v38, %v2901_v53  ;;  %v13307_v38 = vld [vmem:[%s12814_s1 + $0xa0] sm:$0xff]  ;;  %11629 = vmatprep.subr.mxu0 %v3941_v37  ;;  %v3944_v53 = vld [vmem:[%s14718_s10 + $0x108] sm:$0xff] }
 0x2ef   : > { %v2991_v40 = vpop.f32.mrf.mxu0  ;;  %12038 = vmatprep.subr.mxu1 %v13307_v38  ;;  %v3949_v39 = vld [vmem:[%s14718_s10 + $0x130] sm:$0xff]  ;;  %v11347_v37 = vld [vmem:[%s14722_s29 + $0x20] sm:$0xff] }
 0x2f0   : > { %v3065_v62 = vadd.f32 %v2991_v40, %v2902_v57  ;;  %v3925_v40 = vld [vmem:[%s14718_s10 + $0x70] sm:$0xff]  ;;  %12039 = vmatpush3.msra.mxu1 %v3950_v35  ;;  %v3934_v57 = vld [vmem:[%s14718_s10 + $0xb8] sm:$0xff] }
 0x2f1   : > { %v3209_v0 = vpop.f32.mrf.mxu1  ;;  %12040 = vmatprep.subr.mxu1 %v13307_v38  ;;  %11630 = vmatpush3.msra.mxu0 %v3925_v40 }
 0x2f2   : > { %v3138_v41 = vpop.f32.mrf.mxu0  ;;  %v3215_v55 = vadd.f32 %v3209_v0, %v3066_v50  ;;  %v3940_v0 = vld [vmem:[%s14718_s10 + $0xe8] sm:$0xff]  ;;  %12041 = vmatpush3.msra.mxu1 %v3949_v39  ;;  %v3921_v50 = vld [vmem:[%s14718_s10 + $0x50] sm:$0xff] }
 0x2f3   : > { %v12015_v42 = vpop.f32.mrf.mxu1  ;;  %v3213_v63 = vadd.f32 %v3138_v41, %v3064_v58  ;;  %v3924_v41 = vld [vmem:[%s14718_s10 + $0x68] sm:$0xff]  ;;  %11631 = vmatprep.subr.mxu0 %v3940_v0  ;;  %12042 = vmatprep.subr.mxu1 %v13307_v38  ;;  %v3918_v58 = vld [vmem:[%s14718_s10 + $0x38] sm:$0xff] }
 0x2f4   : > { %v3140_v44 = vpop.f32.mrf.mxu0  ;;  %v3948_v42 = vld [vmem:[%s14718_s10 + $0x128] sm:$0xff]  ;;  %11632 = vmatpush3.msra.mxu0 %v3924_v41 }
 0x2f5   : > { %v3369_v45 = vpop.f32.mrf.mxu1  ;;  %v3214_v4 = vadd.f32 %v3140_v44, %v3065_v62  ;;  %v3923_v44 = vld [vmem:[%s14718_s10 + $0x60] sm:$0xff]  ;;  %12043 = vmatpush3.msra.mxu1 %v3948_v42  ;;  %11633 = vmatprep.subr.mxu0 %v3939_v43  ;;  %v11340_v42 = vld [vmem:[%s14722_s29 + $0x8] sm:$0xff] }
 0x2f6   : > { %v3298_v47 = vpop.f32.mrf.mxu0  ;;  %v3375_v60 = vadd.f32 %v3369_v45, %v3215_v55  ;;  %v3947_v45 = vld [vmem:[%s14718_s10 + $0x120] sm:$0xff]  ;;  %12044 = vmatprep.subr.mxu1 %v13307_v38  ;;  %11634 = vmatpush3.msra.mxu0 %v3923_v44 }
 0x2f7   : > { %v12020_v49 = vpop.f32.mrf.mxu1  ;;  %v3373_v6 = vadd.f32 %v3298_v47, %v3213_v63  ;;  %v3922_v47 = vld [vmem:[%s14718_s10 + $0x58] sm:$0xff]  ;;  %12045 = vmatpush3.msra.mxu1 %v3947_v45  ;;  %11635 = vmatprep.subr.mxu0 %v3938_v46  ;;  %v3935_v55 = vld [vmem:[%s14718_s10 + $0xc0] sm:$0xff]  ;;  %v3916_v63 = vld [vmem:[%s14718_s10 + $0x28] sm:$0xff] }
 0x2f8   : > { %v3300_v51 = vpop.f32.mrf.mxu0  ;;  %v3937_v49 = vld [vmem:[%s14718_s10 + $0xd0] sm:$0xff]  ;;  %12046 = vmatprep.subr.mxu1 %v13307_v38  ;;  %11636 = vmatpush3.msra.mxu0 %v3922_v47  ;;  %v3943_v62 = vld [vmem:[%s14718_s10 + $0x100] sm:$0xff] }
 0x2f9   : > { %v3529_v54 = vpop.f32.mrf.mxu1  ;;  %v3374_v11 = vadd.f32 %v3300_v51, %v3214_v4  ;;  %v3945_v51 = vld [vmem:[%s14718_s10 + $0x110] sm:$0xff]  ;;  %12047 = vmatpush3.msra.mxu1 %v3946_v48  ;;  %11637 = vmatprep.subr.mxu0 %v3937_v49  ;;  %v3914_v4 = vld [vmem:[%s14718_s10 + $0x18] sm:$0xff]  ;;  %v4103_v46 = vld [vmem:[%s14722_s29] sm:$0xff] }
 0x2fa   : > { %v3458_v56 = vpop.f32.mrf.mxu0  ;;  %v3535_v2 = vadd.f32 %v3529_v54, %v3375_v60  ;;  %12048 = vmatprep.subr.mxu1 %v13307_v38  ;;  %11638 = vmatpush3.msra.mxu0 %v3921_v50  ;;  %v3920_v54 = vld [vmem:[%s14718_s10 + $0x48] sm:$0xff]  ;;  %v3917_v60 = vld [vmem:[%s14718_s10 + $0x30] sm:$0xff] }
 0x2fb   : > { %v12025_v59 = vpop.f32.mrf.mxu1  ;;  %v3533_v12 = vadd.f32 %v3458_v56, %v3373_v6  ;;  %12049 = vmatpush3.msra.mxu1 %v3945_v51  ;;  %11639 = vmatprep.subr.mxu0 %v3936_v52  ;;  %v3919_v56 = vld [vmem:[%s14718_s10 + $0x40] sm:$0xff]  ;;  %v3929_v6 = vld [vmem:[%s14718_s10 + $0x90] sm:$0xff] }
 0x2fc   : > { %v3460_v61 = vpop.f32.mrf.mxu0  ;;  %12050 = vmatprep.subr.mxu1 %v13307_v38  ;;  %11640 = vmatpush3.msra.mxu0 %v3920_v54  ;;  %v3933_v59 = vld [vmem:[%s14718_s10 + $0xb0] sm:$0xff] }
 0x2fd   : > { %v3689_v1 = vpop.f32.mrf.mxu1  ;;  %v3534_v17 = vadd.f32 %v3460_v61, %v3374_v11  ;;  %12051 = vmatpush3.msra.mxu1 %v3944_v53  ;;  %11641 = vmatprep.subr.mxu0 %v3935_v55  ;;  %v3932_v61 = vld [vmem:[%s14718_s10 + $0xa8] sm:$0xff]  ;;  %v11343_v49 = vld [vmem:[%s14722_s29 + $0x10] sm:$0xff]  ;;  %v11345_v53 = vld [vmem:[%s14722_s29 + $0x18] sm:$0xff] }
 0x2fe   : > { %v3618_v3 = vpop.f32.mrf.mxu0  ;;  %v3695_v8 = vadd.f32 %v3689_v1, %v3535_v2  ;;  %12052 = vmatprep.subr.mxu1 %v13307_v38  ;;  %11642 = vmatpush3.msra.mxu0 %v3919_v56  ;;  %v3931_v1 = vld [vmem:[%s14718_s10 + $0xa0] sm:$0xff]  ;;  %v3912_v11 = vld [vmem:[%s14718_s10 + $0x8] sm:$0xff]  ;;  %v11351_v56 = vld [vmem:[%s14722_s29 + $0x30] sm:$0xff] }
 0x2ff   : > { %v12030_v7 = vpop.f32.mrf.mxu1  ;;  %v3693_v18 = vadd.f32 %v3618_v3, %v3533_v12  ;;  %11643 = vmatprep.subr.mxu0 %v3934_v57  ;;  %12053 = vmatpush3.msra.mxu1 %v3943_v62  ;;  %v3915_v2 = vld [vmem:[%s14718_s10 + $0x20] sm:$0xff]  ;;  %v3930_v3 = vld [vmem:[%s14718_s10 + $0x98] sm:$0xff] }
 0x300   : > { %v3620_v14 = vpop.f32.mrf.mxu0  ;;  %11644 = vmatpush3.msra.mxu0 %v3918_v58  ;;  %12057 = vmatprep.subr.mxu1 %v13307_v38  ;;  %v3913_v7 = vld [vmem:[%s14718_s10 + $0x10] sm:$0xff]  ;;  %v3927_v12 = vld [vmem:[%s14718_s10 + $0x80] sm:$0xff]  ;;  %v11349_v58 = vld [vmem:[%s14722_s29 + $0x28] sm:$0xff] }
 0x301   : > { %v3849_v13 = vpop.f32.mrf.mxu1  ;;  %v3694_v22 = vadd.f32 %v3620_v14, %v3534_v17  ;;  %11645 = vmatprep.subr.mxu0 %v3933_v59  ;;  %v11353_v62 = vld [vmem:[%s14722_s29 + $0x38] sm:$0xff] }
 0x302   : > { %v3855_v10 = vadd.f32 %v3849_v13, %v3695_v8  ;;  %11646 = vmatpush3.msra.mxu0 %v3917_v60  ;;  %v3928_v8 = vld [vmem:[%s14718_s10 + $0x88] sm:$0xff]  ;;  %v3911_v13 = vld [vmem:[%s14718_s10] sm:$0xff]  ;;  %s14723_s10 = sld [smem:[#allocation10_spill]] }
 0x303   : > { %v12035_v19 = vpop.f32.mrf.mxu1  ;;  %11647 = vmatprep.subr.mxu0 %v3932_v61  ;;  %v11355_v60 = vld [vmem:[%s14722_s29 + $0x40] sm:$0xff]  ;;  %s14728_s29 = sld [smem:[#allocation11_spill]] }
 0x304   : > { %v3864_v20 = vadd.f32 %v3860_v16, %v3855_v10  ;;  %v3778_v21 = vpop.f32.mrf.mxu0  ;;  %11648 = vmatpush3.msra.mxu0 %v3916_v63 }
 0x305   : > { %v3853_v23 = vadd.f32 %v3778_v21, %v3693_v18  ;;  %11649 = vmatprep.subr.mxu0 %v3931_v1 }
 0x306   : > { %v3867_v24 = vmax.f32 %v3864_v20, 0.0  ;;  %v3780_v25 = vpop.f32.mrf.mxu0  ;;  %11650 = vmatpush3.msra.mxu0 %v3915_v2 }
 0x307   : > { %v3862_v26 = vadd.f32 %v3860_v16, %v3853_v23  ;;  %v3854_v27 = vadd.f32 %v3780_v25, %v3694_v22  ;;  %11651 = vmatprep.subr.mxu0 %v3930_v3 }
 0x308   : > { %v3870_v28 = vsel %vm2405_vm12, %v3867_v24, 0.0  ;;  %11652 = vmatpush3.msra.mxu0 %v3914_v4  ;;  %v4825_v39 = vld [vmem:[%s14723_s10] sm:$0xff]  ;;  %s14727_s10 = smov 119   ;;  %vm5864_vm12 = vcmask 39936  }
 0x309   : > { %3873 = vst.msk [vmem:[%s12814_s1 + $0x30] sm:$0xff] %vm2411_vm14, %v3870_v28  ;;  %v3865_v29 = vmax.f32 %v3862_v26, 0.0  ;;  %v3863_v30 = vadd.f32 %v3860_v16, %v3854_v27  ;;  %11653 = vmatprep.subr.mxu0 %v3929_v6 }
 0x30a   : > { %11654 = vmatpush3.msra.mxu0 %v3913_v7 }
 0x30b   : > { %v13272_v31 = vsel %vm2403_vm13, %v3865_v29, 0.0  ;;  %v3866_v32 = vmax.f32 %v3863_v30, 0.0  ;;  %11655 = vmatprep.subr.mxu0 %v3928_v8 }
 0x30c   : > { %3871 = vst [vmem:[%s12814_s1 + $0x20] sm:$0xff] %v13272_v31  ;;  %11656 = vmatpush3.msra.mxu0 %v3912_v11 }
 0x30d   : > { %v13278_v33 = vsel %vm2404_vm15, %v3866_v32, 0.0  ;;  %11657 = vmatprep.subr.mxu0 %v3927_v12 }
 0x30e   : > { %3872 = vst [vmem:[%s12814_s1 + $0x28] sm:$0xff] %v13278_v33  ;;  %v12604_v5 = vpack.i.bf16 %v13272_v31, %v13278_v33  ;;  %11658 = vmatpush3.msra.mxu0 %v3911_v13 }
 0x30f   : > { %12077 = vmatprep.subr.mxu0 %v13307_v38 }
 0x310   : > { %v13285_v34 = vld [vmem:[%s12814_s1 + $0x30] sm:$0xff]  ;;  %12605 = vrot.lane.b32.xlu1 %v12604_v5, %s14672_s4 }
 0x311   : > { %3884 = vrot.lane.b32.xlu0 %v13285_v34, %s14672_s4  ;;  %s14720_s4 = smov 1  }
 0x382   : > { %v12606_v14 = vpop.permute.xlu1 %12605 }
 0x383   : > { %v3885_v10 = vpop.permute.xlu0 %3884  ;;  %v12608_v16 = vunpack.i.h.bf16 %v12606_v14  ;;  %v12607_v17 = vunpack.i.l.bf16 %v12606_v14 }
 0x384   : > { %v3893_v18 = vmax.f32 %v13285_v34, %v3885_v10 }
 0x385   : > { %v3886_v19 = vsel %vm1714_vm7, %v12608_v16, %v12607_v17  ;;  %v3887_v20 = vsel %vm1714_vm7, %v12607_v17, %v3885_v10  ;;  %vm4274_vm7 = vcmask 72704  }
 0x386   : > { %3901 = vrot.lane.b32.xlu0 %v3893_v18, %s14719_s6  ;;  %v3891_v21 = vmax.f32 %v13272_v31, %v3886_v19  ;;  %v3892_v22 = vmax.f32 %v13278_v33, %v3887_v20 }
 0x388   : > { %v12609_v23 = vpack.i.bf16 %v3891_v21, %v3892_v22 }
 0x38a   : > { %12610 = vrot.lane.b32.xlu1 %v12609_v23, %s14719_s6  ;;  %s14678_s6 = smov 119  }
 0x38e   : > { %4108 = vrot.lane.b32.xlu1 %v13285_v34, %s14675_s11 }
 0x392   : > { %4188 = vrot.lane.b32.xlu1 %v13285_v34, %s12641_s8 }
 0x396   : > { %4270 = vrot.lane.b32.xlu1 %v13285_v34, %s12642_s3 }
 0x39a   : > { %4353 = vrot.lane.b32.xlu1 %v13285_v34, %s14720_s4 }
 0x3f8   : > { %v3902_v24 = vpop.permute.xlu0 %3901 }
 0x3f9   : > { %v3910_v25 = vmax.f32 %v3893_v18, %v3902_v24 }
 0x3fb   : > { %12055 = vmatmul.mubr.msk.f32.vlgmr.msra.gmra.mxu1 %vm2411_vm14, %v3910_v25  ;;  %vm6532_vm14 = vcmask 130048  }
 0x3fc   : > { %v12611_v26 = vpop.permute.xlu1 %12610  ;;  %12059 = vmatprep.mubr.msk.f32.mxu1 %vm12632_vm0, %v13307_v38 }
 0x3fd   : > { %v12613_v27 = vunpack.i.h.bf16 %v12611_v26  ;;  %v12612_v28 = vunpack.i.l.bf16 %v12611_v26 }
 0x3ff   : > { %v3903_v29 = vsel %vm2052_vm9, %v12613_v27, %v12612_v28  ;;  %v3904_v30 = vsel %vm2052_vm9, %v12612_v28, %v3902_v24  ;;  %vm5685_vm9 = vcmask 48128  }
 0x400   : > { %v3909_v31 = vmax.f32 %v3892_v22, %v3904_v30  ;;  %v3908_v32 = vmax.f32 %v3891_v21, %v3903_v29  ;;  %v4109_v40 = vpop.permute.xlu1 %4108  ;;  %v13537_v30 = vld [vmem:[%s14715_s0 + $0x1] ss:$0 sm:$0xff] }
 0x401   : > { %vm4833_vm8 = vcmp.gt.f32.partialorder %v13537_v30, 0.0 }
 0x402   : > { %4022 = vmatprep.mubr.f32.mxu0 %v3909_v31 }
 0x403   : > { %4023 = vmatmul.mubr.f32.vlgmr.msra.gmra.mxu0 %v3908_v32 }
 0x404   : > { %12079 = vmatprep.mubr.msk.f32.mxu0 %vm12632_vm0, %v13307_v38  ;;  %v4189_v0 = vpop.permute.xlu1 %4188 }
 0x408   : > { %v4271_v44 = vpop.permute.xlu1 %4270 }
 0x40c   : > { %v4354_v50 = vpop.permute.xlu1 %4353 }
 0x4bb   : > { %v4094_v33 = vpop.f32.mrf.mxu1 }
 0x4bd   : > { %v12056_v5 = vpop.f32.mrf.mxu1 }
 0x4c3   : > { %v11659_v34 = vpop.f32.mrf.mxu0 }
 0x4c5   : > { %v11660_v9 = vpop.f32.mrf.mxu0 }
 0x4c6   : > { %v11661_v15 = vadd.f32 %v11660_v9, %v11659_v34  ;;  %v5559_v34 = vld [vmem:[%s14726_s9] sm:$0xff]  ;;  %s14685_s9 = smov 5  }
 0x4c8   : > { %v4095_v35 = vadd.f32 %v11661_v15, %v4094_v33 }
 0x4ca   : > { %4099 = vst.msk [vmem:[%s12814_s1 + $0x38] sm:$0xff] %vm4098_vm1, %v4095_v35 }
 0x4d1   : > { %v4102_v36 = vld [vmem:[%s12814_s1 + $0x38] sm:$0xff] }
 0x4d2   : > { %4511 = vrot.lane.b32.xlu1 %v4102_v36, %s14721_s30  ;;  %4110 = vrot.lane.b32.xlu0 %v4102_v36, %s14675_s11  ;;  %s14725_s11 = smov 118  }
 0x4d3   : > { %12078 = vmatpush3.msra.mxu0 %v4102_v36 }
 0x4d4   : > { %12080 = vmatmul.mubr.msk.f32.vlgmr.msra.gmra.mxu0 %vm2438_vm11, %v11347_v37  ;;  %12087 = vmatprep.subr.mxu0 %v13307_v38 }
 0x4d5   : > { %12089 = vmatprep.mubr.msk.f32.mxu0 %vm12632_vm0, %v13307_v38 }
 0x4d6   : > { %4669 = vrot.lane.b32.xlu1 %v4102_v36, %s14679_s5  ;;  %4190 = vrot.lane.b32.xlu0 %v4102_v36, %s12641_s8 }
 0x4da   : > { %4272 = vrot.lane.b32.xlu0 %v4102_v36, %s12642_s3  ;;  %4828 = vperm.xlu1 %12614, %v4825_v39  }
 0x4de   : > { %4355 = vrot.lane.b32.xlu0 %v4102_v36, %s14720_s4 }
 0x4e2   : > { %4590 = vrot.lane.b32.xlu0 %v4102_v36, %s14678_s6 }
 0x4e6   : > { %4748 = vrot.lane.b32.xlu0 %v4102_v36, %s12645_s2 }
 0x4ea   : > { %4845 = vrot.lane.b32.xlu0 %v4102_v36, %s14724_s27 }
 0x4ee   : > { %4924 = vrot.lane.b32.xlu0 %v4102_v36, %s12641_s8 }
 0x4f2   : > { %5005 = vrot.lane.b32.xlu0 %v4102_v36, %s12642_s3 }
 0x4f6   : > { %5087 = vrot.lane.b32.xlu0 %v4102_v36, %s14720_s4  ;;  %v11357_v36 = vld [vmem:[%s14728_s29 + $0x8] sm:$0xff] }
 0x544   : > { %v4111_v41 = vpop.permute.xlu0 %4110  ;;  %v4512_v54 = vpop.permute.xlu1 %4511 }
 0x545   : > { %v4113_v43 = vsel %vm4112_vm3, %v4109_v40, %v4111_v41 }
 0x546   : > { %12058 = vmatpush3.msra.mxu1 %v4113_v43  ;;  %v11360_v43 = vld [vmem:[%s14728_s29 + $0x10] sm:$0xff] }
 0x547   : > { %12060 = vmatmul.mubr.msk.f32.vlgmr.msra.gmra.mxu1 %vm2438_vm11, %v11340_v42  ;;  %12062 = vmatprep.subr.mxu1 %v13307_v38 }
 0x548   : > { %v4191_v45 = vpop.permute.xlu0 %4190  ;;  %12064 = vmatprep.mubr.msk.f32.mxu1 %vm12632_vm0, %v13307_v38  ;;  %v4670_v59 = vpop.permute.xlu1 %4669 }
 0x549   : > { %v4193_v47 = vsel %vm4192_vm5, %v4189_v0, %v4191_v45  ;;  %v4840_v0 = vld [vmem:[%s14728_s29] sm:$0xff] }
 0x54a   : > { %12063 = vmatpush3.msra.mxu1 %v4193_v47  ;;  %v11362_v47 = vld [vmem:[%s14728_s29 + $0x18] sm:$0xff] }
 0x54b   : > { %12065 = vmatmul.mubr.msk.f32.vlgmr.msra.gmra.mxu1 %vm2438_vm11, %v4103_v46  ;;  %12067 = vmatprep.subr.mxu1 %v13307_v38 }
 0x54c   : > { %v4273_v48 = vpop.permute.xlu0 %4272  ;;  %12069 = vmatprep.mubr.msk.f32.mxu1 %vm12632_vm0, %v13307_v38 }
 0x54d   : > { %v4275_v51 = vsel %vm4274_vm7, %v4271_v44, %v4273_v48  ;;  %v11364_v48 = vld [vmem:[%s14728_s29 + $0x20] sm:$0xff] }
 0x54e   : > { %12068 = vmatpush3.msra.mxu1 %v4275_v51 }
 0x54f   : > { %12070 = vmatmul.mubr.msk.f32.vlgmr.msra.gmra.mxu1 %vm2438_vm11, %v11343_v49  ;;  %12072 = vmatprep.subr.mxu1 %v13307_v38 }
 0x550   : > { %v4356_v52 = vpop.permute.xlu0 %4355  ;;  %12074 = vmatprep.mubr.msk.f32.mxu1 %vm12632_vm0, %v13307_v38 }
 0x551   : > { %v4357_v55 = vsel %vm1384_vm6, %v4354_v50, %v4356_v52  ;;  %v11366_v52 = vld [vmem:[%s14728_s29 + $0x28] sm:$0xff] }
 0x552   : > { %12073 = vmatpush3.msra.mxu1 %v4357_v55 }
 0x553   : > { %12075 = vmatmul.mubr.msk.f32.vlgmr.msra.gmra.mxu1 %vm2438_vm11, %v11345_v53  ;;  %12082 = vmatprep.subr.mxu1 %v13307_v38  ;;  %v11368_v53 = vld [vmem:[%s14728_s29 + $0x30] sm:$0xff] }
 0x554   : > { %12083 = vmatpush3.msra.mxu1 %v4512_v54  ;;  %v4591_v57 = vpop.permute.xlu0 %4590  ;;  %12084 = vmatprep.mubr.msk.f32.mxu1 %vm12632_vm0, %v13307_v38 }
 0x555   : > { %12088 = vmatpush3.msra.mxu0 %v4591_v57  ;;  %12092 = vmatprep.subr.mxu1 %v13307_v38  ;;  %v4829_v28 = vpop.permute.xlu1 %4828  ;;  %v11372_v57 = vld [vmem:[%s14728_s29 + $0x40] sm:$0xff] }
 0x556   : > { %12090 = vmatmul.mubr.msk.f32.vlgmr.msra.gmra.mxu0 %vm2438_vm11, %v11351_v56  ;;  %12097 = vmatprep.subr.mxu0 %v13307_v38  ;;  %v11370_v56 = vld [vmem:[%s14728_s29 + $0x38] sm:$0xff] }
 0x557   : > { %12085 = vmatmul.mubr.msk.f32.vlgmr.msra.gmra.mxu1 %vm2438_vm11, %v11349_v58  ;;  %12099 = vmatprep.mubr.msk.f32.mxu0 %vm12632_vm0, %v13307_v38 }
 0x558   : > { %12093 = vmatpush3.msra.mxu1 %v4670_v59  ;;  %v4749_v61 = vpop.permute.xlu0 %4748  ;;  %12094 = vmatprep.mubr.msk.f32.mxu1 %vm12632_vm0, %v13307_v38 }
 0x559   : > { %12098 = vmatpush3.msra.mxu0 %v4749_v61  ;;  %12102 = vmatprep.subr.mxu1 %v13307_v38 }
 0x55a   : > { %12100 = vmatmul.mubr.msk.f32.vlgmr.msra.gmra.mxu0 %vm2438_vm11, %v11355_v60  ;;  %12107 = vmatprep.subr.mxu0 %v13307_v38 }
 0x55b   : > { %12095 = vmatmul.mubr.msk.f32.vlgmr.msra.gmra.mxu1 %vm2438_vm11, %v11353_v62  ;;  %12109 = vmatprep.mubr.msk.f32.mxu0 %vm12632_vm0, %v13307_v38 }
 0x55c   : > { %12104 = vmatprep.mubr.msk.f32.mxu1 %vm12632_vm0, %v13307_v38  ;;  %v4846_v9 = vpop.permute.xlu0 %4845 }
 0x560   : > { %v4925_v15 = vpop.permute.xlu0 %4924 }
 0x564   : > { %v5006_v39 = vpop.permute.xlu0 %5005 }
 0x568   : > { %v5088_v44 = vpop.permute.xlu0 %5087 }
 0x594   : > { %v4504_v63 = vpop.f32.mrf.mxu0 }
 0x596   : > { %v12081_v1 = vpop.f32.mrf.mxu0 }
 0x607   : > { %v4184_v2 = vpop.f32.mrf.mxu1 }
 0x609   : > { %v12061_v3 = vpop.f32.mrf.mxu1 }
 0x60b   : > { %v4264_v4 = vpop.f32.mrf.mxu1 }
 0x60c   : > { %v4265_v8 = vadd.f32 %v4264_v4, %v4184_v2 }
 0x60d   : > { %v12066_v6 = vpop.f32.mrf.mxu1 }
 0x60f   : > { %v4346_v7 = vpop.f32.mrf.mxu1 }
 0x610   : > { %v4350_v12 = vadd.f32 %v4346_v7, %v4265_v8 }
 0x611   : > { %v12071_v11 = vpop.f32.mrf.mxu1 }
 0x613   : > { %v4428_v13 = vpop.f32.mrf.mxu1 }
 0x614   : > { %v4432_v14 = vadd.f32 %v4428_v13, %v4350_v12 }
 0x615   : > { %v12076_v10 = vpop.f32.mrf.mxu1 }
 0x616   : > { %v4508_v16 = vadd.f32 %v4504_v63, %v4432_v14  ;;  %v4662_v17 = vpop.f32.mrf.mxu0 }
 0x617   : > { %v4583_v18 = vpop.f32.mrf.mxu1 }
 0x618   : > { %v4587_v19 = vadd.f32 %v4583_v18, %v4508_v16  ;;  %v12091_v20 = vpop.f32.mrf.mxu0 }
 0x619   : > { %v12086_v21 = vpop.f32.mrf.mxu1 }
 0x61a   : > { %v4666_v22 = vadd.f32 %v4662_v17, %v4587_v19  ;;  %v4820_v23 = vpop.f32.mrf.mxu0 }
 0x61b   : > { %v4741_v24 = vpop.f32.mrf.mxu1 }
 0x61c   : > { %v4745_v25 = vadd.f32 %v4741_v24, %v4666_v22  ;;  %v12101_v26 = vpop.f32.mrf.mxu0 }
 0x61d   : > { %v12096_v27 = vpop.f32.mrf.mxu1 }
 0x61e   : > { %v4824_v29 = vadd.f32 %v4820_v23, %v4745_v25 }
 0x620   : > { %v4831_v31 = vadd.f32 %v4829_v28, %v4824_v29 }
 0x622   : > { %v4832_v32 = vmax.f32 %v4831_v31, 0.0 }
 0x624   : > { %v4836_v33 = vsel %vm4833_vm8, %v4832_v32, 0.0 }
 0x625   : > { %4837 = vst.msk [vmem:[%s12814_s1 + $0x40] sm:$0xff] %vm4098_vm1, %v4836_v33 }
 0x62c   : > { %v4839_v5 = vld [vmem:[%s12814_s1 + $0x40] sm:$0xff] }
 0x62d   : > { %5245 = vrot.lane.b32.xlu0 %v4839_v5, %s14721_s30  ;;  %4847 = vrot.lane.b32.xlu1 %v4839_v5, %s14724_s27  ;;  %s14683_s27 = smov 7  }
 0x631   : > { %5403 = vrot.lane.b32.xlu0 %v4839_v5, %s14725_s11  ;;  %4926 = vrot.lane.b32.xlu1 %v4839_v5, %s12641_s8  ;;  %s14729_s8 = sld [smem:[#allocation13_spill]] }
 0x635   : > { %5562 = vperm.xlu0 %12603, %v5559_v34   ;;  %5007 = vrot.lane.b32.xlu1 %v4839_v5, %s12642_s3  ;;  %s14731_s3 = smov 7  }
 0x637   : > { %v5592_v29 = vld [vmem:[%s14729_s8 + $0x60] sm:$0xf]  ;;  %v5591_v31 = vld [vmem:[%s14729_s8 + $0x58] sm:$0xff]  ;;  %v5590_v30 = vld [vmem:[%s14729_s8 + $0x50] sm:$0xff] }
 0x638   : > { %v5589_v32 = vld [vmem:[%s14729_s8 + $0x48] sm:$0xff]  ;;  %v5588_v33 = vld [vmem:[%s14729_s8 + $0x40] sm:$0xff]  ;;  %v5586_v34 = vld [vmem:[%s14729_s8 + $0x30] sm:$0xff] }
 0x639   : > { %5089 = vrot.lane.b32.xlu1 %v4839_v5, %s14720_s4 }
 0x63d   : > { %5324 = vrot.lane.b32.xlu1 %v4839_v5, %s14727_s10  ;;  %s14691_s10 = smov 123  }
 0x641   : > { %5482 = vrot.lane.b32.xlu1 %v4839_v5, %s12645_s2  ;;  %s14693_s2 = smov 6  }
 0x69f   : > { %v4848_v35 = vpop.permute.xlu1 %4847  ;;  %v5246_v49 = vpop.permute.xlu0 %5245 }
 0x6a0   : > { %v4849_v37 = vsel %vm4112_vm3, %v4846_v9, %v4848_v35  ;;  %v5585_v9 = vld [vmem:[%s14729_s8 + $0x28] sm:$0xff]  ;;  %v5583_v35 = vld [vmem:[%s14729_s8 + $0x18] sm:$0xff] }
 0x6a1   : > { %12103 = vmatpush3.msra.mxu1 %v4849_v37  ;;  %v5581_v37 = vld [vmem:[%s14729_s8 + $0x8] sm:$0xff] }
 0x6a2   : > { %12105 = vmatmul.mubr.msk.f32.vlgmr.msra.gmra.mxu1 %vm2438_vm11, %v11357_v36  ;;  %12112 = vmatprep.subr.mxu1 %v13307_v38  ;;  %v5582_v36 = vld [vmem:[%s14729_s8 + $0x10] sm:$0xff] }
 0x6a3   : > { %v4927_v40 = vpop.permute.xlu1 %4926  ;;  %12114 = vmatprep.mubr.msk.f32.mxu1 %vm12632_vm0, %v13307_v38  ;;  %v5404_v54 = vpop.permute.xlu0 %5403 }
 0x6a4   : > { %v4928_v41 = vsel %vm4192_vm5, %v4925_v15, %v4927_v40  ;;  %v5584_v15 = vld [vmem:[%s14729_s8 + $0x20] sm:$0xff] }
 0x6a5   : > { %12108 = vmatpush3.msra.mxu0 %v4928_v41 }
 0x6a6   : > { %12110 = vmatmul.mubr.msk.f32.vlgmr.msra.gmra.mxu0 %vm2438_vm11, %v4840_v0  ;;  %12117 = vmatprep.subr.mxu0 %v13307_v38 }
 0x6a7   : > { %v5008_v42 = vpop.permute.xlu1 %5007  ;;  %12119 = vmatprep.mubr.msk.f32.mxu0 %vm12632_vm0, %v13307_v38 }
 0x6a8   : > { %v5009_v45 = vsel %vm4274_vm7, %v5006_v39, %v5008_v42  ;;  %v5580_v39 = vld [vmem:[%s14729_s8] sm:$0xff] }
 0x6a9   : > { %12113 = vmatpush3.msra.mxu1 %v5009_v45 }
 0x6aa   : > { %12115 = vmatmul.mubr.msk.f32.vlgmr.msra.gmra.mxu1 %vm2438_vm11, %v11360_v43  ;;  %12122 = vmatprep.subr.mxu1 %v13307_v38  ;;  %v11376_v43 = vld [vmem:[%s14730_s12 + $0x10] sm:$0xff] }
 0x6ab   : > { %12123 = vmatpush3.msra.mxu1 %v4839_v5  ;;  %v5090_v46 = vpop.permute.xlu1 %5089  ;;  %12124 = vmatprep.mubr.msk.f32.mxu1 %vm12632_vm0, %v13307_v38  ;;  %v5587_v5 = vld [vmem:[%s14729_s8 + $0x38] sm:$0xff]  ;;  %s14734_s8 = smov 6  }
 0x6ac   : > { %v5091_v50 = vsel %vm1384_vm6, %v5088_v44, %v5090_v46  ;;  %12132 = vmatprep.subr.mxu1 %v13307_v38 }
 0x6ad   : > { %12118 = vmatpush3.msra.mxu0 %v5091_v50 }
 0x6ae   : > { %12120 = vmatmul.mubr.msk.f32.vlgmr.msra.gmra.mxu0 %vm2438_vm11, %v11362_v47  ;;  %12125 = vmatmul.mubr.msk.f32.vlgmr.msra.gmra.mxu1 %vm2438_vm11, %v11364_v48  ;;  %v6485_v47 = vld [vmem:[%s14732_s13 + $0x8] sm:$0xff]  ;;  %v11398_v48 = vld [vmem:[%s14730_s12 + $0x60] sm:$0xff] }
 0x6af   : > { %12127 = vmatprep.subr.mxu0 %v13307_v38  ;;  %v5325_v51 = vpop.permute.xlu1 %5324  ;;  %12129 = vmatprep.mubr.msk.f32.mxu0 %vm12632_vm0, %v13307_v38 }
 0x6b0   : > { %12128 = vmatpush3.msra.mxu0 %v5246_v49  ;;  %12133 = vmatpush3.msra.mxu1 %v5325_v51  ;;  %v5563_v24 = vpop.permute.xlu0 %5562  ;;  %v6484_v49 = vld [vmem:[%s14732_s13] sm:$0xff]  ;;  %s12653_s13 = smov 124  }
 0x6b1   : > { %12134 = vmatprep.mubr.msk.f32.mxu1 %vm12632_vm0, %v13307_v38  ;;  %12137 = vmatprep.subr.mxu0 %v13307_v38 }
 0x6b2   : > { %12130 = vmatmul.mubr.msk.f32.vlgmr.msra.gmra.mxu0 %vm2438_vm11, %v11366_v52  ;;  %12135 = vmatmul.mubr.msk.f32.vlgmr.msra.gmra.mxu1 %vm2438_vm11, %v11368_v53 }
 0x6b3   : > { %12138 = vmatpush3.msra.mxu0 %v5404_v54  ;;  %12142 = vmatprep.subr.mxu1 %v13307_v38  ;;  %v5483_v55 = vpop.permute.xlu1 %5482  ;;  %v5674_v54 = vld [vmem:[%s14730_s12] sm:$0xff] }
 0x6b4   : > { %12143 = vmatpush3.msra.mxu1 %v5483_v55  ;;  %12139 = vmatprep.mubr.msk.f32.mxu0 %vm12632_vm0, %v13307_v38 }
 0x6b5   : > { %12144 = vmatprep.mubr.msk.f32.mxu1 %vm12632_vm0, %v13307_v38  ;;  %12147 = vmatprep.subr.mxu0 %v13307_v38 }
 0x6b6   : > { %12140 = vmatmul.mubr.msk.f32.vlgmr.msra.gmra.mxu0 %vm2438_vm11, %v11370_v56  ;;  %12145 = vmatmul.mubr.msk.f32.vlgmr.msra.gmra.mxu1 %vm2438_vm11, %v11372_v57 }
 0x6b7   : > { %12173 = vmatprep.mubr.msk.f32.mxu0 %vm12632_vm0, %v13307_v38  ;;  %12148 = vmatpush3.msk.msra.mxu0 %vm885_vm2, %v5592_v29  ;;  %vm5669_vm0 = vcmask 293888  }
 0x6b8   : > { %12149 = vmatprep.subr.mxu0 %v13307_v38  ;;  %12178 = vmatprep.mubr.msk.f32.mxu1 %vm2438_vm11, %v11376_v43 }
 0x6b9   : > { %12150 = vmatpush3.msra.mxu0 %v5591_v31 }
 0x6ba   : > { %12151 = vmatprep.subr.mxu0 %v13307_v38 }
 0x6bb   : > { %12152 = vmatpush3.msra.mxu0 %v5590_v30 }
 0x6bc   : > { %12153 = vmatprep.subr.mxu0 %v13307_v38 }
 0x6bd   : > { %12154 = vmatpush3.msra.mxu0 %v5589_v32 }
 0x6be   : > { %12155 = vmatprep.subr.mxu0 %v13307_v38 }
 0x6bf   : > { %12156 = vmatpush3.msra.mxu0 %v5588_v33 }
 0x6c0   : > { %12157 = vmatprep.subr.mxu0 %v13307_v38 }
 0x6c1   : > { %12158 = vmatpush3.msra.mxu0 %v5587_v5 }
 0x6c2   : > { %12159 = vmatprep.subr.mxu0 %v13307_v38 }
 0x6c3   : > { %12160 = vmatpush3.msra.mxu0 %v5586_v34 }
 0x6c4   : > { %12161 = vmatprep.subr.mxu0 %v13307_v38 }
 0x6c5   : > { %12162 = vmatpush3.msra.mxu0 %v5585_v9 }
 0x6c6   : > { %12163 = vmatprep.subr.mxu0 %v13307_v38 }
 0x6c7   : > { %12164 = vmatpush3.msra.mxu0 %v5584_v15 }
 0x6c8   : > { %12165 = vmatprep.subr.mxu0 %v13307_v38 }
 0x6c9   : > { %12166 = vmatpush3.msra.mxu0 %v5583_v35 }
 0x6ca   : > { %12167 = vmatprep.subr.mxu0 %v13307_v38 }
 0x6cb   : > { %12168 = vmatpush3.msra.mxu0 %v5582_v36 }
 0x6cc   : > { %12169 = vmatprep.subr.mxu0 %v13307_v38 }
 0x6cd   : > { %12170 = vmatpush3.msra.mxu0 %v5581_v37 }
 0x6ce   : > { %12171 = vmatprep.subr.mxu0 %v13307_v38 }
 0x6cf   : > { %12172 = vmatpush3.msra.mxu0 %v5580_v39 }
 0x762   : > { %v4920_v58 = vpop.f32.mrf.mxu1 }
 0x764   : > { %v12106_v59 = vpop.f32.mrf.mxu1 }
 0x765   : > { %v11382_v59 = vld [vmem:[%s14730_s12 + $0x20] sm:$0xff] }
 0x766   : > { %v4999_v60 = vpop.f32.mrf.mxu0 }
 0x767   : > { %v5000_v62 = vadd.f32 %v4999_v60, %v4920_v58  ;;  %v5675_v58 = vld [vmem:[%s14730_s12 + $0x8] sm:$0xff] }
 0x768   : > { %v12111_v61 = vpop.f32.mrf.mxu0 }
 0x76a   : > { %v5080_v63 = vpop.f32.mrf.mxu1 }
 0x76b   : > { %v5084_v2 = vadd.f32 %v5080_v63, %v5000_v62  ;;  %v11383_v62 = vld [vmem:[%s14730_s12 + $0x28] sm:$0xff]  ;;  %v11386_v63 = vld [vmem:[%s14730_s12 + $0x30] sm:$0xff] }
 0x76c   : > { %v12116_v1 = vpop.f32.mrf.mxu1 }
 0x76e   : > { %v5162_v3 = vpop.f32.mrf.mxu0  ;;  %v5238_v4 = vpop.f32.mrf.mxu1 }
 0x76f   : > { %v5166_v6 = vadd.f32 %v5162_v3, %v5084_v2 }
 0x770   : > { %v12121_v7 = vpop.f32.mrf.mxu0  ;;  %v12126_v8 = vpop.f32.mrf.mxu1 }
 0x771   : > { %v5242_v11 = vadd.f32 %v5238_v4, %v5166_v6  ;;  %v11387_v4 = vld [vmem:[%s14730_s12 + $0x38] sm:$0xff]  ;;  %v11390_v8 = vld [vmem:[%s14730_s12 + $0x40] sm:$0xff] }
 0x772   : > { %v5317_v12 = vpop.f32.mrf.mxu0  ;;  %v5396_v13 = vpop.f32.mrf.mxu1 }
 0x773   : > { %v5321_v14 = vadd.f32 %v5317_v12, %v5242_v11  ;;  %v11399_v11 = vld [vmem:[%s14730_s12 + $0x68] sm:$0xff] }
 0x774   : > { %v12131_v10 = vpop.f32.mrf.mxu0  ;;  %v12136_v16 = vpop.f32.mrf.mxu1  ;;  %v11391_v12 = vld [vmem:[%s14730_s12 + $0x48] sm:$0xff] }
 0x775   : > { %v5400_v17 = vadd.f32 %v5396_v13, %v5321_v14  ;;  %v11406_v13 = vld [vmem:[%s14730_s12 + $0x80] sm:$0xff]  ;;  %v11394_v10 = vld [vmem:[%s14730_s12 + $0x50] sm:$0xff]  ;;  %v11407_v16 = vld [vmem:[%s14730_s12 + $0x88] sm:$0xff] }
 0x776   : > { %v5475_v18 = vpop.f32.mrf.mxu0  ;;  %v5554_v19 = vpop.f32.mrf.mxu1 }
 0x777   : > { %v5479_v20 = vadd.f32 %v5475_v18, %v5400_v17  ;;  %v11395_v18 = vld [vmem:[%s14730_s12 + $0x58] sm:$0xff] }
 0x778   : > { %v12141_v21 = vpop.f32.mrf.mxu0  ;;  %v12146_v22 = vpop.f32.mrf.mxu1 }
 0x779   : > { %v5558_v23 = vadd.f32 %v5554_v19, %v5479_v20  ;;  %v11402_v19 = vld [vmem:[%s14730_s12 + $0x70] sm:$0xff]  ;;  %v11403_v20 = vld [vmem:[%s14730_s12 + $0x78] sm:$0xff] }
 0x77b   : > { %v5565_v25 = vadd.f32 %v5563_v24, %v5558_v23 }
 0x77d   : > { %v5566_v26 = vmax.f32 %v5565_v25, 0.0 }
 0x77f   : > { %v5567_v27 = vsel %vm4833_vm8, %v5566_v26, 0.0 }
 0x780   : > { %5568 = vst.msk [vmem:[%s12814_s1 + $0x48] sm:$0xff] %vm4098_vm1, %v5567_v27 }
 0x787   : > { %v5569_v28 = vld [vmem:[%s12814_s1 + $0x48] sm:$0xff] }
 0x788   : > { %5571 = vrot.lane.b32.xlu1 %v5569_v28, %s14721_s30 }
 0x78c   : > { %5681 = vrot.lane.b32.xlu1 %v5569_v28, %s14693_s2 }
 0x790   : > { %5769 = vrot.lane.b32.xlu1 %v5569_v28, %s14683_s27 }
 0x794   : > { %5860 = vrot.lane.b32.xlu1 %v5569_v28, %s14685_s9  ;;  %s14733_s9 = smov 5  }
 0x798   : > { %5953 = vrot.lane.b32.xlu1 %v5569_v28, %s14720_s4 }
 0x7fa   : > { %v5572_v40 = vpop.permute.xlu1 %5571 }
 0x7fb   : > { %v5574_v0 = vmax.f32 %v5569_v28, %v5572_v40 }
 0x7fd   : > { %5576 = vrot.lane.b32.xlu0 %v5574_v0, %s14725_s11  ;;  %s14689_s11 = smov 122  }
 0x7fe   : > { %v5682_v50 = vpop.permute.xlu1 %5681 }
 0x802   : > { %v5770_v51 = vpop.permute.xlu1 %5769 }
 0x806   : > { %v5861_v56 = vpop.permute.xlu1 %5860 }
 0x80a   : > { %v5954_v1 = vpop.permute.xlu1 %5953 }
 0x86f   : > { %v5577_v41 = vpop.permute.xlu0 %5576 }
 0x870   : > { %v5579_v42 = vmax.f32 %v5574_v0, %v5577_v41 }
 0x872   : > { %12174 = vmatmul.mubr.msk.f32.vlgmr.msra.gmra.mxu0 %vm4098_vm1, %v5579_v42  ;;  %vm9557_vm1 = vcmask 23552  }
 0x873   : > { %12208 = vmatprep.mubr.msk.f32.mxu0 %vm2438_vm11, %v11398_v48 }
 0x932   : > { %v5665_v44 = vpop.f32.mrf.mxu0 }
 0x933   : > { %5670 = vst.msk [vmem:[%s12814_s1 + $0x50] sm:$0xff] %vm5669_vm0, %v5665_v44 }
 0x934   : > { %v12175_v45 = vpop.f32.mrf.mxu0 }
 0x93a   : > { %v13691_v46 = vld [vmem:[%s12814_s1 + $0x50] sm:$0xff] }
 0x93b   : > { %6131 = vrot.lane.b32.xlu1 %v13691_v46, %s14721_s30  ;;  %5683 = vrot.lane.b32.xlu0 %v13691_v46, %s14693_s2 }
 0x93f   : > { %6309 = vrot.lane.b32.xlu1 %v13691_v46, %s14689_s11  ;;  %5771 = vrot.lane.b32.xlu0 %v13691_v46, %s14731_s3 }
 0x943   : > { %6493 = vperm.xlu1 %12614, %v6485_v47   ;;  %5862 = vrot.lane.b32.xlu0 %v13691_v46, %s14733_s9 }
 0x947   : > { %6524 = vrot.lane.b32.xlu1 %v13307_v38, %s14693_s2  ;;  %5955 = vrot.lane.b32.xlu0 %v13691_v46, %s14720_s4 }
 0x94b   : > { %6618 = vrot.lane.b32.xlu1 %v13307_v38, %s14731_s3  ;;  %6220 = vrot.lane.b32.xlu0 %v13691_v46, %s14691_s10  ;;  %s14737_s10 = smov 121  }
 0x94f   : > { %6714 = vrot.lane.b32.xlu1 %v13307_v38, %s14733_s9  ;;  %6398 = vrot.lane.b32.xlu0 %v13691_v46, %s14687_s28  ;;  %s14736_s28 = smov 122  }
 0x953   : > { %6812 = vrot.lane.b32.xlu1 %v13307_v38, %s14720_s4  ;;  %6488 = vperm.xlu0 %12603, %v6484_v49   ;;  %v11377_v38 = vld [vmem:[%s14730_s12 + $0x18] sm:$0xff]  ;;  %v13808_v49 = vld [vmem:[%s14715_s0 + $0x2] ss:$0 sm:$0xff]  ;;  %s12652_s12 = smov 4  }
 0x954   : > { %vm6500_vm13 = vcmp.gt.f32.partialorder %v13808_v49, 0.0  ;;  %v7401_v49 = vld [vmem:[%s14649_s16 + $0x10] sm:$0xff] }
 0x957   : > { %6520 = vrot.lane.b32.xlu1 %v13691_v46, %s14693_s2  ;;  %s14735_s2 = smov 123  }
 0x95b   : > { %6614 = vrot.lane.b32.xlu1 %v13691_v46, %s14731_s3 }
 0x95f   : > { %6710 = vrot.lane.b32.xlu1 %v13691_v46, %s14733_s9 }
 0x963   : > { %6808 = vrot.lane.b32.xlu1 %v13691_v46, %s14720_s4 }
 0x9ad   : > { %v5684_v52 = vpop.permute.xlu0 %5683  ;;  %v6132_v6 = vpop.permute.xlu1 %6131 }
 0x9ae   : > { %v5686_v53 = vsel %vm5685_vm9, %v5682_v50, %v5684_v52 }
 0x9af   : > { %12176 = vmatprep.subr.mxu1 %v5686_v53 }
 0x9b0   : > { %12177 = vmatpush3.msra.mxu1 %v5686_v53 }
 0x9b1   : > { %12179 = vmatmul.mubr.msk.f32.vlgmr.msra.gmra.mxu1 %vm2438_vm11, %v11377_v38  ;;  %v5772_v55 = vpop.permute.xlu0 %5771  ;;  %v6310_v17 = vpop.permute.xlu1 %6309 }
 0x9b2   : > { %v5774_v57 = vsel %vm5773_vm10, %v5770_v51, %v5772_v55  ;;  %12183 = vmatprep.mubr.msk.f32.mxu1 %vm2438_vm11, %v5674_v54 }
 0x9b3   : > { %12181 = vmatprep.subr.mxu1 %v5774_v57 }
 0x9b4   : > { %12182 = vmatpush3.msra.mxu1 %v5774_v57 }
 0x9b5   : > { %12184 = vmatmul.mubr.msk.f32.vlgmr.msra.gmra.mxu1 %vm2438_vm11, %v5675_v58  ;;  %v5863_v60 = vpop.permute.xlu0 %5862 }
 0x9b6   : > { %v5865_v61 = vsel %vm5864_vm12, %v5861_v56, %v5863_v60  ;;  %12188 = vmatprep.mubr.msk.f32.mxu1 %vm2438_vm11, %v11382_v59 }
 0x9b7   : > { %12186 = vmatprep.subr.mxu1 %v5865_v61 }
 0x9b8   : > { %12187 = vmatpush3.msra.mxu1 %v5865_v61  ;;  %v11410_v61 = vld [vmem:[%s14647_s14 + $0x10] sm:$0xff] }
 0x9b9   : > { %12189 = vmatmul.mubr.msk.f32.vlgmr.msra.gmra.mxu1 %vm2438_vm11, %v11383_v62  ;;  %v5956_v2 = vpop.permute.xlu0 %5955  ;;  %v6511_v62 = vld [vmem:[%s14647_s14] sm:$0xff] }
 0x9ba   : > { %v5957_v3 = vsel %vm1384_vm6, %v5954_v1, %v5956_v2  ;;  %12193 = vmatprep.mubr.msk.f32.mxu1 %vm2438_vm11, %v11386_v63  ;;  %v7357_v63 = vld [vmem:[%s14648_s15] sm:$0xff]  ;;  %v7358_v2 = vld [vmem:[%s14648_s15 + $0x8] sm:$0xff] }
 0x9bb   : > { %12191 = vmatprep.subr.mxu1 %v5957_v3 }
 0x9bc   : > { %12192 = vmatpush3.msra.mxu1 %v5957_v3 }
 0x9bd   : > { %12194 = vmatmul.mubr.msk.f32.vlgmr.msra.gmra.mxu1 %vm2438_vm11, %v11387_v4  ;;  %12196 = vmatprep.subr.mxu1 %v13691_v46  ;;  %v6221_v7 = vpop.permute.xlu0 %6220 }
 0x9be   : > { %12197 = vmatpush3.msra.mxu1 %v13691_v46  ;;  %12206 = vmatprep.subr.mxu0 %v6221_v7  ;;  %v6494_v51 = vpop.permute.xlu1 %6493 }
 0x9bf   : > { %12201 = vmatprep.subr.mxu1 %v6132_v6  ;;  %12207 = vmatpush3.msra.mxu0 %v6221_v7 }
 0x9c0   : > { %12198 = vmatprep.mubr.msk.f32.mxu1 %vm2438_vm11, %v11390_v8  ;;  %12209 = vmatmul.mubr.msk.f32.vlgmr.msra.gmra.mxu0 %vm2438_vm11, %v11399_v11 }
 0x9c1   : > { %12199 = vmatmul.mubr.msk.f32.vlgmr.msra.gmra.mxu1 %vm2438_vm11, %v11391_v12  ;;  %v6399_v14 = vpop.permute.xlu0 %6398  ;;  %12218 = vmatprep.mubr.msk.f32.mxu0 %vm2438_vm11, %v11406_v13 }
 0x9c2   : > { %12202 = vmatpush3.msra.mxu1 %v6132_v6  ;;  %12216 = vmatprep.subr.mxu0 %v6399_v14  ;;  %v6525_v3 = vpop.permute.xlu1 %6524 }
 0x9c3   : > { %12211 = vmatprep.subr.mxu1 %v6310_v17  ;;  %12217 = vmatpush3.msra.mxu0 %v6399_v14 }
 0x9c4   : > { %12203 = vmatprep.mubr.msk.f32.mxu1 %vm2438_vm11, %v11394_v10  ;;  %12219 = vmatmul.mubr.msk.f32.vlgmr.msra.gmra.mxu0 %vm2438_vm11, %v11407_v16 }
 0x9c5   : > { %12204 = vmatmul.mubr.msk.f32.vlgmr.msra.gmra.mxu1 %vm2438_vm11, %v11395_v18  ;;  %12232 = vmatprep.mubr.msk.f32.mxu0 %vm6532_vm14, %v6511_v62 }
 0x9c6   : > { %12212 = vmatpush3.msra.mxu1 %v6310_v17  ;;  %12213 = vmatprep.mubr.msk.f32.mxu1 %vm2438_vm11, %v11402_v19  ;;  %v6619_v4 = vpop.permute.xlu1 %6618 }
 0x9c9   : > { %12214 = vmatmul.mubr.msk.f32.vlgmr.msra.gmra.mxu1 %vm2438_vm11, %v11403_v20  ;;  %vm9265_vm11 = vcmask 1040384  }
 0x9ca   : > { %12225 = vmatprep.mubr.msk.f32.mxu1 %vm6532_vm14, %v11410_v61  ;;  %v6715_v6 = vpop.permute.xlu1 %6714 }
 0x9ce   : > { %v6489_v54 = vpop.permute.xlu0 %6488  ;;  %v6813_v7 = vpop.permute.xlu1 %6812 }
 0x9d2   : > { %v6521_v8 = vpop.permute.xlu1 %6520 }
 0x9d6   : > { %v6615_v14 = vpop.permute.xlu1 %6614 }
 0x9da   : > { %v6711_v17 = vpop.permute.xlu1 %6710 }
 0x9de   : > { %v6809_v20 = vpop.permute.xlu1 %6808 }
 0xa71   : > { %v12180_v21 = vpop.f32.mrf.mxu1 }
 0xa73   : > { %v5760_v22 = vpop.f32.mrf.mxu1 }
 0xa75   : > { %v12185_v23 = vpop.f32.mrf.mxu1 }
 0xa76   : > { %v5854_v28 = vadd.f32 %v12185_v23, %v12180_v21  ;;  %v11416_v23 = vld [vmem:[%s14647_s14 + $0x20] sm:$0xff] }
 0xa77   : > { %v5848_v24 = vpop.f32.mrf.mxu1 }
 0xa78   : > { %v5849_v31 = vadd.f32 %v5848_v24, %v5760_v22  ;;  %v11411_v22 = vld [vmem:[%s14647_s14 + $0x18] sm:$0xff] }
 0xa79   : > { %v12190_v25 = vpop.f32.mrf.mxu1 }
 0xa7a   : > { %v5949_v30 = vadd.f32 %v12190_v25, %v5854_v28  ;;  %v6512_v28 = vld [vmem:[%s14647_s14 + $0x8] sm:$0xff] }
 0xa7b   : > { %v5939_v26 = vpop.f32.mrf.mxu1 }
 0xa7c   : > { %v5948_v5 = vadd.f32 %v5939_v26, %v5849_v31 }
 0xa7d   : > { %v12195_v27 = vpop.f32.mrf.mxu1 }
 0xa7e   : > { %v6041_v34 = vadd.f32 %v12195_v27, %v5949_v30 }
 0xa7f   : > { %v6031_v29 = vpop.f32.mrf.mxu1 }
 0xa80   : > { %v12210_v33 = vpop.f32.mrf.mxu0  ;;  %v6040_v15 = vadd.f32 %v6031_v29, %v5948_v5  ;;  %v11420_v29 = vld [vmem:[%s14647_s14 + $0x30] sm:$0xff]  ;;  %v11424_v5 = vld [vmem:[%s14647_s14 + $0x40] sm:$0xff] }
 0xa81   : > { %v12200_v32 = vpop.f32.mrf.mxu1 }
 0xa82   : > { %v6127_v35 = vadd.f32 %v12200_v32, %v6041_v34  ;;  %v6295_v37 = vpop.f32.mrf.mxu0 }
 0xa83   : > { %v6117_v9 = vpop.f32.mrf.mxu1 }
 0xa84   : > { %v6126_v39 = vadd.f32 %v6117_v9, %v6040_v15  ;;  %v12220_v44 = vpop.f32.mrf.mxu0 }
 0xa85   : > { %v12205_v36 = vpop.f32.mrf.mxu1 }
 0xa86   : > { %v6216_v40 = vadd.f32 %v12205_v36, %v6127_v35  ;;  %v6473_v52 = vpop.f32.mrf.mxu0  ;;  %v11421_v35 = vld [vmem:[%s14647_s14 + $0x38] sm:$0xff]  ;;  %v11425_v36 = vld [vmem:[%s14647_s14 + $0x48] sm:$0xff] }
 0xa87   : > { %v6206_v0 = vpop.f32.mrf.mxu1 }
 0xa88   : > { %v6215_v41 = vadd.f32 %v6206_v0, %v6126_v39  ;;  %v6305_v42 = vadd.f32 %v12210_v33, %v6216_v40  ;;  %v11417_v33 = vld [vmem:[%s14647_s14 + $0x28] sm:$0xff]  ;;  %v11428_v39 = vld [vmem:[%s14647_s14 + $0x50] sm:$0xff]  ;;  %v11432_v0 = vld [vmem:[%s14647_s14 + $0x60] sm:$0xff] }
 0xa89   : > { %v12215_v43 = vpop.f32.mrf.mxu1 }
 0xa8a   : > { %v6304_v45 = vadd.f32 %v6295_v37, %v6215_v41  ;;  %v6394_v46 = vadd.f32 %v12215_v43, %v6305_v42  ;;  %v11429_v41 = vld [vmem:[%s14647_s14 + $0x58] sm:$0xff]  ;;  %v11436_v43 = vld [vmem:[%s14647_s14 + $0x70] sm:$0xff] }
 0xa8b   : > { %v6384_v47 = vpop.f32.mrf.mxu1 }
 0xa8c   : > { %v6393_v48 = vadd.f32 %v6384_v47, %v6304_v45  ;;  %v6483_v50 = vadd.f32 %v12220_v44, %v6394_v46  ;;  %v11433_v44 = vld [vmem:[%s14647_s14 + $0x68] sm:$0xff]  ;;  %v11440_v46 = vld [vmem:[%s14647_s14 + $0x80] sm:$0xff] }
 0xa8e   : > { %v6497_v53 = vadd.f32 %v6494_v51, %v6483_v50  ;;  %v6482_v38 = vadd.f32 %v6473_v52, %v6393_v48  ;;  %v11437_v48 = vld [vmem:[%s14647_s14 + $0x78] sm:$0xff]  ;;  %v11441_v51 = vld [vmem:[%s14647_s14 + $0x88] sm:$0xff] }
 0xa90   : > { %v6499_v55 = vmax.f32 %v6497_v53, 0.0  ;;  %v6496_v56 = vadd.f32 %v6489_v54, %v6482_v38 }
 0xa92   : > { %v6504_v57 = vsel %vm6500_vm13, %v6499_v55, 0.0  ;;  %v6498_v58 = vmax.f32 %v6496_v56, 0.0 }
 0xa93   : > { %6506 = vst.msk [vmem:[%s12814_s1 + $0xf8] sm:$0xff] %vm5669_vm0, %v6504_v57 }
 0xa94   : > { %v6503_v59 = vsel %vm6500_vm13, %v6498_v58, 0.0 }
 0xa95   : > { %6505 = vst.msk [vmem:[%s12814_s1 + $0x58] sm:$0xff] %vm5669_vm0, %v6503_v59 }
 0xa9a   : > { %v13820_v60 = vld [vmem:[%s12814_s1 + $0xf8] sm:$0xff] }
 0xa9b   : > { %6994 = vrot.lane.b32.xlu1 %v13820_v60, %s14721_s30  ;;  %6526 = vrot.lane.b32.xlu0 %v13820_v60, %s14734_s8 }
 0xa9c   : > { %v13850_v1 = vld [vmem:[%s12814_s1 + $0x58] sm:$0xff] }
 0xa9f   : > { %7086 = vrot.lane.b32.xlu1 %v13820_v60, %s14735_s2  ;;  %6620 = vrot.lane.b32.xlu0 %v13820_v60, %s14731_s3 }
 0xaa3   : > { %7178 = vrot.lane.b32.xlu1 %v13820_v60, %s14736_s28  ;;  %6716 = vrot.lane.b32.xlu0 %v13820_v60, %s14733_s9 }
 0xaa7   : > { %7270 = vrot.lane.b32.xlu1 %v13820_v60, %s14737_s10  ;;  %6814 = vrot.lane.b32.xlu0 %v13820_v60, %s14720_s4 }
 0xaab   : > { %7361 = vperm.xlu1 %12614, %v7357_v63   ;;  %6522 = vrot.lane.b32.xlu0 %v13850_v1, %s14734_s8 }
 0xaaf   : > { %6616 = vrot.lane.b32.xlu0 %v13850_v1, %s14731_s3  ;;  %s12655_s3 = smov 125  }
 0xab3   : > { %6712 = vrot.lane.b32.xlu0 %v13850_v1, %s14733_s9 }
 0xab7   : > { %6810 = vrot.lane.b32.xlu0 %v13850_v1, %s14720_s4 }
 0xabb   : > { %6992 = vrot.lane.b32.xlu0 %v13850_v1, %s14721_s30 }
 0xabf   : > { %7084 = vrot.lane.b32.xlu0 %v13850_v1, %s14735_s2 }
 0xac3   : > { %7176 = vrot.lane.b32.xlu0 %v13850_v1, %s14736_s28 }
 0xac7   : > { %7268 = vrot.lane.b32.xlu0 %v13850_v1, %s14737_s10 }
 0xacb   : > { %7366 = vperm.xlu0 %12603, %v7358_v2  }
 0xb0d   : > { %v6527_v11 = vpop.permute.xlu0 %6526  ;;  %v6995_v26 = vpop.permute.xlu1 %6994 }
 0xb0e   : > { %v6529_v12 = vsel %vm5685_vm9, %v6525_v3, %v6527_v11 }
 0xb0f   : > { %12221 = vmatprep.subr.mxu1 %v6529_v12 }
 0xb10   : > { %12222 = vmatpush3.msra.mxu1 %v6529_v12 }
 0xb11   : > { %v6621_v13 = vpop.permute.xlu0 %6620  ;;  %v7087_v34 = vpop.permute.xlu1 %7086 }
 0xb12   : > { %v6623_v10 = vsel %vm5773_vm10, %v6619_v4, %v6621_v13 }
 0xb13   : > { %12228 = vmatprep.subr.mxu0 %v6623_v10 }
 0xb14   : > { %12229 = vmatpush3.msra.mxu0 %v6623_v10 }
 0xb15   : > { %v6717_v16 = vpop.permute.xlu0 %6716  ;;  %v7179_v40 = vpop.permute.xlu1 %7178 }
 0xb16   : > { %v6719_v24 = vsel %vm5864_vm12, %v6715_v6, %v6717_v16 }
 0xb19   : > { %v6815_v18 = vpop.permute.xlu0 %6814  ;;  %v7271_v45 = vpop.permute.xlu1 %7270 }
 0xb1a   : > { %v6817_v31 = vsel %vm1384_vm6, %v6813_v7, %v6815_v18 }
 0xb1d   : > { %v6523_v19 = vpop.permute.xlu0 %6522 }
 0xb1e   : > { %v6528_v21 = vsel %vm5685_vm9, %v6521_v8, %v6523_v19 }
 0xb1f   : > { %12223 = vmatprep.subr.mxu1 %v6528_v21 }
 0xb20   : > { %12224 = vmatpush3.msra.mxu1 %v6528_v21 }
 0xb21   : > { %12235 = vmatprep.subr.mxu1 %v6719_v24  ;;  %v6617_v25 = vpop.permute.xlu0 %6616  ;;  %12226 = vmatmul.mubr.msk.f32.vlgmr.msra.gmra.mxu1 %vm6532_vm14, %v11411_v22 }
 0xb22   : > { %12236 = vmatpush3.msra.mxu1 %v6719_v24  ;;  %v6622_v27 = vsel %vm5773_vm10, %v6615_v14, %v6617_v25  ;;  %12239 = vmatprep.mubr.msk.f32.mxu1 %vm6532_vm14, %v11416_v23 }
 0xb23   : > { %12230 = vmatprep.subr.mxu0 %v6622_v27 }
 0xb24   : > { %12231 = vmatpush3.msra.mxu0 %v6622_v27 }
 0xb25   : > { %12242 = vmatprep.subr.mxu0 %v6817_v31  ;;  %v6713_v30 = vpop.permute.xlu0 %6712  ;;  %12233 = vmatmul.mubr.msk.f32.vlgmr.msra.gmra.mxu0 %vm6532_vm14, %v6512_v28 }
 0xb26   : > { %12243 = vmatpush3.msra.mxu0 %v6817_v31  ;;  %v6718_v32 = vsel %vm5864_vm12, %v6711_v17, %v6713_v30  ;;  %12246 = vmatprep.mubr.msk.f32.mxu0 %vm6532_vm14, %v11420_v29  ;;  %v7362_v27 = vpop.permute.xlu1 %7361 }
 0xb27   : > { %12237 = vmatprep.subr.mxu1 %v6718_v32 }
 0xb28   : > { %12238 = vmatpush3.msra.mxu1 %v6718_v32 }
 0xb29   : > { %12249 = vmatprep.subr.mxu1 %v13820_v60  ;;  %v6811_v9 = vpop.permute.xlu0 %6810  ;;  %12240 = vmatmul.mubr.msk.f32.vlgmr.msra.gmra.mxu1 %vm6532_vm14, %v11417_v33 }
 0xb2a   : > { %12250 = vmatpush3.msra.mxu1 %v13820_v60  ;;  %v6816_v15 = vsel %vm1384_vm6, %v6809_v20, %v6811_v9  ;;  %12253 = vmatprep.mubr.msk.f32.mxu1 %vm6532_vm14, %v11424_v5  ;;  %v7402_v9 = vld [vmem:[%s14649_s16 + $0x18] sm:$0xff] }
 0xb2b   : > { %12244 = vmatprep.subr.mxu0 %v6816_v15  ;;  %12251 = vmatprep.subr.mxu1 %v13850_v1 }
 0xb2c   : > { %12245 = vmatpush3.msra.mxu0 %v6816_v15  ;;  %12252 = vmatpush3.msra.mxu1 %v13850_v1  ;;  %v7400_v15 = vld [vmem:[%s14649_s16 + $0x8] sm:$0xff] }
 0xb2d   : > { %12256 = vmatprep.subr.mxu0 %v6995_v26  ;;  %12263 = vmatprep.subr.mxu1 %v7087_v34  ;;  %v6993_v37 = vpop.permute.xlu0 %6992 }
 0xb2e   : > { %12247 = vmatmul.mubr.msk.f32.vlgmr.msra.gmra.mxu0 %vm6532_vm14, %v11421_v35  ;;  %12254 = vmatmul.mubr.msk.f32.vlgmr.msra.gmra.mxu1 %vm6532_vm14, %v11425_v36  ;;  %v7399_v35 = vld [vmem:[%s14649_s16] sm:$0xff] }
 0xb2f   : > { %12257 = vmatpush3.msra.mxu0 %v6995_v26  ;;  %12264 = vmatpush3.msra.mxu1 %v7087_v34  ;;  %v7403_v34 = vld [vmem:[%s14649_s16 + $0x20] sm:$0xf] }
 0xb30   : > { %12258 = vmatprep.subr.mxu0 %v6993_v37  ;;  %12260 = vmatprep.mubr.msk.f32.mxu0 %vm6532_vm14, %v11428_v39 }
 0xb31   : > { %12259 = vmatpush3.msra.mxu0 %v6993_v37  ;;  %v7085_v42 = vpop.permute.xlu0 %7084  ;;  %12267 = vmatprep.mubr.msk.f32.mxu1 %vm6532_vm14, %v11432_v0 }
 0xb32   : > { %12270 = vmatprep.subr.mxu0 %v7179_v40  ;;  %12261 = vmatmul.mubr.msk.f32.vlgmr.msra.gmra.mxu0 %vm6532_vm14, %v11429_v41 }
 0xb33   : > { %12265 = vmatprep.subr.mxu1 %v7085_v42  ;;  %12271 = vmatpush3.msra.mxu0 %v7179_v40 }
 0xb34   : > { %12266 = vmatpush3.msra.mxu1 %v7085_v42  ;;  %12274 = vmatprep.mubr.msk.f32.mxu0 %vm6532_vm14, %v11436_v43 }
 0xb35   : > { %12277 = vmatprep.subr.mxu1 %v7271_v45  ;;  %12268 = vmatmul.mubr.msk.f32.vlgmr.msra.gmra.mxu1 %vm6532_vm14, %v11433_v44  ;;  %v7177_v47 = vpop.permute.xlu0 %7176 }
 0xb36   : > { %12278 = vmatpush3.msra.mxu1 %v7271_v45  ;;  %12272 = vmatprep.subr.mxu0 %v7177_v47 }
 0xb37   : > { %12273 = vmatpush3.msra.mxu0 %v7177_v47  ;;  %12281 = vmatprep.mubr.msk.f32.mxu1 %vm6532_vm14, %v11440_v46  ;;  %v11447_v47 = vld [vmem:[%s14650_s17 + $0x10] sm:$0xff] }
 0xb38   : > { %12275 = vmatmul.mubr.msk.f32.vlgmr.msra.gmra.mxu0 %vm6532_vm14, %v11437_v48  ;;  %12284 = vmatprep.subr.msk.mxu0 %vm885_vm2, %v7403_v34  ;;  %v8342_v48 = vld [vmem:[%s14651_s18 + $0x8] sm:$0xff] }
 0xb39   : > { %v7269_v50 = vpop.permute.xlu0 %7268  ;;  %12285 = vmatpush3.msk.msra.mxu0 %vm885_vm2, %v7403_v34  ;;  %vm7488_vm2 = vcmask 203776   ;;  %v11477_v34 = vld [vmem:[%s14650_s17 + $0x80] sm:$0xff] }
 0xb3a   : > { %12279 = vmatprep.subr.mxu1 %v7269_v50  ;;  %12286 = vmatprep.subr.mxu0 %v7402_v9 }
 0xb3b   : > { %12280 = vmatpush3.msra.mxu1 %v7269_v50  ;;  %12287 = vmatpush3.msra.mxu0 %v7402_v9 }
 0xb3c   : > { %12282 = vmatmul.mubr.msk.f32.vlgmr.msra.gmra.mxu1 %vm6532_vm14, %v11441_v51  ;;  %12288 = vmatprep.subr.mxu0 %v7401_v49  ;;  %v11457_v51 = vld [vmem:[%s14650_s17 + $0x30] sm:$0xff] }
 0xb3d   : > { %12289 = vmatpush3.msra.mxu0 %v7401_v49  ;;  %12301 = vmatprep.mubr.msk.f32.mxu1 %vm6532_vm14, %v11447_v47  ;;  %v11474_v49 = vld [vmem:[%s14650_s17 + $0x78] sm:$0xff] }
 0xb3e   : > { %12290 = vmatprep.subr.mxu0 %v7400_v15 }
 0xb3f   : > { %12291 = vmatpush3.msra.mxu0 %v7400_v15 }
 0xb40   : > { %12292 = vmatprep.subr.mxu0 %v7399_v35 }
 0xb41   : > { %12293 = vmatpush3.msra.mxu0 %v7399_v35  ;;  %v11478_v35 = vld [vmem:[%s14650_s17 + $0x88] sm:$0xff] }
 0xb46   : > { %v7367_v23 = vpop.permute.xlu0 %7366 }
 0xbe1   : > { %v12227_v52 = vpop.f32.mrf.mxu1 }
 0xbe3   : > { %v6605_v53 = vpop.f32.mrf.mxu1 }
 0xbe5   : > { %v12234_v38 = vpop.f32.mrf.mxu0 }
 0xbe6   : > { %v6704_v54 = vadd.f32 %v12234_v38, %v12227_v52  ;;  %v8341_v52 = vld [vmem:[%s14651_s18] sm:$0xff] }
 0xbe7   : > { %v6698_v55 = vpop.f32.mrf.mxu0 }
 0xbe8   : > { %v6699_v56 = vadd.f32 %v6698_v55, %v6605_v53 }
 0xbe9   : > { %v12241_v57 = vpop.f32.mrf.mxu1 }
 0xbea   : > { %v6804_v58 = vadd.f32 %v12241_v57, %v6704_v54 }
 0xbeb   : > { %v6794_v59 = vpop.f32.mrf.mxu1 }
 0xbec   : > { %v6803_v60 = vadd.f32 %v6794_v59, %v6699_v56 }
 0xbee   : > { %v12248_v61 = vpop.f32.mrf.mxu0  ;;  %v12255_v62 = vpop.f32.mrf.mxu1 }
 0xbef   : > { %v6902_v63 = vadd.f32 %v12248_v61, %v6804_v58 }
 0xbf0   : > { %v6892_v1 = vpop.f32.mrf.mxu0  ;;  %v6978_v2 = vpop.f32.mrf.mxu1 }
 0xbf1   : > { %v6901_v3 = vadd.f32 %v6892_v1, %v6803_v60  ;;  %v6988_v4 = vadd.f32 %v12255_v62, %v6902_v63 }
 0xbf2   : > { %v12262_v6 = vpop.f32.mrf.mxu0 }
 0xbf3   : > { %v6987_v7 = vadd.f32 %v6978_v2, %v6901_v3  ;;  %v7080_v8 = vadd.f32 %v12262_v6, %v6988_v4  ;;  %v11448_v6 = vld [vmem:[%s14650_s17 + $0x18] sm:$0xff] }
 0xbf4   : > { %v7070_v11 = vpop.f32.mrf.mxu0 }
 0xbf5   : > { %v12269_v12 = vpop.f32.mrf.mxu1  ;;  %v7079_v13 = vadd.f32 %v7070_v11, %v6987_v7  ;;  %v7496_v7 = vld [vmem:[%s14650_s17] sm:$0xff] }
 0xbf6   : > { %v7172_v14 = vadd.f32 %v12269_v12, %v7080_v8 }
 0xbf7   : > { %v7162_v10 = vpop.f32.mrf.mxu1 }
 0xbf8   : > { %v12276_v16 = vpop.f32.mrf.mxu0  ;;  %v7171_v18 = vadd.f32 %v7162_v10, %v7079_v13  ;;  %v11453_v10 = vld [vmem:[%s14650_s17 + $0x20] sm:$0xff] }
 0xbf9   : > { %v7264_v19 = vadd.f32 %v12276_v16, %v7172_v14  ;;  %v7497_v14 = vld [vmem:[%s14650_s17 + $0x8] sm:$0xff] }
 0xbfa   : > { %v7254_v17 = vpop.f32.mrf.mxu0 }
 0xbfb   : > { %v7263_v21 = vadd.f32 %v7254_v17, %v7171_v18 }
 0xbfc   : > { %v12283_v20 = vpop.f32.mrf.mxu1 }
 0xbfd   : > { %v7356_v22 = vadd.f32 %v12283_v20, %v7264_v19  ;;  %v11454_v19 = vld [vmem:[%s14650_s17 + $0x28] sm:$0xff]  ;;  %v11461_v20 = vld [vmem:[%s14650_s17 + $0x40] sm:$0xff] }
 0xbfe   : > { %v7346_v24 = vpop.f32.mrf.mxu1 }
 0xbff   : > { %v7370_v25 = vadd.f32 %v7367_v23, %v7356_v22  ;;  %v7355_v26 = vadd.f32 %v7346_v24, %v7263_v21  ;;  %v11458_v24 = vld [vmem:[%s14650_s17 + $0x38] sm:$0xff] }
 0xc01   : > { %v7372_v28 = vmax.f32 %v7370_v25, 0.0  ;;  %v7369_v29 = vadd.f32 %v7362_v27, %v7355_v26  ;;  %v11462_v25 = vld [vmem:[%s14650_s17 + $0x48] sm:$0xff]  ;;  %v11465_v27 = vld [vmem:[%s14650_s17 + $0x50] sm:$0xff] }
 0xc03   : > { %v7374_v31 = vsel %vm6500_vm13, %v7372_v28, 0.0  ;;  %v7371_v30 = vmax.f32 %v7369_v29, 0.0  ;;  %v11469_v29 = vld [vmem:[%s14650_s17 + $0x60] sm:$0xff] }
 0xc04   : > { %7376 = vst.msk [vmem:[%s12814_s1 + $0x100] sm:$0xff] %vm5669_vm0, %v7374_v31  ;;  %v11466_v31 = vld [vmem:[%s14650_s17 + $0x58] sm:$0xff] }
 0xc05   : > { %v7373_v32 = vsel %vm6500_vm13, %v7371_v30, 0.0 }
 0xc06   : > { %7375 = vst.msk [vmem:[%s12814_s1 + $0x60] sm:$0xff] %vm5669_vm0, %v7373_v32  ;;  %v11473_v32 = vld [vmem:[%s14650_s17 + $0x70] sm:$0xff] }
 0xc0b   : > { %v7378_v33 = vld [vmem:[%s12814_s1 + $0x100] sm:$0xff] }
 0xc0c   : > { %7383 = vrot.lane.b32.xlu0 %v7378_v33, %s14721_s30 }
 0xc0d   : > { %v7377_v5 = vld [vmem:[%s12814_s1 + $0x60] sm:$0xff] }
 0xc0e   : > { %7381 = vrot.lane.b32.xlu1 %v7377_v5, %s14721_s30 }
 0xc7e   : > { %v7384_v36 = vpop.permute.xlu0 %7383 }
 0xc7f   : > { %v7388_v37 = vmax.f32 %v7378_v33, %v7384_v36 }
 0xc80   : > { %v7382_v39 = vpop.permute.xlu1 %7381 }
 0xc81   : > { %v7387_v40 = vmax.f32 %v7377_v5, %v7382_v39  ;;  %7393 = vrot.lane.b32.xlu0 %v7388_v37, %s14736_s28 }
 0xc83   : > { %7391 = vrot.lane.b32.xlu1 %v7387_v40, %s14736_s28 }
 0xc87   : > { %7509 = vrot.lane.b32.xlu1 %v7378_v33, %s14733_s9 }
 0xc8b   : > { %7505 = vrot.lane.b32.xlu1 %v7377_v5, %s14733_s9 }
 0xc8f   : > { %7602 = vrot.lane.b32.xlu1 %v7378_v33, %s14734_s8 }
 0xc93   : > { %7598 = vrot.lane.b32.xlu1 %v7377_v5, %s14734_s8 }
 0xc97   : > { %7698 = vrot.lane.b32.xlu1 %v7378_v33, %s12652_s12 }
 0xc9b   : > { %7694 = vrot.lane.b32.xlu1 %v7377_v5, %s12652_s12 }
 0xc9f   : > { %7796 = vrot.lane.b32.xlu1 %v7378_v33, %s14720_s4  ;;  %v11470_v33 = vld [vmem:[%s14650_s17 + $0x68] sm:$0xff] }
 0xca3   : > { %7792 = vrot.lane.b32.xlu1 %v7377_v5, %s14720_s4 }
 0xcf3   : > { %v7394_v0 = vpop.permute.xlu0 %7393 }
 0xcf4   : > { %v7398_v43 = vmax.f32 %v7388_v37, %v7394_v0 }
 0xcf5   : > { %v7392_v41 = vpop.permute.xlu1 %7391 }
 0xcf6   : > { %v7397_v42 = vmax.f32 %v7387_v40, %v7392_v41 }
 0xcf8   : > { %12294 = vmatprep.mubr.msk.f32.mxu0 %vm5669_vm0, %v7397_v42 }
 0xcf9   : > { %12295 = vmatmul.mubr.msk.f32.vlgmr.msra.gmra.mxu0 %vm5669_vm0, %v7398_v43  ;;  %v7510_v53 = vpop.permute.xlu1 %7509 }
 0xcfa   : > { %12322 = vmatprep.mubr.msk.f32.mxu0 %vm6532_vm14, %v11457_v51 }
 0xcfd   : > { %v7506_v38 = vpop.permute.xlu1 %7505 }
 0xd01   : > { %v7603_v54 = vpop.permute.xlu1 %7602 }
 0xd05   : > { %v7599_v55 = vpop.permute.xlu1 %7598 }
 0xd09   : > { %v7699_v56 = vpop.permute.xlu1 %7698 }
 0xd0d   : > { %v7695_v60 = vpop.permute.xlu1 %7694 }
 0xd11   : > { %v7797_v62 = vpop.permute.xlu1 %7796 }
 0xd15   : > { %v7793_v3 = vpop.permute.xlu1 %7792 }
 0xdb9   : > { %v12296_v44 = vpop.f32.mrf.mxu0 }
 0xdba   : > { %7490 = vst.msk [vmem:[%s12814_s1 + $0x108] sm:$0xff] %vm7488_vm2, %v12296_v44 }
 0xdbb   : > { %v7479_v45 = vpop.f32.mrf.mxu0 }
 0xdbc   : > { %7489 = vst.msk [vmem:[%s12814_s1 + $0x68] sm:$0xff] %vm7488_vm2, %v7479_v45 }
 0xdc1   : > { %v13993_v46 = vld [vmem:[%s12814_s1 + $0x108] sm:$0xff] }
 0xdc2   : > { %7978 = vrot.lane.b32.xlu1 %v13993_v46, %s14721_s30  ;;  %7511 = vrot.lane.b32.xlu0 %v13993_v46, %s14733_s9 }
 0xdc3   : > { %v14019_v50 = vld [vmem:[%s12814_s1 + $0x68] sm:$0xff] }
 0xdc6   : > { %8070 = vrot.lane.b32.xlu1 %v13993_v46, %s12653_s13  ;;  %7604 = vrot.lane.b32.xlu0 %v13993_v46, %s14734_s8 }
 0xdca   : > { %8162 = vrot.lane.b32.xlu1 %v13993_v46, %s14735_s2  ;;  %7700 = vrot.lane.b32.xlu0 %v13993_v46, %s12652_s12 }
 0xdce   : > { %8254 = vrot.lane.b32.xlu1 %v13993_v46, %s14736_s28  ;;  %7798 = vrot.lane.b32.xlu0 %v13993_v46, %s14720_s4 }
 0xdd2   : > { %8350 = vperm.xlu1 %12614, %v8342_v48   ;;  %7507 = vrot.lane.b32.xlu0 %v14019_v50, %s14733_s9 }
 0xdd6   : > { %8381 = vrot.lane.b32.xlu1 %v13993_v46, %s14733_s9  ;;  %7600 = vrot.lane.b32.xlu0 %v14019_v50, %s14734_s8 }
 0xdda   : > { %8474 = vrot.lane.b32.xlu1 %v13993_v46, %s14734_s8  ;;  %7696 = vrot.lane.b32.xlu0 %v14019_v50, %s12652_s12 }
 0xdde   : > { %8570 = vrot.lane.b32.xlu1 %v13993_v46, %s12652_s12  ;;  %7794 = vrot.lane.b32.xlu0 %v14019_v50, %s14720_s4 }
 0xde2   : > { %8668 = vrot.lane.b32.xlu1 %v13993_v46, %s14720_s4  ;;  %7976 = vrot.lane.b32.xlu0 %v14019_v50, %s14721_s30 }
 0xde6   : > { %8377 = vrot.lane.b32.xlu1 %v14019_v50, %s14733_s9  ;;  %8068 = vrot.lane.b32.xlu0 %v14019_v50, %s12653_s13 }
 0xdea   : > { %8470 = vrot.lane.b32.xlu1 %v14019_v50, %s14734_s8  ;;  %8160 = vrot.lane.b32.xlu0 %v14019_v50, %s14735_s2 }
 0xdee   : > { %8566 = vrot.lane.b32.xlu1 %v14019_v50, %s12652_s12  ;;  %8252 = vrot.lane.b32.xlu0 %v14019_v50, %s14736_s28 }
 0xdf2   : > { %8664 = vrot.lane.b32.xlu1 %v14019_v50, %s14720_s4  ;;  %8345 = vperm.xlu0 %12603, %v8341_v52  }
 0xe34   : > { %v7512_v57 = vpop.permute.xlu0 %7511  ;;  %v7979_v12 = vpop.permute.xlu1 %7978 }
 0xe35   : > { %v7514_v58 = vsel %vm5864_vm12, %v7510_v53, %v7512_v57 }
 0xe36   : > { %12297 = vmatprep.subr.mxu1 %v7514_v58 }
 0xe37   : > { %12298 = vmatpush3.msra.mxu1 %v7514_v58 }
 0xe38   : > { %v7605_v59 = vpop.permute.xlu0 %7604  ;;  %v8071_v21 = vpop.permute.xlu1 %8070 }
 0xe39   : > { %v7607_v8 = vsel %vm5685_vm9, %v7603_v54, %v7605_v59 }
 0xe3c   : > { %v7701_v61 = vpop.permute.xlu0 %7700  ;;  %v8163_v28 = vpop.permute.xlu1 %8162 }
 0xe3d   : > { %v7703_v16 = vsel %vm881_vm4, %v7699_v56, %v7701_v61 }
 0xe40   : > { %v7799_v63 = vpop.permute.xlu0 %7798  ;;  %v8255_v5 = vpop.permute.xlu1 %8254 }
 0xe41   : > { %v7801_v1 = vsel %vm1384_vm6, %v7797_v62, %v7799_v63 }
 0xe42   : > { %12318 = vmatprep.subr.mxu0 %v7801_v1 }
 0xe43   : > { %12319 = vmatpush3.msra.mxu0 %v7801_v1 }
 0xe44   : > { %v7508_v2 = vpop.permute.xlu0 %7507 }
 0xe45   : > { %v7513_v4 = vsel %vm5864_vm12, %v7506_v38, %v7508_v2 }
 0xe46   : > { %12299 = vmatprep.subr.mxu1 %v7513_v4 }
 0xe47   : > { %12300 = vmatpush3.msra.mxu1 %v7513_v4  ;;  %v14139_v4 = vld [vmem:[%s14715_s0 + $0x3] ss:$0 sm:$0xff] }
 0xe48   : > { %12304 = vmatprep.subr.mxu1 %v7607_v8  ;;  %v7601_v11 = vpop.permute.xlu0 %7600  ;;  %12302 = vmatmul.mubr.msk.f32.vlgmr.msra.gmra.mxu1 %vm6532_vm14, %v11448_v6  ;;  %vm8357_vm15 = vcmp.gt.f32.partialorder %v14139_v4, 0.0  ;;  %v9256_v4 = vld [vmem:[%s14654_s21 + $0x8] sm:$0xff] }
 0xe49   : > { %12305 = vmatpush3.msra.mxu1 %v7607_v8  ;;  %v7606_v13 = vsel %vm5685_vm9, %v7599_v55, %v7601_v11  ;;  %12308 = vmatprep.mubr.msk.f32.mxu1 %vm6532_vm14, %v7496_v7 }
 0xe4a   : > { %12306 = vmatprep.subr.mxu1 %v7606_v13 }
 0xe4b   : > { %12307 = vmatpush3.msra.mxu1 %v7606_v13 }
 0xe4c   : > { %12311 = vmatprep.subr.mxu1 %v7703_v16  ;;  %v7697_v17 = vpop.permute.xlu0 %7696  ;;  %12309 = vmatmul.mubr.msk.f32.vlgmr.msra.gmra.mxu1 %vm6532_vm14, %v7497_v14 }
 0xe4d   : > { %12312 = vmatpush3.msra.mxu1 %v7703_v16  ;;  %v7702_v18 = vsel %vm881_vm4, %v7695_v60, %v7697_v17  ;;  %12315 = vmatprep.mubr.msk.f32.mxu1 %vm6532_vm14, %v11453_v10  ;;  %v8351_v7 = vpop.permute.xlu1 %8350 }
 0xe4e   : > { %12313 = vmatprep.subr.mxu1 %v7702_v18 }
 0xe4f   : > { %12314 = vmatpush3.msra.mxu1 %v7702_v18 }
 0xe50   : > { %12325 = vmatprep.subr.mxu1 %v13993_v46  ;;  %v7795_v22 = vpop.permute.xlu0 %7794  ;;  %12316 = vmatmul.mubr.msk.f32.vlgmr.msra.gmra.mxu1 %vm6532_vm14, %v11454_v19 }
 0xe51   : > { %12326 = vmatpush3.msra.mxu1 %v13993_v46  ;;  %v7800_v23 = vsel %vm1384_vm6, %v7793_v3, %v7795_v22  ;;  %12329 = vmatprep.mubr.msk.f32.mxu1 %vm6532_vm14, %v11461_v20  ;;  %v11481_v20 = vld [vmem:[%s14652_s19 + $0x10] sm:$0xff]  ;;  %v9213_v22 = vld [vmem:[%s14653_s20] sm:$0xff] }
 0xe52   : > { %12320 = vmatprep.subr.mxu0 %v7800_v23  ;;  %12327 = vmatprep.subr.mxu1 %v14019_v50 }
 0xe53   : > { %12321 = vmatpush3.msra.mxu0 %v7800_v23  ;;  %12328 = vmatpush3.msra.mxu1 %v14019_v50 }
 0xe54   : > { %12323 = vmatmul.mubr.msk.f32.vlgmr.msra.gmra.mxu0 %vm6532_vm14, %v11458_v24  ;;  %12332 = vmatprep.subr.mxu0 %v7979_v12  ;;  %v7977_v26 = vpop.permute.xlu0 %7976  ;;  %v9214_v24 = vld [vmem:[%s14653_s20 + $0x8] sm:$0xff] }
 0xe55   : > { %12339 = vmatprep.subr.mxu1 %v8071_v21  ;;  %12330 = vmatmul.mubr.msk.f32.vlgmr.msra.gmra.mxu1 %vm6532_vm14, %v11462_v25  ;;  %v8382_v25 = vpop.permute.xlu1 %8381 }
 0xe56   : > { %12333 = vmatpush3.msra.mxu0 %v7979_v12  ;;  %12340 = vmatpush3.msra.mxu1 %v8071_v21  ;;  %v8368_v21 = vld [vmem:[%s14652_s19] sm:$0xff] }
 0xe57   : > { %12334 = vmatprep.subr.mxu0 %v7977_v26  ;;  %12336 = vmatprep.mubr.msk.f32.mxu0 %vm6532_vm14, %v11465_v27 }
 0xe58   : > { %12335 = vmatpush3.msra.mxu0 %v7977_v26  ;;  %v8069_v30 = vpop.permute.xlu0 %8068  ;;  %12343 = vmatprep.mubr.msk.f32.mxu1 %vm6532_vm14, %v11469_v29 }
 0xe59   : > { %12337 = vmatmul.mubr.msk.f32.vlgmr.msra.gmra.mxu0 %vm6532_vm14, %v11466_v31  ;;  %12346 = vmatprep.subr.mxu0 %v8163_v28  ;;  %v8475_v26 = vpop.permute.xlu1 %8474 }
 0xe5a   : > { %12341 = vmatprep.subr.mxu1 %v8069_v30  ;;  %12347 = vmatpush3.msra.mxu0 %v8163_v28 }
 0xe5b   : > { %12342 = vmatpush3.msra.mxu1 %v8069_v30  ;;  %12350 = vmatprep.mubr.msk.f32.mxu0 %vm6532_vm14, %v11473_v32 }
 0xe5c   : > { %12344 = vmatmul.mubr.msk.f32.vlgmr.msra.gmra.mxu1 %vm6532_vm14, %v11470_v33  ;;  %12353 = vmatprep.subr.mxu1 %v8255_v5  ;;  %v8161_v9 = vpop.permute.xlu0 %8160 }
 0xe5d   : > { %12354 = vmatpush3.msra.mxu1 %v8255_v5  ;;  %12348 = vmatprep.subr.mxu0 %v8161_v9  ;;  %v8571_v27 = vpop.permute.xlu1 %8570 }
 0xe5e   : > { %12349 = vmatpush3.msra.mxu0 %v8161_v9  ;;  %12357 = vmatprep.mubr.msk.f32.mxu1 %vm6532_vm14, %v11477_v34 }
 0xe5f   : > { %12351 = vmatmul.mubr.msk.f32.vlgmr.msra.gmra.mxu0 %vm6532_vm14, %v11474_v49 }
 0xe60   : > { %v8253_v15 = vpop.permute.xlu0 %8252  ;;  %12364 = vmatprep.mubr.msk.f32.mxu0 %vm6532_vm14, %v11481_v20 }
 0xe61   : > { %12355 = vmatprep.subr.mxu1 %v8253_v15  ;;  %v8669_v28 = vpop.permute.xlu1 %8668 }
 0xe62   : > { %12356 = vmatpush3.msra.mxu1 %v8253_v15 }
 0xe63   : > { %12358 = vmatmul.mubr.msk.f32.vlgmr.msra.gmra.mxu1 %vm6532_vm14, %v11478_v35 }
 0xe64   : > { %12371 = vmatprep.mubr.msk.f32.mxu1 %vm6532_vm14, %v8368_v21 }
 0xe65   : > { %v8378_v29 = vpop.permute.xlu1 %8377 }
 0xe69   : > { %v8471_v33 = vpop.permute.xlu1 %8470 }
 0xe6d   : > { %v8346_v13 = vpop.permute.xlu0 %8345  ;;  %v8567_v9 = vpop.permute.xlu1 %8566 }
 0xe71   : > { %v8665_v35 = vpop.permute.xlu1 %8664 }
 0xf08   : > { %v12303_v36 = vpop.f32.mrf.mxu1 }
 0xf0a   : > { %v7589_v37 = vpop.f32.mrf.mxu1 }
 0xf0c   : > { %v12310_v39 = vpop.f32.mrf.mxu1 }
 0xf0d   : > { %v7688_v40 = vadd.f32 %v12310_v39, %v12303_v36  ;;  %v11487_v39 = vld [vmem:[%s14652_s19 + $0x20] sm:$0xff] }
 0xf0e   : > { %v7682_v0 = vpop.f32.mrf.mxu1 }
 0xf0f   : > { %v7683_v42 = vadd.f32 %v7682_v0, %v7589_v37  ;;  %v11482_v37 = vld [vmem:[%s14652_s19 + $0x18] sm:$0xff] }
 0xf10   : > { %v12317_v41 = vpop.f32.mrf.mxu1 }
 0xf11   : > { %v7788_v43 = vadd.f32 %v12317_v41, %v7688_v40 }
 0xf12   : > { %v7778_v44 = vpop.f32.mrf.mxu1 }
 0xf13   : > { %v7787_v46 = vadd.f32 %v7778_v44, %v7683_v42  ;;  %v11491_v44 = vld [vmem:[%s14652_s19 + $0x30] sm:$0xff] }
 0xf14   : > { %v12324_v45 = vpop.f32.mrf.mxu0 }
 0xf15   : > { %v7886_v47 = vadd.f32 %v12324_v45, %v7788_v43  ;;  %v12331_v48 = vpop.f32.mrf.mxu1  ;;  %v8369_v43 = vld [vmem:[%s14652_s19 + $0x8] sm:$0xff] }
 0xf16   : > { %v7876_v50 = vpop.f32.mrf.mxu0 }
 0xf17   : > { %v7885_v51 = vadd.f32 %v7876_v50, %v7787_v46  ;;  %v7962_v52 = vpop.f32.mrf.mxu1  ;;  %v7972_v53 = vadd.f32 %v12331_v48, %v7886_v47  ;;  %v11488_v48 = vld [vmem:[%s14652_s19 + $0x28] sm:$0xff]  ;;  %v11495_v50 = vld [vmem:[%s14652_s19 + $0x40] sm:$0xff] }
 0xf19   : > { %v12338_v38 = vpop.f32.mrf.mxu0  ;;  %v7971_v54 = vadd.f32 %v7962_v52, %v7885_v51 }
 0xf1a   : > { %v8064_v56 = vadd.f32 %v12338_v38, %v7972_v53  ;;  %v11492_v38 = vld [vmem:[%s14652_s19 + $0x38] sm:$0xff] }
 0xf1b   : > { %v8054_v55 = vpop.f32.mrf.mxu0 }
 0xf1c   : > { %v12345_v57 = vpop.f32.mrf.mxu1  ;;  %v8063_v58 = vadd.f32 %v8054_v55, %v7971_v54  ;;  %v11496_v54 = vld [vmem:[%s14652_s19 + $0x48] sm:$0xff] }
 0xf1d   : > { %v8156_v61 = vadd.f32 %v12345_v57, %v8064_v56  ;;  %v11499_v56 = vld [vmem:[%s14652_s19 + $0x50] sm:$0xff] }
 0xf1e   : > { %v8146_v59 = vpop.f32.mrf.mxu1 }
 0xf1f   : > { %v12352_v60 = vpop.f32.mrf.mxu0  ;;  %v8155_v63 = vadd.f32 %v8146_v59, %v8063_v58  ;;  %v11503_v58 = vld [vmem:[%s14652_s19 + $0x60] sm:$0xff]  ;;  %v11500_v59 = vld [vmem:[%s14652_s19 + $0x58] sm:$0xff] }
 0xf20   : > { %v8248_v1 = vadd.f32 %v12352_v60, %v8156_v61  ;;  %v11507_v61 = vld [vmem:[%s14652_s19 + $0x70] sm:$0xff] }
 0xf21   : > { %v8238_v62 = vpop.f32.mrf.mxu0 }
 0xf22   : > { %v8247_v3 = vadd.f32 %v8238_v62, %v8155_v63  ;;  %v11504_v62 = vld [vmem:[%s14652_s19 + $0x68] sm:$0xff] }
 0xf23   : > { %v12359_v2 = vpop.f32.mrf.mxu1 }
 0xf24   : > { %v8340_v6 = vadd.f32 %v12359_v2, %v8248_v1  ;;  %v11511_v1 = vld [vmem:[%s14652_s19 + $0x80] sm:$0xff] }
 0xf25   : > { %v8330_v8 = vpop.f32.mrf.mxu1 }
 0xf26   : > { %v8354_v11 = vadd.f32 %v8351_v7, %v8340_v6  ;;  %v8339_v12 = vadd.f32 %v8330_v8, %v8247_v3  ;;  %v11508_v3 = vld [vmem:[%s14652_s19 + $0x78] sm:$0xff]  ;;  %v11512_v7 = vld [vmem:[%s14652_s19 + $0x88] sm:$0xff] }
 0xf28   : > { %v8356_v14 = vmax.f32 %v8354_v11, 0.0  ;;  %v8353_v10 = vadd.f32 %v8346_v13, %v8339_v12 }
 0xf2a   : > { %v8361_v16 = vsel %vm8357_vm15, %v8356_v14, 0.0  ;;  %v8355_v17 = vmax.f32 %v8353_v10, 0.0 }
 0xf2b   : > { %8363 = vst.msk [vmem:[%s12814_s1 + $0x110] sm:$0xff] %vm7488_vm2, %v8361_v16 }
 0xf2c   : > { %v8360_v18 = vsel %vm8357_vm15, %v8355_v17, 0.0 }
 0xf2d   : > { %8362 = vst.msk [vmem:[%s12814_s1 + $0x70] sm:$0xff] %vm7488_vm2, %v8360_v18 }
 0xf32   : > { %v14151_v19 = vld [vmem:[%s12814_s1 + $0x110] sm:$0xff] }
 0xf33   : > { %8850 = vrot.lane.b32.xlu1 %v14151_v19, %s14721_s30  ;;  %8383 = vrot.lane.b32.xlu0 %v14151_v19, %s14733_s9 }
 0xf34   : > { %v14181_v23 = vld [vmem:[%s12814_s1 + $0x70] sm:$0xff] }
 0xf37   : > { %8942 = vrot.lane.b32.xlu1 %v14151_v19, %s12653_s13  ;;  %8476 = vrot.lane.b32.xlu0 %v14151_v19, %s14734_s8 }
 0xf3b   : > { %9034 = vrot.lane.b32.xlu1 %v14151_v19, %s14735_s2  ;;  %8572 = vrot.lane.b32.xlu0 %v14151_v19, %s12652_s12 }
 0xf3f   : > { %9126 = vrot.lane.b32.xlu1 %v14151_v19, %s14736_s28  ;;  %8670 = vrot.lane.b32.xlu0 %v14151_v19, %s14720_s4 }
 0xf43   : > { %9217 = vperm.xlu1 %12614, %v9213_v22   ;;  %8379 = vrot.lane.b32.xlu0 %v14181_v23, %s14733_s9 }
 0xf47   : > { %8472 = vrot.lane.b32.xlu0 %v14181_v23, %s14734_s8 }
 0xf4b   : > { %8568 = vrot.lane.b32.xlu0 %v14181_v23, %s12652_s12 }
 0xf4f   : > { %8666 = vrot.lane.b32.xlu0 %v14181_v23, %s14720_s4 }
 0xf53   : > { %8848 = vrot.lane.b32.xlu0 %v14181_v23, %s14721_s30 }
 0xf57   : > { %8940 = vrot.lane.b32.xlu0 %v14181_v23, %s12653_s13 }
 0xf5b   : > { %9032 = vrot.lane.b32.xlu0 %v14181_v23, %s14735_s2 }
 0xf5f   : > { %9124 = vrot.lane.b32.xlu0 %v14181_v23, %s14736_s28  ;;  %s12654_s28 = smov 3  }
 0xf63   : > { %9222 = vperm.xlu0 %12603, %v9214_v24  }
 0xfa5   : > { %v8384_v31 = vpop.permute.xlu0 %8383  ;;  %v8851_v41 = vpop.permute.xlu1 %8850 }
 0xfa6   : > { %v8386_v30 = vsel %vm5864_vm12, %v8382_v25, %v8384_v31 }
 0xfa7   : > { %12360 = vmatprep.subr.mxu0 %v8386_v30 }
 0xfa8   : > { %12361 = vmatpush3.msra.mxu0 %v8386_v30 }
 0xfa9   : > { %v8477_v32 = vpop.permute.xlu0 %8476  ;;  %v8943_v51 = vpop.permute.xlu1 %8942 }
 0xfaa   : > { %v8479_v5 = vsel %vm5685_vm9, %v8475_v26, %v8477_v32 }
 0xfab   : > { %12367 = vmatprep.subr.mxu1 %v8479_v5 }
 0xfac   : > { %12368 = vmatpush3.msra.mxu1 %v8479_v5 }
 0xfad   : > { %v8573_v34 = vpop.permute.xlu0 %8572  ;;  %v9035_v57 = vpop.permute.xlu1 %9034 }
 0xfae   : > { %v8575_v40 = vsel %vm881_vm4, %v8571_v27, %v8573_v34 }
 0xfb1   : > { %v8671_v49 = vpop.permute.xlu0 %8670  ;;  %v9127_v63 = vpop.permute.xlu1 %9126 }
 0xfb2   : > { %v8673_v45 = vsel %vm1384_vm6, %v8669_v28, %v8671_v49 }
 0xfb5   : > { %v8380_v15 = vpop.permute.xlu0 %8379 }
 0xfb6   : > { %v8385_v36 = vsel %vm5864_vm12, %v8378_v29, %v8380_v15 }
 0xfb7   : > { %12362 = vmatprep.subr.mxu0 %v8385_v36 }
 0xfb8   : > { %12363 = vmatpush3.msra.mxu0 %v8385_v36 }
 0xfb9   : > { %12374 = vmatprep.subr.mxu0 %v8575_v40  ;;  %v8473_v0 = vpop.permute.xlu0 %8472  ;;  %12365 = vmatmul.mubr.msk.f32.vlgmr.msra.gmra.mxu0 %vm6532_vm14, %v11482_v37 }
 0xfba   : > { %12375 = vmatpush3.msra.mxu0 %v8575_v40  ;;  %v8478_v42 = vsel %vm5685_vm9, %v8471_v33, %v8473_v0  ;;  %12378 = vmatprep.mubr.msk.f32.mxu0 %vm6532_vm14, %v11487_v39 }
 0xfbb   : > { %12369 = vmatprep.subr.mxu1 %v8478_v42 }
 0xfbc   : > { %12370 = vmatpush3.msra.mxu1 %v8478_v42 }
 0xfbd   : > { %12381 = vmatprep.subr.mxu1 %v8673_v45  ;;  %v8569_v46 = vpop.permute.xlu0 %8568  ;;  %12372 = vmatmul.mubr.msk.f32.vlgmr.msra.gmra.mxu1 %vm6532_vm14, %v8369_v43 }
 0xfbe   : > { %12382 = vmatpush3.msra.mxu1 %v8673_v45  ;;  %v8574_v47 = vsel %vm881_vm4, %v8567_v9, %v8569_v46  ;;  %12385 = vmatprep.mubr.msk.f32.mxu1 %vm6532_vm14, %v11491_v44  ;;  %v9218_v42 = vpop.permute.xlu1 %9217 }
 0xfbf   : > { %12376 = vmatprep.subr.mxu0 %v8574_v47 }
 0xfc0   : > { %12377 = vmatpush3.msra.mxu0 %v8574_v47 }
 0xfc1   : > { %12388 = vmatprep.subr.mxu0 %v14151_v19  ;;  %v8667_v52 = vpop.permute.xlu0 %8666  ;;  %12379 = vmatmul.mubr.msk.f32.vlgmr.msra.gmra.mxu0 %vm6532_vm14, %v11488_v48 }
 0xfc2   : > { %12389 = vmatpush3.msra.mxu0 %v14151_v19  ;;  %v8672_v53 = vsel %vm1384_vm6, %v8665_v35, %v8667_v52  ;;  %12392 = vmatprep.mubr.msk.f32.mxu0 %vm6532_vm14, %v11495_v50  ;;  %v9257_v52 = vld [vmem:[%s14654_s21 + $0x10] sm:$0xff] }
 0xfc3   : > { %12383 = vmatprep.subr.mxu1 %v8672_v53  ;;  %12390 = vmatprep.subr.mxu0 %v14181_v23 }
 0xfc4   : > { %12384 = vmatpush3.msra.mxu1 %v8672_v53  ;;  %12391 = vmatpush3.msra.mxu0 %v14181_v23  ;;  %v9255_v53 = vld [vmem:[%s14654_s21] sm:$0xff] }
 0xfc5   : > { %12395 = vmatprep.subr.mxu1 %v8851_v41  ;;  %12402 = vmatprep.subr.mxu0 %v8943_v51  ;;  %v8849_v55 = vpop.permute.xlu0 %8848 }
 0xfc6   : > { %12386 = vmatmul.mubr.msk.f32.vlgmr.msra.gmra.mxu1 %vm6532_vm14, %v11492_v38  ;;  %12393 = vmatmul.mubr.msk.f32.vlgmr.msra.gmra.mxu0 %vm6532_vm14, %v11496_v54 }
 0xfc7   : > { %12396 = vmatpush3.msra.mxu1 %v8851_v41  ;;  %12403 = vmatpush3.msra.mxu0 %v8943_v51  ;;  %v9258_v51 = vld [vmem:[%s14654_s21 + $0x18] sm:$0x1] }
 0xfc8   : > { %12397 = vmatprep.subr.mxu1 %v8849_v55  ;;  %12399 = vmatprep.mubr.msk.f32.mxu1 %vm6532_vm14, %v11499_v56 }
 0xfc9   : > { %12398 = vmatpush3.msra.mxu1 %v8849_v55  ;;  %v8941_v60 = vpop.permute.xlu0 %8940  ;;  %12406 = vmatprep.mubr.msk.f32.mxu0 %vm6532_vm14, %v11503_v58 }
 0xfca   : > { %12409 = vmatprep.subr.mxu1 %v9035_v57  ;;  %12400 = vmatmul.mubr.msk.f32.vlgmr.msra.gmra.mxu1 %vm6532_vm14, %v11500_v59 }
 0xfcb   : > { %12404 = vmatprep.subr.mxu0 %v8941_v60  ;;  %12410 = vmatpush3.msra.mxu1 %v9035_v57 }
 0xfcc   : > { %12405 = vmatpush3.msra.mxu0 %v8941_v60  ;;  %12413 = vmatprep.mubr.msk.f32.mxu1 %vm6532_vm14, %v11507_v61 }
 0xfcd   : > { %12416 = vmatprep.subr.mxu0 %v9127_v63  ;;  %12407 = vmatmul.mubr.msk.f32.vlgmr.msra.gmra.mxu0 %vm6532_vm14, %v11504_v62  ;;  %v9033_v2 = vpop.permute.xlu0 %9032 }
 0xfce   : > { %12417 = vmatpush3.msra.mxu0 %v9127_v63  ;;  %12411 = vmatprep.subr.mxu1 %v9033_v2 }
 0xfcf   : > { %12412 = vmatpush3.msra.mxu1 %v9033_v2  ;;  %12420 = vmatprep.mubr.msk.f32.mxu0 %vm6532_vm14, %v11511_v1  ;;  %v11518_v1 = vld [vmem:[%s14655_s22 + $0x10] sm:$0xff]  ;;  %v10198_v2 = vld [vmem:[%s14656_s23 + $0x8] sm:$0xff] }
 0xfd0   : > { %12414 = vmatmul.mubr.msk.f32.vlgmr.msra.gmra.mxu1 %vm6532_vm14, %v11508_v3  ;;  %12423 = vmatprep.subr.msk.mxu1 %vm9265_vm11, %v9258_v51  ;;  %v11524_v3 = vld [vmem:[%s14655_s22 + $0x20] sm:$0xff] }
 0xfd1   : > { %v9125_v6 = vpop.permute.xlu0 %9124  ;;  %12424 = vmatpush3.msk.msra.mxu1 %vm9265_vm11, %v9258_v51 }
 0xfd2   : > { %12418 = vmatprep.subr.mxu0 %v9125_v6  ;;  %12425 = vmatprep.subr.mxu1 %v9257_v52 }
 0xfd3   : > { %12419 = vmatpush3.msra.mxu0 %v9125_v6  ;;  %12426 = vmatpush3.msra.mxu1 %v9257_v52  ;;  %v11545_v52 = vld [vmem:[%s14655_s22 + $0x78] sm:$0xff] }
 0xfd4   : > { %12421 = vmatmul.mubr.msk.f32.vlgmr.msra.gmra.mxu0 %vm6532_vm14, %v11512_v7  ;;  %12427 = vmatprep.subr.mxu1 %v9256_v4  ;;  %v10197_v7 = vld [vmem:[%s14656_s23] sm:$0xff] }
 0xfd5   : > { %12428 = vmatpush3.msra.mxu1 %v9256_v4  ;;  %12438 = vmatprep.mubr.msk.f32.mxu0 %vm6532_vm14, %v11518_v1 }
 0xfd6   : > { %12429 = vmatprep.subr.mxu1 %v9255_v53 }
 0xfd7   : > { %12430 = vmatpush3.msra.mxu1 %v9255_v53  ;;  %v11549_v53 = vld [vmem:[%s14655_s22 + $0x88] sm:$0xff] }
 0xfde   : > { %v9223_v39 = vpop.permute.xlu0 %9222 }
0x1079   : > { %v12366_v8 = vpop.f32.mrf.mxu0 }
0x107b   : > { %v8461_v11 = vpop.f32.mrf.mxu0 }
0x107d   : > { %v12373_v12 = vpop.f32.mrf.mxu1 }
0x107e   : > { %v8560_v13 = vadd.f32 %v12373_v12, %v12366_v8 }
0x107f   : > { %v8554_v14 = vpop.f32.mrf.mxu1 }
0x1080   : > { %v8555_v10 = vadd.f32 %v8554_v14, %v8461_v11 }
0x1081   : > { %v12380_v16 = vpop.f32.mrf.mxu0 }
0x1082   : > { %v8660_v17 = vadd.f32 %v12380_v16, %v8560_v13 }
0x1083   : > { %v8650_v18 = vpop.f32.mrf.mxu0 }
0x1084   : > { %v8659_v19 = vadd.f32 %v8650_v18, %v8555_v10 }
0x1086   : > { %v12387_v20 = vpop.f32.mrf.mxu1  ;;  %v12394_v21 = vpop.f32.mrf.mxu0 }
0x1087   : > { %v8758_v22 = vadd.f32 %v12387_v20, %v8660_v17 }
0x1088   : > { %v8748_v23 = vpop.f32.mrf.mxu1  ;;  %v8834_v24 = vpop.f32.mrf.mxu0 }
0x1089   : > { %v8757_v25 = vadd.f32 %v8748_v23, %v8659_v19  ;;  %v8844_v26 = vadd.f32 %v12394_v21, %v8758_v22 }
0x108a   : > { %v12401_v27 = vpop.f32.mrf.mxu1 }
0x108b   : > { %v8843_v28 = vadd.f32 %v8834_v24, %v8757_v25  ;;  %v8936_v29 = vadd.f32 %v12401_v27, %v8844_v26  ;;  %v11519_v26 = vld [vmem:[%s14655_s22 + $0x18] sm:$0xff]  ;;  %v9351_v27 = vld [vmem:[%s14655_s22] sm:$0xff] }
0x108c   : > { %v8926_v31 = vpop.f32.mrf.mxu1 }
0x108d   : > { %v12408_v30 = vpop.f32.mrf.mxu0  ;;  %v8935_v32 = vadd.f32 %v8926_v31, %v8843_v28 }
0x108e   : > { %v9028_v33 = vadd.f32 %v12408_v30, %v8936_v29 }
0x108f   : > { %v9018_v5 = vpop.f32.mrf.mxu0 }
0x1090   : > { %v12415_v34 = vpop.f32.mrf.mxu1  ;;  %v9027_v49 = vadd.f32 %v9018_v5, %v8935_v32  ;;  %v9352_v32 = vld [vmem:[%s14655_s22 + $0x8] sm:$0xff] }
0x1091   : > { %v9120_v15 = vadd.f32 %v12415_v34, %v9028_v33  ;;  %v11528_v33 = vld [vmem:[%s14655_s22 + $0x30] sm:$0xff] }
0x1092   : > { %v9110_v9 = vpop.f32.mrf.mxu1 }
0x1093   : > { %v9119_v36 = vadd.f32 %v9110_v9, %v9027_v49  ;;  %v11525_v49 = vld [vmem:[%s14655_s22 + $0x28] sm:$0xff] }
0x1094   : > { %v12422_v35 = vpop.f32.mrf.mxu0 }
0x1095   : > { %v9212_v37 = vadd.f32 %v12422_v35, %v9120_v15  ;;  %v11532_v15 = vld [vmem:[%s14655_s22 + $0x40] sm:$0xff] }
0x1096   : > { %v9202_v40 = vpop.f32.mrf.mxu0 }
0x1097   : > { %v9226_v0 = vadd.f32 %v9223_v39, %v9212_v37  ;;  %v9211_v41 = vadd.f32 %v9202_v40, %v9119_v36  ;;  %v11529_v39 = vld [vmem:[%s14655_s22 + $0x38] sm:$0xff]  ;;  %v11533_v40 = vld [vmem:[%s14655_s22 + $0x48] sm:$0xff] }
0x1099   : > { %v9228_v43 = vmax.f32 %v9226_v0, 0.0  ;;  %v9225_v44 = vadd.f32 %v9218_v42, %v9211_v41  ;;  %v11536_v41 = vld [vmem:[%s14655_s22 + $0x50] sm:$0xff] }
0x109b   : > { %v9230_v45 = vsel %vm8357_vm15, %v9228_v43, 0.0  ;;  %v9227_v46 = vmax.f32 %v9225_v44, 0.0  ;;  %v11540_v43 = vld [vmem:[%s14655_s22 + $0x60] sm:$0xff]  ;;  %v11537_v44 = vld [vmem:[%s14655_s22 + $0x58] sm:$0xff] }
0x109c   : > { %9232 = vst.msk [vmem:[%s12814_s1 + $0x118] sm:$0xff] %vm7488_vm2, %v9230_v45 }
0x109d   : > { %v9229_v47 = vsel %vm8357_vm15, %v9227_v46, 0.0  ;;  %v11544_v46 = vld [vmem:[%s14655_s22 + $0x70] sm:$0xff] }
0x109e   : > { %9231 = vst.msk [vmem:[%s12814_s1 + $0x78] sm:$0xff] %vm7488_vm2, %v9229_v47  ;;  %v11541_v47 = vld [vmem:[%s14655_s22 + $0x68] sm:$0xff] }
0x10a3   : > { %v9234_v48 = vld [vmem:[%s12814_s1 + $0x118] sm:$0xff] }
0x10a4   : > { %9239 = vrot.lane.b32.xlu0 %v9234_v48, %s14721_s30 }
0x10a5   : > { %v9233_v50 = vld [vmem:[%s12814_s1 + $0x78] sm:$0xff] }
0x10a6   : > { %9237 = vrot.lane.b32.xlu1 %v9233_v50, %s14721_s30 }
0x1116   : > { %v9240_v38 = vpop.permute.xlu0 %9239 }
0x1117   : > { %v9244_v54 = vmax.f32 %v9234_v48, %v9240_v38 }
0x1118   : > { %v9238_v55 = vpop.permute.xlu1 %9237 }
0x1119   : > { %v9243_v56 = vmax.f32 %v9233_v50, %v9238_v55  ;;  %9249 = vrot.lane.b32.xlu0 %v9244_v54, %s14735_s2 }
0x111b   : > { %9247 = vrot.lane.b32.xlu1 %v9243_v56, %s14735_s2 }
0x111f   : > { %9364 = vrot.lane.b32.xlu1 %v9234_v48, %s12652_s12 }
0x1123   : > { %9360 = vrot.lane.b32.xlu1 %v9233_v50, %s12652_s12 }
0x1127   : > { %9457 = vrot.lane.b32.xlu1 %v9234_v48, %s14733_s9 }
0x112b   : > { %9453 = vrot.lane.b32.xlu1 %v9233_v50, %s14733_s9 }
0x112f   : > { %9553 = vrot.lane.b32.xlu1 %v9234_v48, %s12654_s28 }
0x1133   : > { %9549 = vrot.lane.b32.xlu1 %v9233_v50, %s12654_s28 }
0x1137   : > { %9652 = vrot.lane.b32.xlu1 %v9234_v48, %s14720_s4 }
0x113b   : > { %9648 = vrot.lane.b32.xlu1 %v9233_v50, %s14720_s4  ;;  %v11548_v50 = vld [vmem:[%s14655_s22 + $0x80] sm:$0xff] }
0x118b   : > { %v9250_v57 = vpop.permute.xlu0 %9249 }
0x118c   : > { %v9254_v60 = vmax.f32 %v9244_v54, %v9250_v57 }
0x118d   : > { %v9248_v58 = vpop.permute.xlu1 %9247 }
0x118e   : > { %v9253_v59 = vmax.f32 %v9243_v56, %v9248_v58 }
0x1190   : > { %12431 = vmatprep.mubr.msk.f32.mxu1 %vm7488_vm2, %v9253_v59 }
0x1191   : > { %12432 = vmatmul.mubr.msk.f32.vlgmr.msra.gmra.mxu1 %vm7488_vm2, %v9254_v60  ;;  %v9365_v8 = vpop.permute.xlu1 %9364 }
0x1192   : > { %12452 = vmatprep.mubr.msk.f32.mxu1 %vm6532_vm14, %v11524_v3 }
0x1195   : > { %v9361_v11 = vpop.permute.xlu1 %9360 }
0x1199   : > { %v9458_v12 = vpop.permute.xlu1 %9457 }
0x119d   : > { %v9454_v13 = vpop.permute.xlu1 %9453 }
0x11a1   : > { %v9554_v14 = vpop.permute.xlu1 %9553 }
0x11a5   : > { %v9550_v18 = vpop.permute.xlu1 %9549 }
0x11a9   : > { %v9653_v21 = vpop.permute.xlu1 %9652 }
0x11ad   : > { %v9649_v24 = vpop.permute.xlu1 %9648 }
0x1251   : > { %v12433_v61 = vpop.f32.mrf.mxu1 }
0x1252   : > { %9345 = vst.msk [vmem:[%s12814_s1 + $0x120] sm:$0xff] %vm6532_vm14, %v12433_v61 }
0x1253   : > { %v9335_v62 = vpop.f32.mrf.mxu1 }
0x1254   : > { %9344 = vst.msk [vmem:[%s12814_s1 + $0x80] sm:$0xff] %vm6532_vm14, %v9335_v62 }
0x1259   : > { %v14319_v63 = vld [vmem:[%s12814_s1 + $0x120] sm:$0xff] }
0x125a   : > { %9834 = vrot.lane.b32.xlu1 %v14319_v63, %s14721_s30  ;;  %9366 = vrot.lane.b32.xlu0 %v14319_v63, %s12652_s12 }
0x125b   : > { %v14349_v6 = vld [vmem:[%s12814_s1 + $0x80] sm:$0xff] }
0x125e   : > { %9926 = vrot.lane.b32.xlu1 %v14319_v63, %s12655_s3  ;;  %9459 = vrot.lane.b32.xlu0 %v14319_v63, %s14733_s9 }
0x1262   : > { %10018 = vrot.lane.b32.xlu1 %v14319_v63, %s12653_s13  ;;  %9555 = vrot.lane.b32.xlu0 %v14319_v63, %s12654_s28 }
0x1266   : > { %10110 = vrot.lane.b32.xlu1 %v14319_v63, %s14735_s2  ;;  %9654 = vrot.lane.b32.xlu0 %v14319_v63, %s14720_s4 }
0x126a   : > { %10206 = vperm.xlu1 %12614, %v10198_v2   ;;  %9362 = vrot.lane.b32.xlu0 %v14349_v6, %s12652_s12 }
0x126e   : > { %10237 = vrot.lane.b32.xlu1 %v14319_v63, %s12652_s12  ;;  %9455 = vrot.lane.b32.xlu0 %v14349_v6, %s14733_s9 }
0x1272   : > { %10330 = vrot.lane.b32.xlu1 %v14319_v63, %s14733_s9  ;;  %9551 = vrot.lane.b32.xlu0 %v14349_v6, %s12654_s28 }
0x1276   : > { %10426 = vrot.lane.b32.xlu1 %v14319_v63, %s12654_s28  ;;  %9650 = vrot.lane.b32.xlu0 %v14349_v6, %s14720_s4 }
0x127a   : > { %10524 = vrot.lane.b32.xlu1 %v14319_v63, %s14720_s4  ;;  %9832 = vrot.lane.b32.xlu0 %v14349_v6, %s14721_s30 }
0x127e   : > { %10233 = vrot.lane.b32.xlu1 %v14349_v6, %s12652_s12  ;;  %9924 = vrot.lane.b32.xlu0 %v14349_v6, %s12655_s3 }
0x1282   : > { %10326 = vrot.lane.b32.xlu1 %v14349_v6, %s14733_s9  ;;  %10016 = vrot.lane.b32.xlu0 %v14349_v6, %s12653_s13 }
0x1286   : > { %10422 = vrot.lane.b32.xlu1 %v14349_v6, %s12654_s28  ;;  %10108 = vrot.lane.b32.xlu0 %v14349_v6, %s14735_s2 }
0x128a   : > { %10520 = vrot.lane.b32.xlu1 %v14349_v6, %s14720_s4  ;;  %10201 = vperm.xlu0 %12603, %v10197_v7  }
0x12cc   : > { %v9367_v10 = vpop.permute.xlu0 %9366  ;;  %v9835_v31 = vpop.permute.xlu1 %9834 }
0x12cd   : > { %v9369_v16 = vsel %vm881_vm4, %v9365_v8, %v9367_v10 }
0x12ce   : > { %12434 = vmatprep.subr.mxu0 %v9369_v16 }
0x12cf   : > { %12435 = vmatpush3.msra.mxu0 %v9369_v16 }
0x12d0   : > { %v9460_v17 = vpop.permute.xlu0 %9459  ;;  %v9927_v35 = vpop.permute.xlu1 %9926 }
0x12d1   : > { %v9462_v28 = vsel %vm5864_vm12, %v9458_v12, %v9460_v17 }
0x12d4   : > { %v9556_v19 = vpop.permute.xlu0 %9555  ;;  %v10019_v42 = vpop.permute.xlu1 %10018 }
0x12d5   : > { %v9559_v20 = vsel %vm9557_vm1, %v9554_v14, %v9556_v19 }
0x12d6   : > { %12448 = vmatprep.subr.mxu1 %v9559_v20 }
0x12d7   : > { %12449 = vmatpush3.msra.mxu1 %v9559_v20 }
0x12d8   : > { %v9655_v22 = vpop.permute.xlu0 %9654  ;;  %v10111_v48 = vpop.permute.xlu1 %10110 }
0x12d9   : > { %v9657_v5 = vsel %vm1384_vm6, %v9653_v21, %v9655_v22 }
0x12dc   : > { %v9363_v23 = vpop.permute.xlu0 %9362 }
0x12dd   : > { %v9368_v25 = vsel %vm881_vm4, %v9361_v11, %v9363_v23 }
0x12de   : > { %12436 = vmatprep.subr.mxu0 %v9368_v25 }
0x12df   : > { %12437 = vmatpush3.msra.mxu0 %v9368_v25  ;;  %v14465_v25 = vld [vmem:[%s14715_s0 + $0x4] ss:$0 sm:$0xff] }
0x12e0   : > { %12441 = vmatprep.subr.mxu0 %v9462_v28  ;;  %v9456_v29 = vpop.permute.xlu0 %9455  ;;  %12439 = vmatmul.mubr.msk.f32.vlgmr.msra.gmra.mxu0 %vm6532_vm14, %v11519_v26  ;;  %vm10213_vm3 = vcmp.gt.f32.partialorder %v14465_v25, 0.0 }
0x12e1   : > { %12442 = vmatpush3.msra.mxu0 %v9462_v28  ;;  %v9461_v30 = vsel %vm5864_vm12, %v9454_v13, %v9456_v29  ;;  %12445 = vmatprep.mubr.msk.f32.mxu0 %vm6532_vm14, %v9351_v27 }
0x12e2   : > { %12443 = vmatprep.subr.mxu0 %v9461_v30 }
0x12e3   : > { %12444 = vmatpush3.msra.mxu0 %v9461_v30 }
0x12e4   : > { %12455 = vmatprep.subr.mxu0 %v9657_v5  ;;  %v9552_v34 = vpop.permute.xlu0 %9551  ;;  %12446 = vmatmul.mubr.msk.f32.vlgmr.msra.gmra.mxu0 %vm6532_vm14, %v9352_v32 }
0x12e5   : > { %12456 = vmatpush3.msra.mxu0 %v9657_v5  ;;  %v9558_v9 = vsel %vm9557_vm1, %v9550_v18, %v9552_v34  ;;  %12459 = vmatprep.mubr.msk.f32.mxu0 %vm6532_vm14, %v11528_v33  ;;  %v10207_v27 = vpop.permute.xlu1 %10206 }
0x12e6   : > { %12450 = vmatprep.subr.mxu1 %v9558_v9 }
0x12e7   : > { %12451 = vmatpush3.msra.mxu1 %v9558_v9 }
0x12e8   : > { %12462 = vmatprep.subr.mxu1 %v14319_v63  ;;  %v9651_v36 = vpop.permute.xlu0 %9650  ;;  %12453 = vmatmul.mubr.msk.f32.vlgmr.msra.gmra.mxu1 %vm6532_vm14, %v11525_v49 }
0x12e9   : > { %12463 = vmatpush3.msra.mxu1 %v14319_v63  ;;  %v9656_v37 = vsel %vm1384_vm6, %v9649_v24, %v9651_v36  ;;  %12466 = vmatprep.mubr.msk.f32.mxu1 %vm6532_vm14, %v11532_v15  ;;  %v11552_v15 = vld [vmem:[%s14657_s24 + $0x10] sm:$0xff]  ;;  %v11069_v36 = vld [vmem:[%s14658_s25] sm:$0xff] }
0x12ea   : > { %12457 = vmatprep.subr.mxu0 %v9656_v37  ;;  %12464 = vmatprep.subr.mxu1 %v14349_v6 }
0x12eb   : > { %12458 = vmatpush3.msra.mxu0 %v9656_v37  ;;  %12465 = vmatpush3.msra.mxu1 %v14349_v6 }
0x12ec   : > { %12469 = vmatprep.subr.mxu0 %v9835_v31  ;;  %12476 = vmatprep.subr.mxu1 %v9927_v35  ;;  %v9833_v0 = vpop.permute.xlu0 %9832 }
0x12ed   : > { %12460 = vmatmul.mubr.msk.f32.vlgmr.msra.gmra.mxu0 %vm6532_vm14, %v11529_v39  ;;  %12467 = vmatmul.mubr.msk.f32.vlgmr.msra.gmra.mxu1 %vm6532_vm14, %v11533_v40  ;;  %v11070_v39 = vld [vmem:[%s14658_s25 + $0x8] sm:$0xff]  ;;  %v10238_v40 = vpop.permute.xlu1 %10237 }
0x12ee   : > { %12470 = vmatpush3.msra.mxu0 %v9835_v31  ;;  %12477 = vmatpush3.msra.mxu1 %v9927_v35  ;;  %v10224_v35 = vld [vmem:[%s14657_s24] sm:$0xff] }
0x12ef   : > { %12471 = vmatprep.subr.mxu0 %v9833_v0  ;;  %12473 = vmatprep.mubr.msk.f32.mxu0 %vm6532_vm14, %v11536_v41 }
0x12f0   : > { %12472 = vmatpush3.msra.mxu0 %v9833_v0  ;;  %v9925_v45 = vpop.permute.xlu0 %9924  ;;  %12480 = vmatprep.mubr.msk.f32.mxu1 %vm6532_vm14, %v11540_v43 }
0x12f1   : > { %12483 = vmatprep.subr.mxu0 %v10019_v42  ;;  %12474 = vmatmul.mubr.msk.f32.vlgmr.msra.gmra.mxu0 %vm6532_vm14, %v11537_v44  ;;  %v10331_v0 = vpop.permute.xlu1 %10330 }
0x12f2   : > { %12478 = vmatprep.subr.mxu1 %v9925_v45  ;;  %12484 = vmatpush3.msra.mxu0 %v10019_v42 }
0x12f3   : > { %12479 = vmatpush3.msra.mxu1 %v9925_v45  ;;  %12487 = vmatprep.mubr.msk.f32.mxu0 %vm6532_vm14, %v11544_v46 }
0x12f4   : > { %12481 = vmatmul.mubr.msk.f32.vlgmr.msra.gmra.mxu1 %vm6532_vm14, %v11541_v47  ;;  %12490 = vmatprep.subr.mxu1 %v10111_v48  ;;  %v10017_v51 = vpop.permute.xlu0 %10016 }
0x12f5   : > { %12491 = vmatpush3.msra.mxu1 %v10111_v48  ;;  %12485 = vmatprep.subr.mxu0 %v10017_v51  ;;  %v10427_v41 = vpop.permute.xlu1 %10426 }
0x12f6   : > { %12486 = vmatpush3.msra.mxu0 %v10017_v51  ;;  %12494 = vmatprep.mubr.msk.f32.mxu1 %vm6532_vm14, %v11548_v50 }
0x12f7   : > { %12488 = vmatmul.mubr.msk.f32.vlgmr.msra.gmra.mxu0 %vm6532_vm14, %v11545_v52 }
0x12f8   : > { %v10109_v4 = vpop.permute.xlu0 %10108  ;;  %12501 = vmatprep.mubr.msk.f32.mxu0 %vm6532_vm14, %v11552_v15 }
0x12f9   : > { %12492 = vmatprep.subr.mxu1 %v10109_v4  ;;  %v10525_v42 = vpop.permute.xlu1 %10524 }
0x12fa   : > { %12493 = vmatpush3.msra.mxu1 %v10109_v4 }
0x12fb   : > { %12495 = vmatmul.mubr.msk.f32.vlgmr.msra.gmra.mxu1 %vm6532_vm14, %v11549_v53 }
0x12fc   : > { %12508 = vmatprep.mubr.msk.f32.mxu1 %vm6532_vm14, %v10224_v35 }
0x12fd   : > { %v10234_v43 = vpop.permute.xlu1 %10233 }
0x1301   : > { %v10327_v47 = vpop.permute.xlu1 %10326 }
0x1305   : > { %v10202_v30 = vpop.permute.xlu0 %10201  ;;  %v10423_v51 = vpop.permute.xlu1 %10422 }
0x1309   : > { %v10521_v53 = vpop.permute.xlu1 %10520 }
0x13a0   : > { %v12440_v38 = vpop.f32.mrf.mxu0 }
0x13a2   : > { %v9444_v54 = vpop.f32.mrf.mxu0 }
0x13a4   : > { %v12447_v55 = vpop.f32.mrf.mxu0 }
0x13a5   : > { %v9543_v56 = vadd.f32 %v12447_v55, %v12440_v38  ;;  %v11558_v55 = vld [vmem:[%s14657_s24 + $0x20] sm:$0xff] }
0x13a6   : > { %v9537_v57 = vpop.f32.mrf.mxu0 }
0x13a7   : > { %v9538_v58 = vadd.f32 %v9537_v57, %v9444_v54  ;;  %v11553_v54 = vld [vmem:[%s14657_s24 + $0x18] sm:$0xff] }
0x13a8   : > { %v12454_v59 = vpop.f32.mrf.mxu1 }
0x13a9   : > { %v9644_v60 = vadd.f32 %v12454_v59, %v9543_v56 }
0x13aa   : > { %v9634_v61 = vpop.f32.mrf.mxu1 }
0x13ab   : > { %v9643_v62 = vadd.f32 %v9634_v61, %v9538_v58  ;;  %v11562_v61 = vld [vmem:[%s14657_s24 + $0x30] sm:$0xff] }
0x13ad   : > { %v12461_v63 = vpop.f32.mrf.mxu0  ;;  %v12468_v1 = vpop.f32.mrf.mxu1 }
0x13ae   : > { %v9742_v2 = vadd.f32 %v12461_v63, %v9644_v60  ;;  %v10225_v60 = vld [vmem:[%s14657_s24 + $0x8] sm:$0xff] }
0x13af   : > { %v9732_v3 = vpop.f32.mrf.mxu0  ;;  %v9818_v6 = vpop.f32.mrf.mxu1 }
0x13b0   : > { %v9741_v7 = vadd.f32 %v9732_v3, %v9643_v62  ;;  %v9828_v8 = vadd.f32 %v12468_v1, %v9742_v2  ;;  %v11559_v2 = vld [vmem:[%s14657_s24 + $0x28] sm:$0xff]  ;;  %v11566_v3 = vld [vmem:[%s14657_s24 + $0x40] sm:$0xff] }
0x13b1   : > { %v12475_v11 = vpop.f32.mrf.mxu0 }
0x13b2   : > { %v9827_v12 = vadd.f32 %v9818_v6, %v9741_v7  ;;  %v9920_v14 = vadd.f32 %v12475_v11, %v9828_v8  ;;  %v11563_v11 = vld [vmem:[%s14657_s24 + $0x38] sm:$0xff] }
0x13b3   : > { %v9910_v13 = vpop.f32.mrf.mxu0 }
0x13b4   : > { %v12482_v10 = vpop.f32.mrf.mxu1  ;;  %v9919_v16 = vadd.f32 %v9910_v13, %v9827_v12  ;;  %v11567_v12 = vld [vmem:[%s14657_s24 + $0x48] sm:$0xff] }
0x13b5   : > { %v10012_v19 = vadd.f32 %v12482_v10, %v9920_v14  ;;  %v11570_v14 = vld [vmem:[%s14657_s24 + $0x50] sm:$0xff] }
0x13b6   : > { %v10002_v17 = vpop.f32.mrf.mxu1 }
0x13b7   : > { %v12489_v18 = vpop.f32.mrf.mxu0  ;;  %v10011_v21 = vadd.f32 %v10002_v17, %v9919_v16  ;;  %v11574_v16 = vld [vmem:[%s14657_s24 + $0x60] sm:$0xff]  ;;  %v11571_v17 = vld [vmem:[%s14657_s24 + $0x58] sm:$0xff] }
0x13b8   : > { %v10104_v22 = vadd.f32 %v12489_v18, %v10012_v19  ;;  %v11578_v19 = vld [vmem:[%s14657_s24 + $0x70] sm:$0xff] }
0x13b9   : > { %v10094_v20 = vpop.f32.mrf.mxu0 }
0x13ba   : > { %v10103_v24 = vadd.f32 %v10094_v20, %v10011_v21  ;;  %v11575_v20 = vld [vmem:[%s14657_s24 + $0x68] sm:$0xff] }
0x13bb   : > { %v12496_v23 = vpop.f32.mrf.mxu1 }
0x13bc   : > { %v10196_v26 = vadd.f32 %v12496_v23, %v10104_v22  ;;  %v11582_v22 = vld [vmem:[%s14657_s24 + $0x80] sm:$0xff] }
0x13bd   : > { %v10186_v28 = vpop.f32.mrf.mxu1 }
0x13be   : > { %v10210_v29 = vadd.f32 %v10207_v27, %v10196_v26  ;;  %v10195_v31 = vadd.f32 %v10186_v28, %v10103_v24  ;;  %v11579_v24 = vld [vmem:[%s14657_s24 + $0x78] sm:$0xff]  ;;  %v11583_v27 = vld [vmem:[%s14657_s24 + $0x88] sm:$0xff] }
0x13c0   : > { %v10212_v32 = vmax.f32 %v10210_v29, 0.0  ;;  %v10209_v33 = vadd.f32 %v10202_v30, %v10195_v31 }
0x13c2   : > { %v10217_v5 = vsel %vm10213_vm3, %v10212_v32, 0.0  ;;  %v10211_v34 = vmax.f32 %v10209_v33, 0.0 }
0x13c3   : > { %10219 = vst.msk [vmem:[%s12814_s1 + $0x128] sm:$0xff] %vm6532_vm14, %v10217_v5 }
0x13c4   : > { %v10216_v9 = vsel %vm10213_vm3, %v10211_v34, 0.0 }
0x13c5   : > { %10218 = vst.msk [vmem:[%s12814_s1 + $0x88] sm:$0xff] %vm6532_vm14, %v10216_v9 }
0x13ca   : > { %v14477_v49 = vld [vmem:[%s12814_s1 + $0x128] sm:$0xff] }
0x13cb   : > { %10706 = vrot.lane.b32.xlu1 %v14477_v49, %s14721_s30  ;;  %10239 = vrot.lane.b32.xlu0 %v14477_v49, %s12652_s12 }
0x13cc   : > { %v14507_v37 = vld [vmem:[%s12814_s1 + $0x88] sm:$0xff] }
0x13cf   : > { %10798 = vrot.lane.b32.xlu1 %v14477_v49, %s12655_s3  ;;  %10332 = vrot.lane.b32.xlu0 %v14477_v49, %s14733_s9 }
0x13d3   : > { %10890 = vrot.lane.b32.xlu1 %v14477_v49, %s12653_s13  ;;  %10428 = vrot.lane.b32.xlu0 %v14477_v49, %s12654_s28 }
0x13d7   : > { %10982 = vrot.lane.b32.xlu1 %v14477_v49, %s14735_s2  ;;  %10526 = vrot.lane.b32.xlu0 %v14477_v49, %s14720_s4 }
0x13db   : > { %11073 = vperm.xlu1 %12614, %v11069_v36   ;;  %10235 = vrot.lane.b32.xlu0 %v14507_v37, %s12652_s12 }
0x13df   : > { %10328 = vrot.lane.b32.xlu0 %v14507_v37, %s14733_s9 }
0x13e3   : > { %10424 = vrot.lane.b32.xlu0 %v14507_v37, %s12654_s28 }
0x13e7   : > { %10522 = vrot.lane.b32.xlu0 %v14507_v37, %s14720_s4 }
0x13eb   : > { %10704 = vrot.lane.b32.xlu0 %v14507_v37, %s14721_s30 }
0x13ef   : > { %10796 = vrot.lane.b32.xlu0 %v14507_v37, %s12655_s3 }
0x13f3   : > { %10888 = vrot.lane.b32.xlu0 %v14507_v37, %s12653_s13 }
0x13f7   : > { %10980 = vrot.lane.b32.xlu0 %v14507_v37, %s14735_s2 }
0x13fb   : > { %11078 = vperm.xlu0 %12603, %v11070_v39  }
0x143d   : > { %v10240_v44 = vpop.permute.xlu0 %10239  ;;  %v10707_v58 = vpop.permute.xlu1 %10706 }
0x143e   : > { %v10242_v45 = vsel %vm881_vm4, %v10238_v40, %v10240_v44 }
0x143f   : > { %12497 = vmatprep.subr.mxu0 %v10242_v45 }
0x1440   : > { %12498 = vmatpush3.msra.mxu0 %v10242_v45 }
0x1441   : > { %v10333_v46 = vpop.permute.xlu0 %10332  ;;  %v10799_v6 = vpop.permute.xlu1 %10798 }
0x1442   : > { %v10335_v48 = vsel %vm5864_vm12, %v10331_v0, %v10333_v46 }
0x1443   : > { %12504 = vmatprep.subr.mxu1 %v10335_v48 }
0x1444   : > { %12505 = vmatpush3.msra.mxu1 %v10335_v48 }
0x1445   : > { %v10429_v50 = vpop.permute.xlu0 %10428  ;;  %v10891_v10 = vpop.permute.xlu1 %10890 }
0x1446   : > { %v10431_v56 = vsel %vm9557_vm1, %v10427_v41, %v10429_v50 }
0x1449   : > { %v10527_v52 = vpop.permute.xlu0 %10526  ;;  %v10983_v21 = vpop.permute.xlu1 %10982 }
0x144a   : > { %v10529_v62 = vsel %vm1384_vm6, %v10525_v42, %v10527_v52 }
0x144d   : > { %v10236_v4 = vpop.permute.xlu0 %10235 }
0x144e   : > { %v10241_v38 = vsel %vm881_vm4, %v10234_v43, %v10236_v4 }
0x144f   : > { %12499 = vmatprep.subr.mxu0 %v10241_v38 }
0x1450   : > { %12500 = vmatpush3.msra.mxu0 %v10241_v38 }
0x1451   : > { %12511 = vmatprep.subr.mxu0 %v10431_v56  ;;  %v10329_v57 = vpop.permute.xlu0 %10328  ;;  %12502 = vmatmul.mubr.msk.f32.vlgmr.msra.gmra.mxu0 %vm6532_vm14, %v11553_v54 }
0x1452   : > { %12512 = vmatpush3.msra.mxu0 %v10431_v56  ;;  %v10334_v59 = vsel %vm5864_vm12, %v10327_v47, %v10329_v57  ;;  %12515 = vmatprep.mubr.msk.f32.mxu0 %vm6532_vm14, %v11558_v55 }
0x1453   : > { %12506 = vmatprep.subr.mxu1 %v10334_v59 }
0x1454   : > { %12507 = vmatpush3.msra.mxu1 %v10334_v59 }
0x1455   : > { %12518 = vmatprep.subr.mxu1 %v10529_v62  ;;  %v10425_v63 = vpop.permute.xlu0 %10424  ;;  %12509 = vmatmul.mubr.msk.f32.vlgmr.msra.gmra.mxu1 %vm6532_vm14, %v10225_v60 }
0x1456   : > { %12519 = vmatpush3.msra.mxu1 %v10529_v62  ;;  %v10430_v1 = vsel %vm9557_vm1, %v10423_v51, %v10425_v63  ;;  %12522 = vmatprep.mubr.msk.f32.mxu1 %vm6532_vm14, %v11562_v61  ;;  %v11074_v59 = vpop.permute.xlu1 %11073 }
0x1457   : > { %12513 = vmatprep.subr.mxu0 %v10430_v1 }
0x1458   : > { %12514 = vmatpush3.msra.mxu0 %v10430_v1 }
0x1459   : > { %12525 = vmatprep.subr.mxu0 %v14477_v49  ;;  %v10523_v7 = vpop.permute.xlu0 %10522  ;;  %12516 = vmatmul.mubr.msk.f32.vlgmr.msra.gmra.mxu0 %vm6532_vm14, %v11559_v2 }
0x145a   : > { %12526 = vmatpush3.msra.mxu0 %v14477_v49  ;;  %v10528_v8 = vsel %vm1384_vm6, %v10521_v53, %v10523_v7  ;;  %12529 = vmatprep.mubr.msk.f32.mxu0 %vm6532_vm14, %v11566_v3  ;;  %v11111_v7 = vld [vmem:[%s14659_s26] sm:$0xff] }
0x145b   : > { %12520 = vmatprep.subr.mxu1 %v10528_v8  ;;  %12527 = vmatprep.subr.mxu0 %v14507_v37 }
0x145c   : > { %12521 = vmatpush3.msra.mxu1 %v10528_v8  ;;  %12528 = vmatpush3.msra.mxu0 %v14507_v37 }
0x145d   : > { %12532 = vmatprep.subr.mxu1 %v10707_v58  ;;  %12539 = vmatprep.subr.mxu0 %v10799_v6  ;;  %v10705_v13 = vpop.permute.xlu0 %10704 }
0x145e   : > { %12523 = vmatmul.mubr.msk.f32.vlgmr.msra.gmra.mxu1 %vm6532_vm14, %v11563_v11  ;;  %12530 = vmatmul.mubr.msk.f32.vlgmr.msra.gmra.mxu0 %vm6532_vm14, %v11567_v12 }
0x145f   : > { %12533 = vmatpush3.msra.mxu1 %v10707_v58  ;;  %12540 = vmatpush3.msra.mxu0 %v10799_v6  ;;  %v11112_v6 = vld [vmem:[%s14659_s26 + $0x8] sm:$0xff] }
0x1460   : > { %12534 = vmatprep.subr.mxu1 %v10705_v13  ;;  %12536 = vmatprep.mubr.msk.f32.mxu1 %vm6532_vm14, %v11570_v14 }
0x1461   : > { %12535 = vmatpush3.msra.mxu1 %v10705_v13  ;;  %v10797_v18 = vpop.permute.xlu0 %10796  ;;  %12543 = vmatprep.mubr.msk.f32.mxu0 %vm6532_vm14, %v11574_v16 }
0x1462   : > { %12546 = vmatprep.subr.mxu1 %v10891_v10  ;;  %12537 = vmatmul.mubr.msk.f32.vlgmr.msra.gmra.mxu1 %vm6532_vm14, %v11571_v17 }
0x1463   : > { %12541 = vmatprep.subr.mxu0 %v10797_v18  ;;  %12547 = vmatpush3.msra.mxu1 %v10891_v10 }
0x1464   : > { %12542 = vmatpush3.msra.mxu0 %v10797_v18  ;;  %12550 = vmatprep.mubr.msk.f32.mxu1 %vm6532_vm14, %v11578_v19 }
0x1465   : > { %12553 = vmatprep.subr.mxu0 %v10983_v21  ;;  %12544 = vmatmul.mubr.msk.f32.vlgmr.msra.gmra.mxu0 %vm6532_vm14, %v11575_v20  ;;  %v10889_v23 = vpop.permute.xlu0 %10888 }
0x1466   : > { %12554 = vmatpush3.msra.mxu0 %v10983_v21  ;;  %12548 = vmatprep.subr.mxu1 %v10889_v23 }
0x1467   : > { %12549 = vmatpush3.msra.mxu1 %v10889_v23  ;;  %12557 = vmatprep.mubr.msk.f32.mxu0 %vm6532_vm14, %v11582_v22 }
0x1468   : > { %12551 = vmatmul.mubr.msk.f32.vlgmr.msra.gmra.mxu1 %vm6532_vm14, %v11579_v24  ;;  %12560 = vmatprep.subr.mxu1 %v11112_v6 }
0x1469   : > { %v10981_v26 = vpop.permute.xlu0 %10980  ;;  %12561 = vmatpush3.msra.mxu1 %v11112_v6 }
0x146a   : > { %12555 = vmatprep.subr.mxu0 %v10981_v26  ;;  %12562 = vmatprep.subr.mxu1 %v11111_v7 }
0x146b   : > { %12556 = vmatpush3.msra.mxu0 %v10981_v26  ;;  %12563 = vmatpush3.msra.mxu1 %v11111_v7 }
0x146c   : > { %12558 = vmatmul.mubr.msk.f32.vlgmr.msra.gmra.mxu0 %vm6532_vm14, %v11583_v27 }
0x1476   : > { %v11079_v55 = vpop.permute.xlu0 %11078 }
0x1511   : > { %v12503_v28 = vpop.f32.mrf.mxu0 }
0x1513   : > { %v10317_v29 = vpop.f32.mrf.mxu0 }
0x1515   : > { %v12510_v31 = vpop.f32.mrf.mxu1 }
0x1516   : > { %v10416_v30 = vadd.f32 %v12510_v31, %v12503_v28 }
0x1517   : > { %v10410_v32 = vpop.f32.mrf.mxu1 }
0x1518   : > { %v10411_v33 = vadd.f32 %v10410_v32, %v10317_v29 }
0x1519   : > { %v12517_v5 = vpop.f32.mrf.mxu0 }
0x151a   : > { %v10516_v34 = vadd.f32 %v12517_v5, %v10416_v30 }
0x151b   : > { %v10506_v9 = vpop.f32.mrf.mxu0 }
0x151c   : > { %v10515_v49 = vadd.f32 %v10506_v9, %v10411_v33 }
0x151e   : > { %v12524_v15 = vpop.f32.mrf.mxu1  ;;  %v12531_v35 = vpop.f32.mrf.mxu0 }
0x151f   : > { %v10614_v36 = vadd.f32 %v12524_v15, %v10516_v34 }
0x1520   : > { %v10604_v37 = vpop.f32.mrf.mxu1  ;;  %v10690_v39 = vpop.f32.mrf.mxu0 }
0x1521   : > { %v10613_v40 = vadd.f32 %v10604_v37, %v10515_v49  ;;  %v10700_v0 = vadd.f32 %v12531_v35, %v10614_v36 }
0x1522   : > { %v12538_v41 = vpop.f32.mrf.mxu1 }
0x1523   : > { %v10699_v42 = vadd.f32 %v10690_v39, %v10613_v40  ;;  %v10792_v43 = vadd.f32 %v12538_v41, %v10700_v0 }
0x1524   : > { %v10782_v44 = vpop.f32.mrf.mxu1 }
0x1525   : > { %v12545_v45 = vpop.f32.mrf.mxu0  ;;  %v10791_v46 = vadd.f32 %v10782_v44, %v10699_v42 }
0x1526   : > { %v10884_v47 = vadd.f32 %v12545_v45, %v10792_v43 }
0x1527   : > { %v10874_v48 = vpop.f32.mrf.mxu0 }
0x1528   : > { %v12552_v50 = vpop.f32.mrf.mxu1  ;;  %v10883_v52 = vadd.f32 %v10874_v48, %v10791_v46 }
0x1529   : > { %v10976_v4 = vadd.f32 %v12552_v50, %v10884_v47 }
0x152a   : > { %v10966_v51 = vpop.f32.mrf.mxu1 }
0x152b   : > { %v10975_v38 = vadd.f32 %v10966_v51, %v10883_v52 }
0x152c   : > { %v12559_v53 = vpop.f32.mrf.mxu0 }
0x152d   : > { %v11068_v54 = vadd.f32 %v12559_v53, %v10976_v4 }
0x152e   : > { %v11058_v56 = vpop.f32.mrf.mxu0 }
0x152f   : > { %v11082_v57 = vadd.f32 %v11079_v55, %v11068_v54  ;;  %v11067_v58 = vadd.f32 %v11058_v56, %v10975_v38 }
0x1531   : > { %v11084_v60 = vmax.f32 %v11082_v57, 0.0  ;;  %v11081_v61 = vadd.f32 %v11074_v59, %v11067_v58 }
0x1533   : > { %v11086_v62 = vsel %vm10213_vm3, %v11084_v60, 0.0  ;;  %v11083_v63 = vmax.f32 %v11081_v61, 0.0 }
0x1534   : > { %11088 = vst.msk [vmem:[%s12814_s1 + $0x130] sm:$0xff] %vm6532_vm14, %v11086_v62 }
0x1535   : > { %v11085_v1 = vsel %vm10213_vm3, %v11083_v63, 0.0 }
0x1536   : > { %11087 = vst.msk [vmem:[%s12814_s1 + $0x90] sm:$0xff] %vm6532_vm14, %v11085_v1 }
0x153b   : > { %v11090_v2 = vld [vmem:[%s12814_s1 + $0x130] sm:$0xff] }
0x153c   : > { %11095 = vrot.lane.b32.xlu0 %v11090_v2, %s14721_s30 }
0x153d   : > { %v11089_v3 = vld [vmem:[%s12814_s1 + $0x90] sm:$0xff] }
0x153e   : > { %11093 = vrot.lane.b32.xlu1 %v11089_v3, %s14721_s30 }
0x15ae   : > { %v11096_v25 = vpop.permute.xlu0 %11095 }
0x15af   : > { %v11100_v8 = vmax.f32 %v11090_v2, %v11096_v25 }
0x15b0   : > { %v11094_v11 = vpop.permute.xlu1 %11093 }
0x15b1   : > { %v11099_v12 = vmax.f32 %v11089_v3, %v11094_v11  ;;  %11105 = vrot.lane.b32.xlu0 %v11100_v8, %s12653_s13 }
0x15b3   : > { %11103 = vrot.lane.b32.xlu1 %v11099_v12, %s12653_s13 }
0x1623   : > { %v11106_v13 = vpop.permute.xlu0 %11105 }
0x1624   : > { %v11110_v16 = vmax.f32 %v11100_v8, %v11106_v13 }
0x1625   : > { %v11104_v14 = vpop.permute.xlu1 %11103 }
0x1626   : > { %v11109_v10 = vmax.f32 %v11099_v12, %v11104_v14 }
0x1628   : > { %12564 = vmatprep.mubr.msk.f32.mxu1 %vm6532_vm14, %v11109_v10 }
0x1629   : > { %12565 = vmatmul.mubr.msk.f32.vlgmr.msra.gmra.mxu1 %vm6532_vm14, %v11110_v16 }
0x16e9   : > { %v12566_v17 = vpop.f32.mrf.mxu1 }
0x16ea   : > { %11195 = vst.msk [vmem:[%s12814_s1 + $0x138] sm:$0xff] %vm4274_vm7, %v12566_v17 }
0x16eb   : > { %v11185_v18 = vpop.f32.mrf.mxu1 }
0x16ec   : > { %11194 = vst.msk [vmem:[%s12814_s1 + $0x98] sm:$0xff] %vm4274_vm7, %v11185_v18 }
0x16ed PF: > { %s37_s7 = sadd.s32 1, %s12627_s7  }
0x16ee   : > { %p34_p4 = scmp.ge.s32.totalorder %s37_s7, 4  }
0x16f0   :  { %36 = sbr.rel (!%p34_p4) target bundleno = 16 (0x10), region = 238 }

</bundles_post_ra>
